<compile_context>
chip_gen: v7x
topology: tpu7x:2x2x1
jax: 0.10.0
libtpu: 0.0.40
codegen_flags: <defaults>
</compile_context>

<pallas_src>
import functools

import jax
import jax.numpy as jnp
from jax.experimental import pallas as pl
from jax.experimental.pallas import tpu as pltpu

INPUT_SIZE = 1
HIDDEN_SIZE = 50
NUM_LAYERS = 2

NGATES = 4                          # i, f, o, g
NCELLS = 2                          # two LSTM layers fused into one matmul
GATE_PAD = 128                      # each (gate, layer) slot = one lane block
ZC = NGATES * NCELLS * GATE_PAD     # 1024 fused gate cols [i0,i1,f0,f1,o0,o1,g0,g1]
HP = 128                            # padded state lanes: layer-0 real in [0,50),
                                    # layer-1 real in [50,100), rest exactly 0
N_SIG = 3 * NCELLS * GATE_PAD       # i/f/o slots -> one contiguous sigmoid slab


def _lstm_fc_kernel(x_ref, wc_ref, vecs_ref, out_ref, *, batch, seq_len):
  """Fused 2-layer LSTM over the full sequence + Linear on the last hidden.

  x_ref:    (T, B, 1)    time-major input (f32)
  wc_ref:   (128, 1024)  bf16 fused recurrent weights:
                         rows [0,50)   = [Whh0 | Wih1] (gate-interleaved cols)
                         rows [50,100) = [  0  | Whh1]
  vecs_ref: (8, 1024)    f32: row0 = W_ih0 (x projection, layer-0 cols),
                         row1 = fused bias (b0 in layer-0 cols, b1 in layer-1
                         cols), row2[:128] = fc weights (aligned to h1 lanes
                         [50,100)), row3[0] = fc bias.
  out_ref:  (B, 1)
  """
  B, T = batch, seq_len
  GP = GATE_PAD

  w_combo = wc_ref[...]                                     # (128, 1024) bf16
  w0_row = vecs_ref[0:1, :]                                 # (1, 1024) f32
  # Hoisted bias broadcast (JAX does not CSE broadcast_in_dim inside loops).
  bias_b = jnp.broadcast_to(vecs_ref[1:2, :], (B, ZC))      # (B, 1024)
  wfc_vec = vecs_ref[2:3, 0:HP]                             # (1, 128)
  bfc = vecs_ref[3:4, 0:1]                                  # (1, 1)

  # Hoisted input projection: addends[j] feeds iteration j — layer-0 columns
  # get x(j)*W_ih0 + b0, layer-1 columns get b1.  The extra entry feeds the
  # epilogue iteration (its layer-0 half is discarded).  Pure VPU work,
  # independent of the recurrence, so it never sits on the serial chain.
  addends = [x_ref[t].astype(jnp.float32) * w0_row + bias_b for t in range(T)]
  addends.append(bias_b)

  def gate_update(sg, tg, layer, c):
    # Every slice is a whole 128-lane block -> pure vreg views.
    i = sg[:, (0 + layer) * GP:(1 + layer) * GP]
    f = sg[:, (2 + layer) * GP:(3 + layer) * GP]
    o = sg[:, (4 + layer) * GP:(5 + layer) * GP]
    g = tg[:, (0 + layer) * GP:(1 + layer) * GP]
    c_new = f * c + i * g
    h_new = o * jnp.tanh(c_new)
    return h_new, c_new

  zeros = jnp.zeros((B, HP), jnp.float32)
  h0, c0, h1, c1 = zeros, zeros, zeros, zeros

  # Skewed, fully-unrolled schedule (T is a small static constant).
  # Iteration j computes layer-0 of timestep j and layer-1 of timestep j-1;
  # both consume h0(j-1) / h1(j-2), so one fused matmul drives both cells.
  for j in range(T + 1):
    if j == 0:
      # Prologue: h0(-1) = h1(-2) = 0, so the matmul term vanishes entirely.
      zc = addends[0]
    else:
      # h1's real lanes live at [50,100) by construction (inside h0's dead
      # lanes), so the fused K=128 LHS is one VPU add — no roll, no concat.
      lhs = (h0 + h1).astype(jnp.bfloat16)
      zc = jnp.dot(lhs, w_combo,
                   preferred_element_type=jnp.float32) + addends[j]
    # One sigmoid over the contiguous [i0,i1,f0,f1,o0,o1] slab and one tanh
    # over [g0,g1] cover BOTH cells (gate math stays f32 -> v5e-safe).
    sg = jax.nn.sigmoid(zc[:, :N_SIG])
    tg = jnp.tanh(zc[:, N_SIG:])
    if j > 0:                               # layer-1 update for timestep j-1
      h1, c1 = gate_update(sg, tg, 1, c1)
    if j < T:                               # layer-0 update for timestep j
      h0, c0 = gate_update(sg, tg, 0, c0)

  # fc on the last timestep's top-layer hidden state: VPU multiply + XLU
  # cross-lane reduce (no N=1 MXU launch).  wfc is aligned to h1's real lanes
  # and zero elsewhere, so dead lanes contribute nothing.
  out = jnp.sum(h1 * wfc_vec, axis=-1, keepdims=True) + bfc
  out_ref[...] = out.astype(out_ref.dtype)


def lstm_model_forward(x, kparams):
  """x: (B, T, INPUT_SIZE) float32 -> (B, 1) float32."""
  B, T, _ = x.shape
  # Time-major layout so the kernel reads one (B, 1) step per leading index.
  x_tm = jnp.transpose(x, (1, 0, 2)).astype(jnp.float32)    # (T, B, 1)
  kernel = functools.partial(_lstm_fc_kernel, batch=B, seq_len=T)
  vmem = pl.BlockSpec(memory_space=pltpu.MemorySpace.VMEM)
  return pl.pallas_call(
      kernel,
      out_shape=jax.ShapeDtypeStruct((B, 1), jnp.float32),
      in_specs=[vmem, vmem, vmem],
      out_specs=vmem,
  )(x_tm, kparams["w_combo"], kparams["vecs"])


# ----------------------------------------------------------------------------
# Parameter generation (PyTorch layout) + packing into the fused kernel layout.
# ----------------------------------------------------------------------------
_PT_GATE_IDX = {"i": 0, "f": 1, "g": 2, "o": 3}   # PyTorch row-chunk order
_GATE_ORDER = ("i", "f", "o", "g")                # our paired column-block order


def _pt_gate(w, gate):
  H = HIDDEN_SIZE
  g = _PT_GATE_IDX[gate]
  return w[g * H:(g + 1) * H]


def init_params(key, input_size=INPUT_SIZE, hidden_size=HIDDEN_SIZE):
  """PyTorch-layout params, uniform(-1/sqrt(H), 1/sqrt(H)). Gate order [i,f,g,o]."""
  H = hidden_size
  stdv = 1.0 / jnp.sqrt(jnp.float32(H))
  ks = jax.random.split(key, 10)

  def u(k, shape):
    return jax.random.uniform(k, shape, jnp.float32, -stdv, stdv)

  return {
      "wih0": u(ks[0], (4 * H, input_size)),          # (4H, D_in)
      "whh0": u(ks[1], (4 * H, H)),                   # (4H, H)
      "b0": u(ks[2], (4 * H,)) + u(ks[3], (4 * H,)),  # b_ih + b_hh
      "wih1": u(ks[4], (4 * H, H)),
      "whh1": u(ks[5], (4 * H, H)),
      "b1": u(ks[6], (4 * H,)) + u(ks[7], (4 * H,)),
      "wfc": u(ks[8], (1, H)),
      "bfc": u(ks[9], (1,)),
  }


def prepare_kernel_params(raw):
  """Pack PyTorch-layout params into the fused, lane-aligned kernel layout.

  Column layout (1024 = 8 blocks of 128): [i0,i1,f0,f1,o0,o1,g0,g1].
  Layer-0 slots use lanes [0,50) of their block; layer-1 slots use lanes
  [50,100), so layer-1 state lands in layer-0's dead lanes and the fused matmul
  LHS is simply h0 + h1.  All padding is EXACTLY zero (dead-lane invariant).
  """
  H = HIDDEN_SIZE
  wc = jnp.zeros((HP, ZC), jnp.float32)
  vecs = jnp.zeros((8, ZC), jnp.float32)
  for gi, gate in enumerate(_GATE_ORDER):
    c0 = (2 * gi + 0) * GATE_PAD          # layer-0 block, lanes [0, H)
    c1 = (2 * gi + 1) * GATE_PAD + H      # layer-1 block, lanes [H, 2H)
    wc = wc.at[0:H, c0:c0 + H].set(_pt_gate(raw["whh0"], gate).T)
    wc = wc.at[0:H, c1:c1 + H].set(_pt_gate(raw["wih1"], gate).T)
    wc = wc.at[H:2 * H, c1:c1 + H].set(_pt_gate(raw["whh1"], gate).T)
    vecs = vecs.at[0, c0:c0 + H].set(_pt_gate(raw["wih0"], gate)[:, 0])
    vecs = vecs.at[1, c0:c0 + H].set(_pt_gate(raw["b0"], gate))
    vecs = vecs.at[1, c1:c1 + H].set(_pt_gate(raw["b1"], gate))
  vecs = vecs.at[2, H:2 * H].set(raw["wfc"][0])     # fc weights on h1's lanes
  vecs = vecs.at[3, 0].set(raw["bfc"][0])
  return {"w_combo": wc.astype(jnp.bfloat16), "vecs": vecs}


def reference_forward(x, raw):
  """Pure-JAX f32 reference with the original PyTorch layout."""
  H = HIDDEN_SIZE
  B, T, _ = x.shape

  def cell(x_t, h, c, wih, whh, b):
    z = x_t @ wih.T + h @ whh.T + b
    i = jax.nn.sigmoid(z[:, 0 * H:1 * H])
    f = jax.nn.sigmoid(z[:, 1 * H:2 * H])
    g = jnp.tanh(z[:, 2 * H:3 * H])
    o = jax.nn.sigmoid(z[:, 3 * H:4 * H])
    c = f * c + i * g
    h = o * jnp.tanh(c)
    return h, c

  h0 = c0 = h1 = c1 = jnp.zeros((B, H), jnp.float32)
  for t in range(T):
    h0, c0 = cell(x[:, t, :], h0, c0, raw["wih0"], raw["whh0"], raw["b0"])
    h1, c1 = cell(h0, h1, c1, raw["wih1"], raw["whh1"], raw["b1"])
  return h1 @ raw["wfc"].T + raw["bfc"]


if __name__ == "__main__":
  key = jax.random.PRNGKey(0)
  k_x, k_p = jax.random.split(key)

  B, T = 2, 8
  x = jax.random.normal(k_x, (B, T, INPUT_SIZE), jnp.float32)
  raw_params = init_params(k_p)
  kernel_params = prepare_kernel_params(raw_params)

  out = lstm_model_forward(x, kernel_params)
  out = jax.block_until_ready(out)

  ref = reference_forward(x, raw_params)
  assert out.shape == (B, 1), out.shape
  # bf16 MXU operands => relaxed from the old 1e-4 pure-f32 tolerance.
  assert jnp.allclose(out, ref, atol=2e-2, rtol=2e-2), (out, ref)

  print("KERNEL_OK")
</pallas_src>

<mosaic_0001>
module attributes {stable_mosaic.version = 11 : i64} {
  func.func @_lstm_fc_kernel(%arg0: memref<8x2x1xf32, #tpu.memory_space<vmem>>, %arg1: memref<128x1024xbf16, #tpu.memory_space<vmem>>, %arg2: memref<8x1024xf32, #tpu.memory_space<vmem>>, %arg3: memref<2x1xf32, #tpu.memory_space<vmem>>) attributes {dimension_semantics = [], scalar_prefetch = 0 : i64, scratch_operands = 0 : i64, tpu.core_type = #tpu.core_type<tc>} {
    %c0 = arith.constant 0 : index
    %c0_0 = arith.constant 0 : index
    %0 = vector.load %arg1[%c0, %c0_0] : memref<128x1024xbf16, #tpu.memory_space<vmem>>, vector<128x1024xbf16>
    %c0_1 = arith.constant 0 : index
    %c0_2 = arith.constant 0 : index
    %1 = vector.load %arg2[%c0_1, %c0_2] : memref<8x1024xf32, #tpu.memory_space<vmem>>, vector<1x1024xf32>
    %c1 = arith.constant 1 : index
    %c0_3 = arith.constant 0 : index
    %2 = vector.load %arg2[%c1, %c0_3] : memref<8x1024xf32, #tpu.memory_space<vmem>>, vector<1x1024xf32>
    %3 = vector.shape_cast %2 : vector<1x1024xf32> to vector<1x1024xf32>
    %4 = vector.broadcast %3 : vector<1x1024xf32> to vector<2x1024xf32>
    %c2 = arith.constant 2 : index
    %c0_4 = arith.constant 0 : index
    %5 = vector.load %arg2[%c2, %c0_4] : memref<8x1024xf32, #tpu.memory_space<vmem>>, vector<1x128xf32>
    %c3 = arith.constant 3 : index
    %c0_5 = arith.constant 0 : index
    %6 = vector.load %arg2[%c3, %c0_5] : memref<8x1024xf32, #tpu.memory_space<vmem>>, vector<1x1xf32>
    %c0_6 = arith.constant 0 : index
    %c0_7 = arith.constant 0 : index
    %c0_8 = arith.constant 0 : index
    %7 = vector.load %arg0[%c0_6, %c0_7, %c0_8] : memref<8x2x1xf32, #tpu.memory_space<vmem>>, vector<1x2x1xf32>
    %8 = vector.shape_cast %7 : vector<1x2x1xf32> to vector<2x1xf32>
    %9 = vector.broadcast %8 : vector<2x1xf32> to vector<2x1024xf32>
    %10 = vector.broadcast %1 : vector<1x1024xf32> to vector<2x1024xf32>
    %11 = arith.mulf %9, %10 : vector<2x1024xf32>
    %12 = arith.addf %11, %4 : vector<2x1024xf32>
    %c1_9 = arith.constant 1 : index
    %c0_10 = arith.constant 0 : index
    %c0_11 = arith.constant 0 : index
    %13 = vector.load %arg0[%c1_9, %c0_10, %c0_11] : memref<8x2x1xf32, #tpu.memory_space<vmem>>, vector<1x2x1xf32>
    %14 = vector.shape_cast %13 : vector<1x2x1xf32> to vector<2x1xf32>
    %15 = vector.broadcast %14 : vector<2x1xf32> to vector<2x1024xf32>
    %16 = vector.broadcast %1 : vector<1x1024xf32> to vector<2x1024xf32>
    %17 = arith.mulf %15, %16 : vector<2x1024xf32>
    %18 = arith.addf %17, %4 : vector<2x1024xf32>
    %c2_12 = arith.constant 2 : index
    %c0_13 = arith.constant 0 : index
    %c0_14 = arith.constant 0 : index
    %19 = vector.load %arg0[%c2_12, %c0_13, %c0_14] : memref<8x2x1xf32, #tpu.memory_space<vmem>>, vector<1x2x1xf32>
    %20 = vector.shape_cast %19 : vector<1x2x1xf32> to vector<2x1xf32>
    %21 = vector.broadcast %20 : vector<2x1xf32> to vector<2x1024xf32>
    %22 = vector.broadcast %1 : vector<1x1024xf32> to vector<2x1024xf32>
    %23 = arith.mulf %21, %22 : vector<2x1024xf32>
    %24 = arith.addf %23, %4 : vector<2x1024xf32>
    %c3_15 = arith.constant 3 : index
    %c0_16 = arith.constant 0 : index
    %c0_17 = arith.constant 0 : index
    %25 = vector.load %arg0[%c3_15, %c0_16, %c0_17] : memref<8x2x1xf32, #tpu.memory_space<vmem>>, vector<1x2x1xf32>
    %26 = vector.shape_cast %25 : vector<1x2x1xf32> to vector<2x1xf32>
    %27 = vector.broadcast %26 : vector<2x1xf32> to vector<2x1024xf32>
    %28 = vector.broadcast %1 : vector<1x1024xf32> to vector<2x1024xf32>
    %29 = arith.mulf %27, %28 : vector<2x1024xf32>
    %30 = arith.addf %29, %4 : vector<2x1024xf32>
    %c4 = arith.constant 4 : index
    %c0_18 = arith.constant 0 : index
    %c0_19 = arith.constant 0 : index
    %31 = vector.load %arg0[%c4, %c0_18, %c0_19] : memref<8x2x1xf32, #tpu.memory_space<vmem>>, vector<1x2x1xf32>
    %32 = vector.shape_cast %31 : vector<1x2x1xf32> to vector<2x1xf32>
    %33 = vector.broadcast %32 : vector<2x1xf32> to vector<2x1024xf32>
    %34 = vector.broadcast %1 : vector<1x1024xf32> to vector<2x1024xf32>
    %35 = arith.mulf %33, %34 : vector<2x1024xf32>
    %36 = arith.addf %35, %4 : vector<2x1024xf32>
    %c5 = arith.constant 5 : index
    %c0_20 = arith.constant 0 : index
    %c0_21 = arith.constant 0 : index
    %37 = vector.load %arg0[%c5, %c0_20, %c0_21] : memref<8x2x1xf32, #tpu.memory_space<vmem>>, vector<1x2x1xf32>
    %38 = vector.shape_cast %37 : vector<1x2x1xf32> to vector<2x1xf32>
    %39 = vector.broadcast %38 : vector<2x1xf32> to vector<2x1024xf32>
    %40 = vector.broadcast %1 : vector<1x1024xf32> to vector<2x1024xf32>
    %41 = arith.mulf %39, %40 : vector<2x1024xf32>
    %42 = arith.addf %41, %4 : vector<2x1024xf32>
    %c6 = arith.constant 6 : index
    %c0_22 = arith.constant 0 : index
    %c0_23 = arith.constant 0 : index
    %43 = vector.load %arg0[%c6, %c0_22, %c0_23] : memref<8x2x1xf32, #tpu.memory_space<vmem>>, vector<1x2x1xf32>
    %44 = vector.shape_cast %43 : vector<1x2x1xf32> to vector<2x1xf32>
    %45 = vector.broadcast %44 : vector<2x1xf32> to vector<2x1024xf32>
    %46 = vector.broadcast %1 : vector<1x1024xf32> to vector<2x1024xf32>
    %47 = arith.mulf %45, %46 : vector<2x1024xf32>
    %48 = arith.addf %47, %4 : vector<2x1024xf32>
    %c7 = arith.constant 7 : index
    %c0_24 = arith.constant 0 : index
    %c0_25 = arith.constant 0 : index
    %49 = vector.load %arg0[%c7, %c0_24, %c0_25] : memref<8x2x1xf32, #tpu.memory_space<vmem>>, vector<1x2x1xf32>
    %50 = vector.shape_cast %49 : vector<1x2x1xf32> to vector<2x1xf32>
    %51 = vector.broadcast %50 : vector<2x1xf32> to vector<2x1024xf32>
    %52 = vector.broadcast %1 : vector<1x1024xf32> to vector<2x1024xf32>
    %53 = arith.mulf %51, %52 : vector<2x1024xf32>
    %54 = arith.addf %53, %4 : vector<2x1024xf32>
    %cst = arith.constant 0.000000e+00 : f32
    %55 = vector.broadcast %cst : f32 to vector<2x128xf32>
    %56 = vector.extract_strided_slice %12 {offsets = [0, 0], sizes = [2, 768], strides = [1, 1]} : vector<2x1024xf32> to vector<2x768xf32>
    %57 = arith.negf %56 : vector<2x768xf32>
    %58 = math.exp %57 : vector<2x768xf32>
    %cst_26 = arith.constant 1.000000e+00 : f32
    %59 = vector.broadcast %cst_26 : f32 to vector<2x768xf32>
    %60 = arith.addf %59, %58 : vector<2x768xf32>
    %61 = arith.divf %59, %60 : vector<2x768xf32>
    %62 = vector.extract_strided_slice %12 {offsets = [0, 768], sizes = [2, 256], strides = [1, 1]} : vector<2x1024xf32> to vector<2x256xf32>
    %63 = math.tanh %62 : vector<2x256xf32>
    %64 = vector.extract_strided_slice %61 {offsets = [0, 0], sizes = [2, 128], strides = [1, 1]} : vector<2x768xf32> to vector<2x128xf32>
    %65 = vector.extract_strided_slice %61 {offsets = [0, 256], sizes = [2, 128], strides = [1, 1]} : vector<2x768xf32> to vector<2x128xf32>
    %66 = vector.extract_strided_slice %61 {offsets = [0, 512], sizes = [2, 128], strides = [1, 1]} : vector<2x768xf32> to vector<2x128xf32>
    %67 = vector.extract_strided_slice %63 {offsets = [0, 0], sizes = [2, 128], strides = [1, 1]} : vector<2x256xf32> to vector<2x128xf32>
    %68 = arith.mulf %65, %55 : vector<2x128xf32>
    %69 = arith.mulf %64, %67 : vector<2x128xf32>
    %70 = arith.addf %68, %69 : vector<2x128xf32>
    %71 = math.tanh %70 : vector<2x128xf32>
    %72 = arith.mulf %66, %71 : vector<2x128xf32>
    %73 = arith.addf %72, %55 : vector<2x128xf32>
    %74 = arith.truncf %73 : vector<2x128xf32> to vector<2x128xbf16>
    %cst_27 = arith.constant dense<0.000000e+00> : vector<2x1024xf32>
    %75 = tpu.matmul %74, %0, %cst_27 {dimension_numbers = #tpu.dot_dimension_numbers<[1], [0], [0], [1], [0, 0, 1, 1], [], []>} : vector<2x128xbf16>, vector<128x1024xbf16>, vector<2x1024xf32> -> vector<2x1024xf32>
    %76 = arith.addf %75, %18 : vector<2x1024xf32>
    %77 = vector.extract_strided_slice %76 {offsets = [0, 0], sizes = [2, 768], strides = [1, 1]} : vector<2x1024xf32> to vector<2x768xf32>
    %78 = arith.negf %77 : vector<2x768xf32>
    %79 = math.exp %78 : vector<2x768xf32>
    %cst_28 = arith.constant 1.000000e+00 : f32
    %80 = vector.broadcast %cst_28 : f32 to vector<2x768xf32>
    %81 = arith.addf %80, %79 : vector<2x768xf32>
    %82 = arith.divf %80, %81 : vector<2x768xf32>
    %83 = vector.extract_strided_slice %76 {offsets = [0, 768], sizes = [2, 256], strides = [1, 1]} : vector<2x1024xf32> to vector<2x256xf32>
    %84 = math.tanh %83 : vector<2x256xf32>
    %85 = vector.extract_strided_slice %82 {offsets = [0, 128], sizes = [2, 128], strides = [1, 1]} : vector<2x768xf32> to vector<2x128xf32>
    %86 = vector.extract_strided_slice %82 {offsets = [0, 384], sizes = [2, 128], strides = [1, 1]} : vector<2x768xf32> to vector<2x128xf32>
    %87 = vector.extract_strided_slice %82 {offsets = [0, 640], sizes = [2, 128], strides = [1, 1]} : vector<2x768xf32> to vector<2x128xf32>
    %88 = vector.extract_strided_slice %84 {offsets = [0, 128], sizes = [2, 128], strides = [1, 1]} : vector<2x256xf32> to vector<2x128xf32>
    %89 = arith.mulf %86, %55 : vector<2x128xf32>
    %90 = arith.mulf %85, %88 : vector<2x128xf32>
    %91 = arith.addf %89, %90 : vector<2x128xf32>
    %92 = math.tanh %91 : vector<2x128xf32>
    %93 = arith.mulf %87, %92 : vector<2x128xf32>
    %94 = vector.extract_strided_slice %82 {offsets = [0, 0], sizes = [2, 128], strides = [1, 1]} : vector<2x768xf32> to vector<2x128xf32>
    %95 = vector.extract_strided_slice %82 {offsets = [0, 256], sizes = [2, 128], strides = [1, 1]} : vector<2x768xf32> to vector<2x128xf32>
    %96 = vector.extract_strided_slice %82 {offsets = [0, 512], sizes = [2, 128], strides = [1, 1]} : vector<2x768xf32> to vector<2x128xf32>
    %97 = vector.extract_strided_slice %84 {offsets = [0, 0], sizes = [2, 128], strides = [1, 1]} : vector<2x256xf32> to vector<2x128xf32>
    %98 = arith.mulf %95, %70 : vector<2x128xf32>
    %99 = arith.mulf %94, %97 : vector<2x128xf32>
    %100 = arith.addf %98, %99 : vector<2x128xf32>
    %101 = math.tanh %100 : vector<2x128xf32>
    %102 = arith.mulf %96, %101 : vector<2x128xf32>
    %103 = arith.addf %102, %93 : vector<2x128xf32>
    %104 = arith.truncf %103 : vector<2x128xf32> to vector<2x128xbf16>
    %cst_29 = arith.constant dense<0.000000e+00> : vector<2x1024xf32>
    %105 = tpu.matmul %104, %0, %cst_29 {dimension_numbers = #tpu.dot_dimension_numbers<[1], [0], [0], [1], [0, 0, 1, 1], [], []>} : vector<2x128xbf16>, vector<128x1024xbf16>, vector<2x1024xf32> -> vector<2x1024xf32>
    %106 = arith.addf %105, %24 : vector<2x1024xf32>
    %107 = vector.extract_strided_slice %106 {offsets = [0, 0], sizes = [2, 768], strides = [1, 1]} : vector<2x1024xf32> to vector<2x768xf32>
    %108 = arith.negf %107 : vector<2x768xf32>
    %109 = math.exp %108 : vector<2x768xf32>
    %cst_30 = arith.constant 1.000000e+00 : f32
    %110 = vector.broadcast %cst_30 : f32 to vector<2x768xf32>
    %111 = arith.addf %110, %109 : vector<2x768xf32>
    %112 = arith.divf %110, %111 : vector<2x768xf32>
    %113 = vector.extract_strided_slice %106 {offsets = [0, 768], sizes = [2, 256], strides = [1, 1]} : vector<2x1024xf32> to vector<2x256xf32>
    %114 = math.tanh %113 : vector<2x256xf32>
    %115 = vector.extract_strided_slice %112 {offsets = [0, 128], sizes = [2, 128], strides = [1, 1]} : vector<2x768xf32> to vector<2x128xf32>
    %116 = vector.extract_strided_slice %112 {offsets = [0, 384], sizes = [2, 128], strides = [1, 1]} : vector<2x768xf32> to vector<2x128xf32>
    %117 = vector.extract_strided_slice %112 {offsets = [0, 640], sizes = [2, 128], strides = [1, 1]} : vector<2x768xf32> to vector<2x128xf32>
    %118 = vector.extract_strided_slice %114 {offsets = [0, 128], sizes = [2, 128], strides = [1, 1]} : vector<2x256xf32> to vector<2x128xf32>
    %119 = arith.mulf %116, %91 : vector<2x128xf32>
    %120 = arith.mulf %115, %118 : vector<2x128xf32>
    %121 = arith.addf %119, %120 : vector<2x128xf32>
    %122 = math.tanh %121 : vector<2x128xf32>
    %123 = arith.mulf %117, %122 : vector<2x128xf32>
    %124 = vector.extract_strided_slice %112 {offsets = [0, 0], sizes = [2, 128], strides = [1, 1]} : vector<2x768xf32> to vector<2x128xf32>
    %125 = vector.extract_strided_slice %112 {offsets = [0, 256], sizes = [2, 128], strides = [1, 1]} : vector<2x768xf32> to vector<2x128xf32>
    %126 = vector.extract_strided_slice %112 {offsets = [0, 512], sizes = [2, 128], strides = [1, 1]} : vector<2x768xf32> to vector<2x128xf32>
    %127 = vector.extract_strided_slice %114 {offsets = [0, 0], sizes = [2, 128], strides = [1, 1]} : vector<2x256xf32> to vector<2x128xf32>
    %128 = arith.mulf %125, %100 : vector<2x128xf32>
    %129 = arith.mulf %124, %127 : vector<2x128xf32>
    %130 = arith.addf %128, %129 : vector<2x128xf32>
    %131 = math.tanh %130 : vector<2x128xf32>
    %132 = arith.mulf %126, %131 : vector<2x128xf32>
    %133 = arith.addf %132, %123 : vector<2x128xf32>
    %134 = arith.truncf %133 : vector<2x128xf32> to vector<2x128xbf16>
    %cst_31 = arith.constant dense<0.000000e+00> : vector<2x1024xf32>
    %135 = tpu.matmul %134, %0, %cst_31 {dimension_numbers = #tpu.dot_dimension_numbers<[1], [0], [0], [1], [0, 0, 1, 1], [], []>} : vector<2x128xbf16>, vector<128x1024xbf16>, vector<2x1024xf32> -> vector<2x1024xf32>
    %136 = arith.addf %135, %30 : vector<2x1024xf32>
    %137 = vector.extract_strided_slice %136 {offsets = [0, 0], sizes = [2, 768], strides = [1, 1]} : vector<2x1024xf32> to vector<2x768xf32>
    %138 = arith.negf %137 : vector<2x768xf32>
    %139 = math.exp %138 : vector<2x768xf32>
    %cst_32 = arith.constant 1.000000e+00 : f32
    %140 = vector.broadcast %cst_32 : f32 to vector<2x768xf32>
    %141 = arith.addf %140, %139 : vector<2x768xf32>
    %142 = arith.divf %140, %141 : vector<2x768xf32>
    %143 = vector.extract_strided_slice %136 {offsets = [0, 768], sizes = [2, 256], strides = [1, 1]} : vector<2x1024xf32> to vector<2x256xf32>
    %144 = math.tanh %143 : vector<2x256xf32>
    %145 = vector.extract_strided_slice %142 {offsets = [0, 128], sizes = [2, 128], strides = [1, 1]} : vector<2x768xf32> to vector<2x128xf32>
    %146 = vector.extract_strided_slice %142 {offsets = [0, 384], sizes = [2, 128], strides = [1, 1]} : vector<2x768xf32> to vector<2x128xf32>
    %147 = vector.extract_strided_slice %142 {offsets = [0, 640], sizes = [2, 128], strides = [1, 1]} : vector<2x768xf32> to vector<2x128xf32>
    %148 = vector.extract_strided_slice %144 {offsets = [0, 128], sizes = [2, 128], strides = [1, 1]} : vector<2x256xf32> to vector<2x128xf32>
    %149 = arith.mulf %146, %121 : vector<2x128xf32>
    %150 = arith.mulf %145, %148 : vector<2x128xf32>
    %151 = arith.addf %149, %150 : vector<2x128xf32>
    %152 = math.tanh %151 : vector<2x128xf32>
    %153 = arith.mulf %147, %152 : vector<2x128xf32>
    %154 = vector.extract_strided_slice %142 {offsets = [0, 0], sizes = [2, 128], strides = [1, 1]} : vector<2x768xf32> to vector<2x128xf32>
    %155 = vector.extract_strided_slice %142 {offsets = [0, 256], sizes = [2, 128], strides = [1, 1]} : vector<2x768xf32> to vector<2x128xf32>
    %156 = vector.extract_strided_slice %142 {offsets = [0, 512], sizes = [2, 128], strides = [1, 1]} : vector<2x768xf32> to vector<2x128xf32>
    %157 = vector.extract_strided_slice %144 {offsets = [0, 0], sizes = [2, 128], strides = [1, 1]} : vector<2x256xf32> to vector<2x128xf32>
    %158 = arith.mulf %155, %130 : vector<2x128xf32>
    %159 = arith.mulf %154, %157 : vector<2x128xf32>
    %160 = arith.addf %158, %159 : vector<2x128xf32>
    %161 = math.tanh %160 : vector<2x128xf32>
    %162 = arith.mulf %156, %161 : vector<2x128xf32>
    %163 = arith.addf %162, %153 : vector<2x128xf32>
    %164 = arith.truncf %163 : vector<2x128xf32> to vector<2x128xbf16>
    %cst_33 = arith.constant dense<0.000000e+00> : vector<2x1024xf32>
    %165 = tpu.matmul %164, %0, %cst_33 {dimension_numbers = #tpu.dot_dimension_numbers<[1], [0], [0], [1], [0, 0, 1, 1], [], []>} : vector<2x128xbf16>, vector<128x1024xbf16>, vector<2x1024xf32> -> vector<2x1024xf32>
    %166 = arith.addf %165, %36 : vector<2x1024xf32>
    %167 = vector.extract_strided_slice %166 {offsets = [0, 0], sizes = [2, 768], strides = [1, 1]} : vector<2x1024xf32> to vector<2x768xf32>
    %168 = arith.negf %167 : vector<2x768xf32>
    %169 = math.exp %168 : vector<2x768xf32>
    %cst_34 = arith.constant 1.000000e+00 : f32
    %170 = vector.broadcast %cst_34 : f32 to vector<2x768xf32>
    %171 = arith.addf %170, %169 : vector<2x768xf32>
    %172 = arith.divf %170, %171 : vector<2x768xf32>
    %173 = vector.extract_strided_slice %166 {offsets = [0, 768], sizes = [2, 256], strides = [1, 1]} : vector<2x1024xf32> to vector<2x256xf32>
    %174 = math.tanh %173 : vector<2x256xf32>
    %175 = vector.extract_strided_slice %172 {offsets = [0, 128], sizes = [2, 128], strides = [1, 1]} : vector<2x768xf32> to vector<2x128xf32>
    %176 = vector.extract_strided_slice %172 {offsets = [0, 384], sizes = [2, 128], strides = [1, 1]} : vector<2x768xf32> to vector<2x128xf32>
    %177 = vector.extract_strided_slice %172 {offsets = [0, 640], sizes = [2, 128], strides = [1, 1]} : vector<2x768xf32> to vector<2x128xf32>
    %178 = vector.extract_strided_slice %174 {offsets = [0, 128], sizes = [2, 128], strides = [1, 1]} : vector<2x256xf32> to vector<2x128xf32>
    %179 = arith.mulf %176, %151 : vector<2x128xf32>
    %180 = arith.mulf %175, %178 : vector<2x128xf32>
    %181 = arith.addf %179, %180 : vector<2x128xf32>
    %182 = math.tanh %181 : vector<2x128xf32>
    %183 = arith.mulf %177, %182 : vector<2x128xf32>
    %184 = vector.extract_strided_slice %172 {offsets = [0, 0], sizes = [2, 128], strides = [1, 1]} : vector<2x768xf32> to vector<2x128xf32>
    %185 = vector.extract_strided_slice %172 {offsets = [0, 256], sizes = [2, 128], strides = [1, 1]} : vector<2x768xf32> to vector<2x128xf32>
    %186 = vector.extract_strided_slice %172 {offsets = [0, 512], sizes = [2, 128], strides = [1, 1]} : vector<2x768xf32> to vector<2x128xf32>
    %187 = vector.extract_strided_slice %174 {offsets = [0, 0], sizes = [2, 128], strides = [1, 1]} : vector<2x256xf32> to vector<2x128xf32>
    %188 = arith.mulf %185, %160 : vector<2x128xf32>
    %189 = arith.mulf %184, %187 : vector<2x128xf32>
    %190 = arith.addf %188, %189 : vector<2x128xf32>
    %191 = math.tanh %190 : vector<2x128xf32>
    %192 = arith.mulf %186, %191 : vector<2x128xf32>
    %193 = arith.addf %192, %183 : vector<2x128xf32>
    %194 = arith.truncf %193 : vector<2x128xf32> to vector<2x128xbf16>
    %cst_35 = arith.constant dense<0.000000e+00> : vector<2x1024xf32>
    %195 = tpu.matmul %194, %0, %cst_35 {dimension_numbers = #tpu.dot_dimension_numbers<[1], [0], [0], [1], [0, 0, 1, 1], [], []>} : vector<2x128xbf16>, vector<128x1024xbf16>, vector<2x1024xf32> -> vector<2x1024xf32>
    %196 = arith.addf %195, %42 : vector<2x1024xf32>
    %197 = vector.extract_strided_slice %196 {offsets = [0, 0], sizes = [2, 768], strides = [1, 1]} : vector<2x1024xf32> to vector<2x768xf32>
    %198 = arith.negf %197 : vector<2x768xf32>
    %199 = math.exp %198 : vector<2x768xf32>
    %cst_36 = arith.constant 1.000000e+00 : f32
    %200 = vector.broadcast %cst_36 : f32 to vector<2x768xf32>
    %201 = arith.addf %200, %199 : vector<2x768xf32>
    %202 = arith.divf %200, %201 : vector<2x768xf32>
    %203 = vector.extract_strided_slice %196 {offsets = [0, 768], sizes = [2, 256], strides = [1, 1]} : vector<2x1024xf32> to vector<2x256xf32>
    %204 = math.tanh %203 : vector<2x256xf32>
    %205 = vector.extract_strided_slice %202 {offsets = [0, 128], sizes = [2, 128], strides = [1, 1]} : vector<2x768xf32> to vector<2x128xf32>
    %206 = vector.extract_strided_slice %202 {offsets = [0, 384], sizes = [2, 128], strides = [1, 1]} : vector<2x768xf32> to vector<2x128xf32>
    %207 = vector.extract_strided_slice %202 {offsets = [0, 640], sizes = [2, 128], strides = [1, 1]} : vector<2x768xf32> to vector<2x128xf32>
    %208 = vector.extract_strided_slice %204 {offsets = [0, 128], sizes = [2, 128], strides = [1, 1]} : vector<2x256xf32> to vector<2x128xf32>
    %209 = arith.mulf %206, %181 : vector<2x128xf32>
    %210 = arith.mulf %205, %208 : vector<2x128xf32>
    %211 = arith.addf %209, %210 : vector<2x128xf32>
    %212 = math.tanh %211 : vector<2x128xf32>
    %213 = arith.mulf %207, %212 : vector<2x128xf32>
    %214 = vector.extract_strided_slice %202 {offsets = [0, 0], sizes = [2, 128], strides = [1, 1]} : vector<2x768xf32> to vector<2x128xf32>
    %215 = vector.extract_strided_slice %202 {offsets = [0, 256], sizes = [2, 128], strides = [1, 1]} : vector<2x768xf32> to vector<2x128xf32>
    %216 = vector.extract_strided_slice %202 {offsets = [0, 512], sizes = [2, 128], strides = [1, 1]} : vector<2x768xf32> to vector<2x128xf32>
    %217 = vector.extract_strided_slice %204 {offsets = [0, 0], sizes = [2, 128], strides = [1, 1]} : vector<2x256xf32> to vector<2x128xf32>
    %218 = arith.mulf %215, %190 : vector<2x128xf32>
    %219 = arith.mulf %214, %217 : vector<2x128xf32>
    %220 = arith.addf %218, %219 : vector<2x128xf32>
    %221 = math.tanh %220 : vector<2x128xf32>
    %222 = arith.mulf %216, %221 : vector<2x128xf32>
    %223 = arith.addf %222, %213 : vector<2x128xf32>
    %224 = arith.truncf %223 : vector<2x128xf32> to vector<2x128xbf16>
    %cst_37 = arith.constant dense<0.000000e+00> : vector<2x1024xf32>
    %225 = tpu.matmul %224, %0, %cst_37 {dimension_numbers = #tpu.dot_dimension_numbers<[1], [0], [0], [1], [0, 0, 1, 1], [], []>} : vector<2x128xbf16>, vector<128x1024xbf16>, vector<2x1024xf32> -> vector<2x1024xf32>
    %226 = arith.addf %225, %48 : vector<2x1024xf32>
    %227 = vector.extract_strided_slice %226 {offsets = [0, 0], sizes = [2, 768], strides = [1, 1]} : vector<2x1024xf32> to vector<2x768xf32>
    %228 = arith.negf %227 : vector<2x768xf32>
    %229 = math.exp %228 : vector<2x768xf32>
    %cst_38 = arith.constant 1.000000e+00 : f32
    %230 = vector.broadcast %cst_38 : f32 to vector<2x768xf32>
    %231 = arith.addf %230, %229 : vector<2x768xf32>
    %232 = arith.divf %230, %231 : vector<2x768xf32>
    %233 = vector.extract_strided_slice %226 {offsets = [0, 768], sizes = [2, 256], strides = [1, 1]} : vector<2x1024xf32> to vector<2x256xf32>
    %234 = math.tanh %233 : vector<2x256xf32>
    %235 = vector.extract_strided_slice %232 {offsets = [0, 128], sizes = [2, 128], strides = [1, 1]} : vector<2x768xf32> to vector<2x128xf32>
    %236 = vector.extract_strided_slice %232 {offsets = [0, 384], sizes = [2, 128], strides = [1, 1]} : vector<2x768xf32> to vector<2x128xf32>
    %237 = vector.extract_strided_slice %232 {offsets = [0, 640], sizes = [2, 128], strides = [1, 1]} : vector<2x768xf32> to vector<2x128xf32>
    %238 = vector.extract_strided_slice %234 {offsets = [0, 128], sizes = [2, 128], strides = [1, 1]} : vector<2x256xf32> to vector<2x128xf32>
    %239 = arith.mulf %236, %211 : vector<2x128xf32>
    %240 = arith.mulf %235, %238 : vector<2x128xf32>
    %241 = arith.addf %239, %240 : vector<2x128xf32>
    %242 = math.tanh %241 : vector<2x128xf32>
    %243 = arith.mulf %237, %242 : vector<2x128xf32>
    %244 = vector.extract_strided_slice %232 {offsets = [0, 0], sizes = [2, 128], strides = [1, 1]} : vector<2x768xf32> to vector<2x128xf32>
    %245 = vector.extract_strided_slice %232 {offsets = [0, 256], sizes = [2, 128], strides = [1, 1]} : vector<2x768xf32> to vector<2x128xf32>
    %246 = vector.extract_strided_slice %232 {offsets = [0, 512], sizes = [2, 128], strides = [1, 1]} : vector<2x768xf32> to vector<2x128xf32>
    %247 = vector.extract_strided_slice %234 {offsets = [0, 0], sizes = [2, 128], strides = [1, 1]} : vector<2x256xf32> to vector<2x128xf32>
    %248 = arith.mulf %245, %220 : vector<2x128xf32>
    %249 = arith.mulf %244, %247 : vector<2x128xf32>
    %250 = arith.addf %248, %249 : vector<2x128xf32>
    %251 = math.tanh %250 : vector<2x128xf32>
    %252 = arith.mulf %246, %251 : vector<2x128xf32>
    %253 = arith.addf %252, %243 : vector<2x128xf32>
    %254 = arith.truncf %253 : vector<2x128xf32> to vector<2x128xbf16>
    %cst_39 = arith.constant dense<0.000000e+00> : vector<2x1024xf32>
    %255 = tpu.matmul %254, %0, %cst_39 {dimension_numbers = #tpu.dot_dimension_numbers<[1], [0], [0], [1], [0, 0, 1, 1], [], []>} : vector<2x128xbf16>, vector<128x1024xbf16>, vector<2x1024xf32> -> vector<2x1024xf32>
    %256 = arith.addf %255, %54 : vector<2x1024xf32>
    %257 = vector.extract_strided_slice %256 {offsets = [0, 0], sizes = [2, 768], strides = [1, 1]} : vector<2x1024xf32> to vector<2x768xf32>
    %258 = arith.negf %257 : vector<2x768xf32>
    %259 = math.exp %258 : vector<2x768xf32>
    %cst_40 = arith.constant 1.000000e+00 : f32
    %260 = vector.broadcast %cst_40 : f32 to vector<2x768xf32>
    %261 = arith.addf %260, %259 : vector<2x768xf32>
    %262 = arith.divf %260, %261 : vector<2x768xf32>
    %263 = vector.extract_strided_slice %256 {offsets = [0, 768], sizes = [2, 256], strides = [1, 1]} : vector<2x1024xf32> to vector<2x256xf32>
    %264 = math.tanh %263 : vector<2x256xf32>
    %265 = vector.extract_strided_slice %262 {offsets = [0, 128], sizes = [2, 128], strides = [1, 1]} : vector<2x768xf32> to vector<2x128xf32>
    %266 = vector.extract_strided_slice %262 {offsets = [0, 384], sizes = [2, 128], strides = [1, 1]} : vector<2x768xf32> to vector<2x128xf32>
    %267 = vector.extract_strided_slice %262 {offsets = [0, 640], sizes = [2, 128], strides = [1, 1]} : vector<2x768xf32> to vector<2x128xf32>
    %268 = vector.extract_strided_slice %264 {offsets = [0, 128], sizes = [2, 128], strides = [1, 1]} : vector<2x256xf32> to vector<2x128xf32>
    %269 = arith.mulf %266, %241 : vector<2x128xf32>
    %270 = arith.mulf %265, %268 : vector<2x128xf32>
    %271 = arith.addf %269, %270 : vector<2x128xf32>
    %272 = math.tanh %271 : vector<2x128xf32>
    %273 = arith.mulf %267, %272 : vector<2x128xf32>
    %274 = vector.extract_strided_slice %262 {offsets = [0, 0], sizes = [2, 128], strides = [1, 1]} : vector<2x768xf32> to vector<2x128xf32>
    %275 = vector.extract_strided_slice %262 {offsets = [0, 256], sizes = [2, 128], strides = [1, 1]} : vector<2x768xf32> to vector<2x128xf32>
    %276 = vector.extract_strided_slice %262 {offsets = [0, 512], sizes = [2, 128], strides = [1, 1]} : vector<2x768xf32> to vector<2x128xf32>
    %277 = vector.extract_strided_slice %264 {offsets = [0, 0], sizes = [2, 128], strides = [1, 1]} : vector<2x256xf32> to vector<2x128xf32>
    %278 = arith.mulf %275, %250 : vector<2x128xf32>
    %279 = arith.mulf %274, %277 : vector<2x128xf32>
    %280 = arith.addf %278, %279 : vector<2x128xf32>
    %281 = math.tanh %280 : vector<2x128xf32>
    %282 = arith.mulf %276, %281 : vector<2x128xf32>
    %283 = arith.addf %282, %273 : vector<2x128xf32>
    %284 = arith.truncf %283 : vector<2x128xf32> to vector<2x128xbf16>
    %cst_41 = arith.constant dense<0.000000e+00> : vector<2x1024xf32>
    %285 = tpu.matmul %284, %0, %cst_41 {dimension_numbers = #tpu.dot_dimension_numbers<[1], [0], [0], [1], [0, 0, 1, 1], [], []>} : vector<2x128xbf16>, vector<128x1024xbf16>, vector<2x1024xf32> -> vector<2x1024xf32>
    %286 = arith.addf %285, %4 : vector<2x1024xf32>
    %287 = vector.extract_strided_slice %286 {offsets = [0, 0], sizes = [2, 768], strides = [1, 1]} : vector<2x1024xf32> to vector<2x768xf32>
    %288 = arith.negf %287 : vector<2x768xf32>
    %289 = math.exp %288 : vector<2x768xf32>
    %cst_42 = arith.constant 1.000000e+00 : f32
    %290 = vector.broadcast %cst_42 : f32 to vector<2x768xf32>
    %291 = arith.addf %290, %289 : vector<2x768xf32>
    %292 = arith.divf %290, %291 : vector<2x768xf32>
    %293 = vector.extract_strided_slice %286 {offsets = [0, 768], sizes = [2, 256], strides = [1, 1]} : vector<2x1024xf32> to vector<2x256xf32>
    %294 = math.tanh %293 : vector<2x256xf32>
    %295 = vector.extract_strided_slice %292 {offsets = [0, 128], sizes = [2, 128], strides = [1, 1]} : vector<2x768xf32> to vector<2x128xf32>
    %296 = vector.extract_strided_slice %292 {offsets = [0, 384], sizes = [2, 128], strides = [1, 1]} : vector<2x768xf32> to vector<2x128xf32>
    %297 = vector.extract_strided_slice %292 {offsets = [0, 640], sizes = [2, 128], strides = [1, 1]} : vector<2x768xf32> to vector<2x128xf32>
    %298 = vector.extract_strided_slice %294 {offsets = [0, 128], sizes = [2, 128], strides = [1, 1]} : vector<2x256xf32> to vector<2x128xf32>
    %299 = arith.mulf %296, %271 : vector<2x128xf32>
    %300 = arith.mulf %295, %298 : vector<2x128xf32>
    %301 = arith.addf %299, %300 : vector<2x128xf32>
    %302 = math.tanh %301 : vector<2x128xf32>
    %303 = arith.mulf %297, %302 : vector<2x128xf32>
    %304 = vector.broadcast %5 : vector<1x128xf32> to vector<2x128xf32>
    %305 = arith.mulf %303, %304 : vector<2x128xf32>
    %cst_43 = arith.constant dense<0.000000e+00> : vector<2xf32>
    %306 = vector.multi_reduction <add>, %305, %cst_43 [1] : vector<2x128xf32> to vector<2xf32>
    %307 = vector.shape_cast %306 : vector<2xf32> to vector<2x1xf32>
    %308 = vector.broadcast %6 : vector<1x1xf32> to vector<2x1xf32>
    %309 = arith.addf %307, %308 : vector<2x1xf32>
    %c0_44 = arith.constant 0 : index
    %c0_45 = arith.constant 0 : index
    %310 = vector.load %arg3[%c0_44, %c0_45] : memref<2x1xf32, #tpu.memory_space<vmem>>, vector<2x1xf32>
    tpu.vector_store %arg3[%c0_44, %c0_45], %309 {strides = array<i32>} : memref<2x1xf32, #tpu.memory_space<vmem>>, vector<2x1xf32>,
    return
  }
}

</mosaic_0001>

<bundles_post_ra>
// kernel: tpu_custom_call.1
= control target key start
LH: loop header
LB: loop body
LE: loop exit
PB: predicated region body
PF: predicated region fallthrough
CT: control target
= control target key end

     0   :  { %8 = vsyncpa [#allocation3], 0  ;;  %s3841_s0 = inlined_call_operand.vmem [shape: f32[8,2,1], index: 0, kind: input, shape index: {}]   ;;  %s3842_s1 = inlined_call_operand.hbm [shape: bf16[128,1024], index: 1, kind: input, shape index: {}]   ;;  %s3843_s2 = inlined_call_operand.hbm [shape: f32[8,1024], index: 2, kind: input, shape index: {}]   ;;  %s3844_s3 = inlined_call_operand.vmem [shape: f32[2,1], index: 3, kind: output, shape index: {}]  }
   0x1   :  { %9 = vsyncpa [#allocation5], 0  ;;  %s2843_s12 = smov [#allocation2]   ;;  %s2795_s16 = scalar_lea.hbm %s3842_s1, 8192 }
   0x2   :  { %s17_s13 = sshll.u32 %s2843_s12, 4  ;;  %p2796_p0 = scmp.ne.s32.totalorder %s3842_s1, %s2795_s16  ;;  %s18_s13 = int_to_ptr.vmem [resolvable:$true] %s17_s13 }
   0x3   :  { %p2799_p1 = scmp.lt.u32.totalorder %s2795_s16, %s3842_s1 }
   0x5   :  { %p2801_p2 = pnand %p2799_p1, %p2796_p0 }
   0x7   :  { %2804 = shalt.err (!%p2801_p2)
}
   0x8   :  { %s2805_s21 = scalar_lea.vmem %s18_s13, 8192  ;;  %p2810_p4 = scmp.lt.s32.totalorder %s18_s13, %s18_s13 }
   0x9   :  { %p2806_p3 = scmp.ne.s32.totalorder %s18_s13, %s2805_s21  ;;  %p2811_p5 = scmp.lt.s32.totalorder %s2805_s21, %s2805_s21 }
   0xb   :  { %p2812_p6 = por %p2811_p5, %p2810_p4 }
   0xd   :  { %p2813_p7 = pnand %p2812_p6, %p2806_p3 }
   0xf   :  { %2816 = shalt.err (!%p2813_p7)
}
  0x10   :  { %s2844_s22 = smov 512   ;;  %s2845_s23 = smov 32  }
  0x11   :  { %23 = dma.hbm_to_vmem [thread:$0]  %s3842_s1, 8192, %s18_s13, [#allocation3], %s2844_s22, %s2844_s22, %s2845_s23  }
  0x12   :  { %s2846_s26 = smov [#allocation4]   ;;  %s2817_s30 = scalar_lea.hbm %s3843_s2, 1024 }
  0x13   :  { %s30_s27 = sshll.u32 %s2846_s26, 4  ;;  %p2818_p8 = scmp.ne.s32.totalorder %s3843_s2, %s2817_s30  ;;  %s31_s27 = int_to_ptr.vmem [resolvable:$true] %s30_s27 }
  0x14   :  { %p2821_p9 = scmp.lt.u32.totalorder %s2817_s30, %s3843_s2 }
  0x16   :  { %p2823_p10 = pnand %p2821_p9, %p2818_p8 }
  0x18   :  { %2826 = shalt.err (!%p2823_p10)
}
  0x19   :  { %s2827_s8 = scalar_lea.vmem %s31_s27, 1024  ;;  %p2832_p12 = scmp.lt.s32.totalorder %s31_s27, %s31_s27 }
  0x1a   :  { %p2828_p11 = scmp.ne.s32.totalorder %s31_s27, %s2827_s8  ;;  %p2833_p13 = scmp.lt.s32.totalorder %s2827_s8, %s2827_s8 }
  0x1c   :  { %p2834_p0 = por %p2833_p13, %p2832_p12 }
  0x1e   :  { %p2835_p1 = pnand %p2834_p0, %p2828_p11 }
  0x20   :  { %2838 = shalt.err (!%p2835_p1)
}
  0x21   :  { %33 = dma.hbm_to_vmem [thread:$0]  %s3843_s2, 1024, %s31_s27, [#allocation5]  }
  0x22   :  { %2839 = dma.done.wait [#allocation3], 8192  }
  0x23   :  { %2840 = vsyncadd [#allocation3], 4294959104 }
  0x24   :  { %2841 = dma.done.wait [#allocation5], 1024  }
  0x25   :  { %2842 = vsyncadd [#allocation5], 4294966272  ;;  %v3845_v0 = vmov 0   ;;  %v113_v1 = vlaneseq  ;;  %v155_v2 = vld [vmem:[%s3841_s0] sm:$0x3]  ;;  %v42_v27 = vld [vmem:[#allocation2 + $0x8] sm:$0xff] }
  0x26   :  { %2537 = vset.pattern.permute.xlu0 %v3845_v0  ;;  %749 = vmatprep.mubr.bf16.mxu0 %v3845_v0  ;;  %v2413_v3 = vld [vmem:[%s3841_s0 + $0x2] sm:$0x3]  ;;  %v105_v5 = vld [vmem:[#allocation4] ss:$8 sm:$0xf]  ;;  %vm2400_vm0 = vcmask 1041408  }
  0x27   :  { %790 = vmatprep.mubr.bf16.mxu1 %v3845_v0  ;;  %2538 = vset.pattern.permute.xlu1 %v3845_v0  ;;  %v2902_v4 = vshrl.u32 %v113_v1, 7  ;;  %v106_v6 = vld [vmem:[#allocation4] ss:$8 sm:$0xf0]  ;;  %v2418_v24 = vld [vmem:[%s3841_s0 + $0xc] sm:$0x3] }
  0x28   :  { %158 = vperm.xlu0 %2537, %v155_v2   ;;  %v109_v7 = vld [vmem:[#allocation4 + $0x1] ss:$8 sm:$0xf]  ;;  %v2908_v13 = vor.u32 %v106_v6, %v105_v5  ;;  %vm2405_vm1 = vcmask 1024  }
  0x29   :  { %v110_v8 = vld [vmem:[#allocation4 + $0x1] ss:$8 sm:$0xf0]  ;;  %v119_v9 = vsub.s32 1, %v2902_v4  ;;  %v127_v10 = vsub.s32 3, %v2902_v4  ;;  %v135_v11 = vsub.s32 5, %v2902_v4 }
  0x2a   :  { %v143_v12 = vsub.s32 7, %v2902_v4  ;;  %v2910_v14 = vor.u32 %v110_v8, %v109_v7  ;;  %v2416_v15 = vld [vmem:[%s3841_s0 + $0x8] sm:$0x3]  ;;  %v41_v25 = vld [vmem:[#allocation2] sm:$0xff] }
  0x2b   :  { %v2919_v17 = vrot.slane %v2908_v13, %v119_v9  ;;  %v2925_v19 = vrot.slane %v2908_v13, %v127_v10  ;;  %v2931_v21 = vrot.slane %v2908_v13, %v135_v11  ;;  %v45_v26 = vld [vmem:[#allocation2 + $0x20] sm:$0xff]  ;;  %v46_v29 = vld [vmem:[#allocation2 + $0x28] sm:$0xff] }
  0x2c   :  { %214 = vperm.xlu0 %2537, %v2413_v3   ;;  %v2916_v16 = vrot.slane %v2910_v14, %v119_v9  ;;  %v2922_v18 = vrot.slane %v2910_v14, %v127_v10  ;;  %v2928_v20 = vrot.slane %v2910_v14, %v135_v11  ;;  %v2934_v22 = vrot.slane %v2910_v14, %v143_v12  ;;  %v49_v33 = vld [vmem:[#allocation2 + $0x40] sm:$0xff]  ;;  %v50_v35 = vld [vmem:[#allocation2 + $0x48] sm:$0xff] }
  0x2d   :  { %3989 = vst [vmem:[#allocation9_spill] sm:$0xff] %v2919_v17  ;;  %3991 = vst [vmem:[#allocation11_spill] sm:$0xff] %v2925_v19  ;;  %v2937_v23 = vrot.slane %v2908_v13, %v143_v12  ;;  %v2942_v28 = vcombine.high %v41_v25, %v45_v26  ;;  %v2944_v30 = vcombine.high %v42_v27, %v46_v29  ;;  %v53_v34 = vld [vmem:[#allocation2 + $0x60] sm:$0xff]  ;;  %v54_v37 = vld [vmem:[#allocation2 + $0x68] sm:$0xff] }
  0x2e   :  { %3988 = vst [vmem:[#allocation8_spill] sm:$0xff] %v2916_v16  ;;  %3990 = vst [vmem:[#allocation10_spill] sm:$0xff] %v2922_v18  ;;  %v2946_v31 = vcombine.low %v41_v25, %v45_v26  ;;  %v2948_v32 = vcombine.low %v42_v27, %v46_v29  ;;  %v2954_v36 = vcombine.high %v49_v33, %v53_v34  ;;  %v57_v41 = vld [vmem:[#allocation2 + $0x80] sm:$0xff]  ;;  %v58_v43 = vld [vmem:[#allocation2 + $0x88] sm:$0xff] }
  0x2f   :  { %3992 = vst [vmem:[#allocation12_spill] sm:$0xff] %v2928_v20  ;;  %3993 = vst [vmem:[#allocation13_spill] sm:$0xff] %v2931_v21  ;;  %717 = vmatprep.subr.bf16.mxu0 %v2942_v28  ;;  %758 = vmatprep.subr.bf16.mxu1 %v2944_v30  ;;  %v2956_v38 = vcombine.high %v50_v35, %v54_v37  ;;  %v2958_v39 = vcombine.low %v49_v33, %v53_v34  ;;  %v61_v42 = vld [vmem:[#allocation2 + $0xa0] sm:$0xff]  ;;  %v62_v45 = vld [vmem:[#allocation2 + $0xa8] sm:$0xff] }
  0x30   :  { %3994 = vst [vmem:[#allocation14_spill] sm:$0xff] %v2934_v22  ;;  %3995 = vst [vmem:[#allocation15_spill] sm:$0xff] %v2937_v23  ;;  %283 = vperm.xlu0 %2537, %v2416_v15   ;;  %718 = vmatpush1.bf16.msra.mxu0 %v2946_v31  ;;  %v2960_v40 = vcombine.low %v50_v35, %v54_v37  ;;  %v2966_v44 = vcombine.high %v57_v41, %v61_v42  ;;  %v65_v49 = vld [vmem:[#allocation2 + $0xc0] sm:$0xff]  ;;  %v66_v51 = vld [vmem:[#allocation2 + $0xc8] sm:$0xff] }
  0x31   :  { %3996 = vst [vmem:[#allocation16_spill] sm:$0xff] %v2942_v28  ;;  %3997 = vst [vmem:[#allocation17_spill] sm:$0xff] %v2944_v30  ;;  %759 = vmatpush1.bf16.msra.mxu1 %v2948_v32  ;;  %719 = vmatprep.subr.bf16.mxu0 %v2954_v36  ;;  %v2968_v46 = vcombine.high %v58_v43, %v62_v45  ;;  %v2970_v47 = vcombine.low %v57_v41, %v61_v42  ;;  %v69_v50 = vld [vmem:[#allocation2 + $0xe0] sm:$0xff]  ;;  %v70_v53 = vld [vmem:[#allocation2 + $0xe8] sm:$0xff] }
  0x32   :  { %3998 = vst [vmem:[#allocation18_spill] sm:$0xff] %v2946_v31  ;;  %3999 = vst [vmem:[#allocation19_spill] sm:$0xff] %v2948_v32  ;;  %760 = vmatprep.subr.bf16.mxu1 %v2956_v38  ;;  %v2972_v48 = vcombine.low %v58_v43, %v62_v45  ;;  %v2978_v52 = vcombine.high %v65_v49, %v69_v50  ;;  %v2980_v54 = vcombine.high %v66_v51, %v70_v53  ;;  %v73_v57 = vld [vmem:[#allocation2 + $0x100] sm:$0xff]  ;;  %v74_v59 = vld [vmem:[#allocation2 + $0x108] sm:$0xff] }
  0x33   :  { %4000 = vst [vmem:[#allocation20_spill] sm:$0xff] %v2954_v36  ;;  %4001 = vst [vmem:[#allocation21_spill] sm:$0xff] %v2956_v38  ;;  %v2982_v55 = vcombine.low %v65_v49, %v69_v50  ;;  %v2984_v56 = vcombine.low %v66_v51, %v70_v53  ;;  %v77_v58 = vld [vmem:[#allocation2 + $0x120] sm:$0xff]  ;;  %v78_v61 = vld [vmem:[#allocation2 + $0x128] sm:$0xff] }
  0x34   :  { %329 = vperm.xlu0 %2537, %v2418_v24   ;;  %4002 = vst [vmem:[#allocation22_spill] sm:$0xff] %v2958_v39  ;;  %4003 = vst [vmem:[#allocation23_spill] sm:$0xff] %v2960_v40  ;;  %720 = vmatpush1.bf16.msra.mxu0 %v2958_v39  ;;  %v2990_v60 = vcombine.high %v73_v57, %v77_v58  ;;  %v2992_v62 = vcombine.high %v74_v59, %v78_v61  ;;  %v81_v2 = vld [vmem:[#allocation2 + $0x140] sm:$0xff]  ;;  %v82_v5 = vld [vmem:[#allocation2 + $0x148] sm:$0xff] }
  0x35   :  { %761 = vmatpush1.bf16.msra.mxu1 %v2960_v40  ;;  %4004 = vst [vmem:[#allocation24_spill] sm:$0xff] %v2966_v44  ;;  %4005 = vst [vmem:[#allocation25_spill] sm:$0xff] %v2968_v46  ;;  %721 = vmatprep.subr.bf16.mxu0 %v2966_v44  ;;  %v2994_v63 = vcombine.low %v73_v57, %v77_v58  ;;  %v2996_v1 = vcombine.low %v74_v59, %v78_v61  ;;  %v85_v3 = vld [vmem:[#allocation2 + $0x160] sm:$0xff]  ;;  %v86_v7 = vld [vmem:[#allocation2 + $0x168] sm:$0xff] }
  0x36   :  { %4006 = vst [vmem:[#allocation26_spill] sm:$0xff] %v2970_v47  ;;  %4007 = vst [vmem:[#allocation27_spill] sm:$0xff] %v2972_v48  ;;  %762 = vmatprep.subr.bf16.mxu1 %v2968_v46  ;;  %v3002_v6 = vcombine.high %v81_v2, %v85_v3  ;;  %v3004_v8 = vcombine.low %v81_v2, %v85_v3  ;;  %v89_v9 = vld [vmem:[#allocation2 + $0x180] sm:$0xff]  ;;  %v3006_v11 = vcombine.high %v82_v5, %v86_v7  ;;  %v90_v24 = vld [vmem:[#allocation2 + $0x188] sm:$0xff] }
  0x37   :  { %4008 = vst [vmem:[#allocation28_spill] sm:$0xff] %v2978_v52  ;;  %4009 = vst [vmem:[#allocation29_spill] sm:$0xff] %v2980_v54  ;;  %v93_v10 = vld [vmem:[#allocation2 + $0x1a0] sm:$0xff]  ;;  %v3008_v12 = vcombine.low %v82_v5, %v86_v7  ;;  %v94_v25 = vld [vmem:[#allocation2 + $0x1a8] sm:$0xff]  ;;  %v115_v2 = vsub.s32 0, %v2902_v4  ;;  %v123_v3 = vsub.s32 2, %v2902_v4 }
  0x38   :  { %722 = vmatpush1.bf16.msra.mxu0 %v2970_v47  ;;  %4010 = vst [vmem:[#allocation30_spill] sm:$0xff] %v2982_v55  ;;  %4011 = vst [vmem:[#allocation31_spill] sm:$0xff] %v2984_v56  ;;  %v3010_v15 = vcombine.high %v89_v9, %v93_v10  ;;  %v97_v26 = vld [vmem:[#allocation2 + $0x1c0] sm:$0xff]  ;;  %v3013_v27 = vcombine.high %v90_v24, %v94_v25  ;;  %v98_v33 = vld [vmem:[#allocation2 + $0x1c8] sm:$0xff]  ;;  %v3017_v35 = vcombine.low %v89_v9, %v93_v10 }
  0x39   :  { %763 = vmatpush1.bf16.msra.mxu1 %v2972_v48  ;;  %723 = vmatprep.subr.bf16.mxu0 %v2978_v52  ;;  %4012 = vst [vmem:[#allocation32_spill] sm:$0xff] %v2990_v60  ;;  %4013 = vst [vmem:[#allocation33_spill] sm:$0xff] %v2992_v62  ;;  %v101_v29 = vld [vmem:[#allocation2 + $0x1e0] sm:$0xff]  ;;  %v102_v34 = vld [vmem:[#allocation2 + $0x1e8] sm:$0xff]  ;;  %v3021_v37 = vcombine.low %v90_v24, %v94_v25  ;;  %v3051_v5 = vrot.slane %v2908_v13, %v115_v2  ;;  %v131_v9 = vsub.s32 4, %v2902_v4 }
  0x3a   :  { %764 = vmatprep.subr.bf16.mxu1 %v2980_v54  ;;  %4014 = vst [vmem:[#allocation34_spill] sm:$0xff] %v2994_v63  ;;  %4015 = vst [vmem:[#allocation35_spill] sm:$0xff] %v2996_v1  ;;  %v3023_v41 = vcombine.high %v97_v26, %v101_v29  ;;  %v3026_v42 = vcombine.high %v98_v33, %v102_v34  ;;  %v43_v43 = vld [vmem:[#allocation2 + $0x10] sm:$0xff]  ;;  %v44_v49 = vld [vmem:[#allocation2 + $0x18] sm:$0xff]  ;;  %v3029_v51 = vcombine.low %v97_v26, %v101_v29 }
  0x3b   :  { %4016 = vst [vmem:[#allocation36_spill] sm:$0xff] %v3002_v6  ;;  %4017 = vst [vmem:[#allocation37_spill] sm:$0xff] %v3004_v8  ;;  %v47_v45 = vld [vmem:[#allocation2 + $0x30] sm:$0xff]  ;;  %v48_v50 = vld [vmem:[#allocation2 + $0x38] sm:$0xff]  ;;  %v3033_v53 = vcombine.low %v98_v33, %v102_v34  ;;  %v3054_v7 = vrot.slane %v2908_v13, %v123_v3  ;;  %v3058_v10 = vrot.slane %v2910_v14, %v115_v2  ;;  %v139_v34 = vsub.s32 6, %v2902_v4 }
  0x3c   :  { %724 = vmatpush1.bf16.msra.mxu0 %v2982_v55  ;;  %4018 = vst [vmem:[#allocation38_spill] sm:$0xff] %v3006_v11  ;;  %4019 = vst [vmem:[#allocation39_spill] sm:$0xff] %v3008_v12  ;;  %v3035_v57 = vcombine.high %v43_v43, %v47_v45  ;;  %v3038_v58 = vcombine.high %v44_v49, %v48_v50  ;;  %v3044_v59 = vcombine.low %v43_v43, %v47_v45 }
  0x3d   :  { %765 = vmatpush1.bf16.msra.mxu1 %v2984_v56  ;;  %725 = vmatprep.subr.bf16.mxu0 %v2990_v60  ;;  %4020 = vst [vmem:[#allocation40_spill] sm:$0xff] %v3010_v15  ;;  %4021 = vst [vmem:[#allocation41_spill] sm:$0xff] %v3013_v27  ;;  %v3046_v61 = vcombine.low %v44_v49, %v48_v50  ;;  %v3061_v24 = vrot.slane %v2910_v14, %v123_v3 }
  0x3e   :  { %766 = vmatprep.subr.bf16.mxu1 %v2992_v62  ;;  %4022 = vst [vmem:[#allocation42_spill] sm:$0xff] %v3017_v35  ;;  %4023 = vst [vmem:[#allocation43_spill] sm:$0xff] %v3021_v37  ;;  %v3066_v33 = vrot.slane %v2908_v13, %v131_v9  ;;  %v3072_v2 = vrot.slane %v2910_v14, %v131_v9  ;;  %v3076_v0 = vrot.slane %v2908_v13, %v139_v34 }
  0x3f   :  { %4024 = vst [vmem:[#allocation44_spill] sm:$0xff] %v3023_v41  ;;  %4025 = vst [vmem:[#allocation45_spill] sm:$0xff] %v3026_v42  ;;  %v3080_v4 = vrot.slane %v2910_v14, %v139_v34 }
  0x40   :  { %726 = vmatpush1.bf16.msra.mxu0 %v2994_v63  ;;  %4026 = vst [vmem:[#allocation46_spill] sm:$0xff] %v3029_v51  ;;  %4027 = vst [vmem:[#allocation47_spill] sm:$0xff] %v3033_v53 }
  0x41   :  { %767 = vmatpush1.bf16.msra.mxu1 %v2996_v1  ;;  %727 = vmatprep.subr.bf16.mxu0 %v3002_v6  ;;  %4028 = vst [vmem:[#allocation48_spill] sm:$0xff] %v3035_v57  ;;  %4029 = vst [vmem:[#allocation49_spill] sm:$0xff] %v3038_v58 }
  0x42   :  { %768 = vmatprep.subr.bf16.mxu1 %v3006_v11  ;;  %4030 = vst [vmem:[#allocation50_spill] sm:$0xff] %v3044_v59  ;;  %4031 = vst [vmem:[#allocation51_spill] sm:$0xff] %v3046_v61 }
  0x43   :  { %4032 = vst [vmem:[#allocation52_spill] sm:$0xff] %v3051_v5  ;;  %4033 = vst [vmem:[#allocation53_spill] sm:$0xff] %v3054_v7 }
  0x44   :  { %728 = vmatpush1.bf16.msra.mxu0 %v3004_v8  ;;  %4034 = vst [vmem:[#allocation54_spill] sm:$0xff] %v3061_v24  ;;  %4035 = vst [vmem:[#allocation55_spill] sm:$0xff] %v3066_v33 }
  0x45   :  { %769 = vmatpush1.bf16.msra.mxu1 %v3008_v12  ;;  %729 = vmatprep.subr.bf16.mxu0 %v3010_v15  ;;  %4036 = vst [vmem:[#allocation56_spill] sm:$0xff] %v3072_v2  ;;  %4037 = vst [vmem:[#allocation57_spill] sm:$0xff] %v3076_v0 }
  0x46   :  { %770 = vmatprep.subr.bf16.mxu1 %v3013_v27  ;;  %4038 = vst [vmem:[#allocation58_spill] sm:$0xff] %v3080_v4 }
  0x48   :  { %730 = vmatpush1.bf16.msra.mxu0 %v3017_v35 }
  0x49   :  { %771 = vmatpush1.bf16.msra.mxu1 %v3021_v37  ;;  %731 = vmatprep.subr.bf16.mxu0 %v3023_v41 }
  0x4a   :  { %772 = vmatprep.subr.bf16.mxu1 %v3026_v42 }
  0x4c   :  { %732 = vmatpush1.bf16.msra.mxu0 %v3029_v51 }
  0x4d   :  { %773 = vmatpush1.bf16.msra.mxu1 %v3033_v53  ;;  %799 = vmatprep.subr.bf16.mxu0 %v3035_v57 }
  0x4e   :  { %840 = vmatprep.subr.bf16.mxu1 %v3038_v58 }
  0xa7   :  { %v159_v25 = vpop.permute.xlu0 %158 }
  0xa8   :  { %v202_v26 = vmul.f32 %v3051_v5, %v159_v25  ;;  %v203_v29 = vmul.f32 %v3054_v7, %v159_v25  ;;  %v204_v3 = vmul.f32 %v3066_v33, %v159_v25  ;;  %v4046_v33 = vmov 0  }
  0xaa   :  { %v206_v43 = vadd.f32 %v202_v26, %v3058_v10  ;;  %v207_v45 = vadd.f32 %v203_v29, %v3061_v24  ;;  %v208_v22 = vadd.f32 %v204_v3, %v3072_v2  ;;  %v205_v26 = vmul.f32 %v3076_v0, %v159_v25  ;;  %v51_v25 = vld [vmem:[#allocation2 + $0x50] sm:$0xff]  ;;  %v72_v0 = vld [vmem:[#allocation2 + $0xf8] sm:$0xff] }
  0xac   :  { %v2420_v49 = vmul.f32 -1.442695, %v206_v43  ;;  %v2421_v50 = vmul.f32 -1.442695, %v207_v45  ;;  %v2422_v29 = vmul.f32 -1.442695, %v208_v22  ;;  %v209_v43 = vadd.f32 %v205_v26, %v3080_v4 }
  0xae   :  { %2539 = vpow2.f32 %v2420_v49 }
  0xaf   :  { %2541 = vpow2.f32 %v2421_v50 }
  0xb0   :  { %2543 = vpow2.f32 %v2422_v29  ;;  %v55_v29 = vld [vmem:[#allocation2 + $0x70] sm:$0xff] }
  0xb1   :  { %2545 = vtanh.f32 %v209_v43  ;;  %v56_v43 = vld [vmem:[#allocation2 + $0x78] sm:$0xff] }
  0xb8   :  { %v2540_v45 = vpop.eup %2539 }
  0xb9   :  { %v2542_v9 = vpop.eup %2541  ;;  %v380_v20 = vadd.f32 1.0, %v2540_v45  ;;  %v52_v45 = vld [vmem:[#allocation2 + $0x58] sm:$0xff] }
  0xba   :  { %v381_v23 = vadd.f32 1.0, %v2542_v9  ;;  %v2544_v13 = vpop.eup %2543  ;;  %v3089_v9 = vcombine.high %v51_v25, %v55_v29  ;;  %v3091_v4 = vcombine.high %v52_v45, %v56_v43 }
  0xbb   :  { %2547 = vrcp.f32 %v380_v20  ;;  %v2546_v49 = vpop.eup %2545  ;;  %v382_v2 = vadd.f32 1.0, %v2544_v13  ;;  %v59_v13 = vld [vmem:[#allocation2 + $0x90] sm:$0xff] }
  0xbc   :  { %2549 = vrcp.f32 %v381_v23  ;;  %4040 = vst [vmem:[#allocation60_spill] sm:$0xff] %v3089_v9  ;;  %4041 = vst [vmem:[#allocation61_spill] sm:$0xff] %v3091_v4 }
  0xbd   :  { %2551 = vrcp.f32 %v382_v2  ;;  %v3097_v2 = vcombine.low %v51_v25, %v55_v29 }
  0xbf   :  { %4042 = vst [vmem:[#allocation62_spill] sm:$0xff] %v3097_v2 }
  0xc5   :  { %v2548_v50 = vpop.eup %2547 }
  0xc6   :  { %v2550_v3 = vpop.eup %2549  ;;  %v391_v14 = vmul.f32 %v2548_v50, %v2546_v49  ;;  %v63_v49 = vld [vmem:[#allocation2 + $0xb0] sm:$0xff]  ;;  %v60_v50 = vld [vmem:[#allocation2 + $0x98] sm:$0xff] }
  0xc7   :  { %v390_v34 = vmul.f32 0.0, %v2550_v3  ;;  %v2552_v22 = vpop.eup %2551  ;;  %v64_v3 = vld [vmem:[#allocation2 + $0xb8] sm:$0xff]  ;;  %v3111_v25 = vcombine.low %v59_v13, %v63_v49 }
  0xc8   :  { %v3113_v29 = vcombine.low %v60_v50, %v64_v3 }
  0xc9   :  { %v3084_v21 = vadd.f32 %v391_v14, %v390_v34  ;;  %v3099_v14 = vcombine.low %v52_v45, %v56_v43  ;;  %v3103_v34 = vcombine.high %v59_v13, %v63_v49  ;;  %4047 = vst [vmem:[#allocation66_spill] sm:$0xff] %v3111_v25 }
  0xca   :  { %4048 = vst [vmem:[#allocation67_spill] sm:$0xff] %v3113_v29 }
  0xcb   :  { %4039 = vst [vmem:[#allocation59_spill] sm:$0xff] %v3084_v21  ;;  %2553 = vtanh.f32 %v3084_v21  ;;  %4043 = vst [vmem:[#allocation63_spill] sm:$0xff] %v3099_v14  ;;  %v68_v21 = vld [vmem:[#allocation2 + $0xd8] sm:$0xff] }
  0xcc   :  { %4044 = vst [vmem:[#allocation64_spill] sm:$0xff] %v3103_v34  ;;  %v3119_v43 = vcombine.high %v68_v21, %v72_v0  ;;  %v3125_v49 = vcombine.low %v68_v21, %v72_v0 }
  0xce   :  { %4050 = vst [vmem:[#allocation69_spill] sm:$0xff] %v3119_v43  ;;  %4052 = vst [vmem:[#allocation71_spill] sm:$0xff] %v3125_v49 }
  0xd5   :  { %v2554_v26 = vpop.eup %2553 }
  0xd6   :  { %v394_v20 = vmul.f32 %v2554_v26, %v2552_v22  ;;  %v3105_v22 = vcombine.high %v60_v50, %v64_v3  ;;  %v67_v26 = vld [vmem:[#allocation2 + $0xd0] sm:$0xff] }
  0xd8   :  { %v3087_v23 = vpack.c.bf16 %v394_v20, %v394_v20  ;;  %4045 = vst [vmem:[#allocation65_spill] sm:$0xff] %v3105_v22  ;;  %v71_v20 = vld [vmem:[#allocation2 + $0xf0] sm:$0xff] }
  0xd9   :  { %v3117_v45 = vcombine.high %v67_v26, %v71_v20  ;;  %v3123_v13 = vcombine.low %v67_v26, %v71_v20 }
  0xda   :  { %750 = vmatmul.mubr.bf16.vlgmr.msra.gmra.mrb[0].mxu0 %v3087_v23  ;;  %791 = vmatmul.mubr.bf16.vlgmr.msra.gmra.mrb[0].mxu1 %v3087_v23 }
  0xdb   :  { %800 = vmatpush1.bf16.msra.mxu0 %v3044_v59  ;;  %841 = vmatpush1.bf16.msra.mxu1 %v3046_v61  ;;  %4049 = vst [vmem:[#allocation68_spill] sm:$0xff] %v3117_v45  ;;  %v76_v61 = vld [vmem:[#allocation2 + $0x118] sm:$0xff]  ;;  %4051 = vst [vmem:[#allocation70_spill] sm:$0xff] %v3123_v13 }
  0xdc   :  { %801 = vmatprep.subr.bf16.mxu0 %v3089_v9  ;;  %842 = vmatprep.subr.bf16.mxu1 %v3091_v4  ;;  %v75_v4 = vld [vmem:[#allocation2 + $0x110] sm:$0xff]  ;;  %v80_v59 = vld [vmem:[#allocation2 + $0x138] sm:$0xff] }
  0xdd   :  { %831 = vmatprep.mubr.bf16.mxu0 %v4046_v33  ;;  %872 = vmatprep.mubr.bf16.mxu1 %v4046_v33  ;;  %v79_v9 = vld [vmem:[#allocation2 + $0x130] sm:$0xff]  ;;  %v3131_v3 = vcombine.high %v76_v61, %v80_v59  ;;  %v3137_v0 = vcombine.low %v76_v61, %v80_v59 }
  0xde   :  { %v3129_v50 = vcombine.high %v75_v4, %v79_v9  ;;  %v3135_v26 = vcombine.low %v75_v4, %v79_v9 }
  0xdf   :  { %802 = vmatpush1.bf16.msra.mxu0 %v3097_v2  ;;  %843 = vmatpush1.bf16.msra.mxu1 %v3099_v14  ;;  %4054 = vst [vmem:[#allocation73_spill] sm:$0xff] %v3131_v3  ;;  %v84_v14 = vld [vmem:[#allocation2 + $0x158] sm:$0xff] }
  0xe0   :  { %803 = vmatprep.subr.bf16.mxu0 %v3103_v34  ;;  %844 = vmatprep.subr.bf16.mxu1 %v3105_v22  ;;  %4053 = vst [vmem:[#allocation72_spill] sm:$0xff] %v3129_v50  ;;  %v83_v22 = vld [vmem:[#allocation2 + $0x150] sm:$0xff]  ;;  %v88_v2 = vld [vmem:[#allocation2 + $0x178] sm:$0xff] }
  0xe1   :  { %v87_v34 = vld [vmem:[#allocation2 + $0x170] sm:$0xff]  ;;  %v3143_v20 = vcombine.high %v84_v14, %v88_v2  ;;  %v3149_v59 = vcombine.low %v84_v14, %v88_v2 }
  0xe2   :  { %v3141_v21 = vcombine.high %v83_v22, %v87_v34  ;;  %v3147_v4 = vcombine.low %v83_v22, %v87_v34 }
  0xe3   :  { %804 = vmatpush1.bf16.msra.mxu0 %v3111_v25  ;;  %845 = vmatpush1.bf16.msra.mxu1 %v3113_v29  ;;  %4055 = vst [vmem:[#allocation74_spill] sm:$0xff] %v3143_v20  ;;  %v92_v29 = vld [vmem:[#allocation2 + $0x198] sm:$0xff] }
  0xe4   :  { %805 = vmatprep.subr.bf16.mxu0 %v3117_v45  ;;  %846 = vmatprep.subr.bf16.mxu1 %v3119_v43  ;;  %v91_v43 = vld [vmem:[#allocation2 + $0x190] sm:$0xff]  ;;  %v96_v25 = vld [vmem:[#allocation2 + $0x1b8] sm:$0xff]  ;;  %4056 = vst [vmem:[#allocation75_spill] sm:$0xff] %v3147_v4 }
  0xe5   :  { %v95_v45 = vld [vmem:[#allocation2 + $0x1b0] sm:$0xff]  ;;  %v3155_v9 = vcombine.high %v92_v29, %v96_v25  ;;  %v3161_v2 = vcombine.low %v92_v29, %v96_v25  ;;  %v2415_v25 = vld [vmem:[%s3841_s0 + $0x6] sm:$0x3]  ;;  %v2417_v29 = vld [vmem:[%s3841_s0 + $0xa] sm:$0x3] }
  0xe6   :  { %v3153_v61 = vcombine.high %v91_v43, %v95_v45  ;;  %v3159_v34 = vcombine.low %v91_v43, %v95_v45  ;;  %v2419_v45 = vld [vmem:[%s3841_s0 + $0xe] sm:$0x3]  ;;  %v215_v43 = vpop.permute.xlu0 %214 }
  0xe7   :  { %806 = vmatpush1.bf16.msra.mxu0 %v3123_v13  ;;  %847 = vmatpush1.bf16.msra.mxu1 %v3125_v49  ;;  %v100_v49 = vld [vmem:[#allocation2 + $0x1d8] sm:$0xff]  ;;  %4057 = vst [vmem:[#allocation76_spill] sm:$0xff] %v3161_v2 }
  0xe8   :  { %807 = vmatprep.subr.bf16.mxu0 %v3129_v50  ;;  %848 = vmatprep.subr.bf16.mxu1 %v3131_v3  ;;  %v99_v3 = vld [vmem:[#allocation2 + $0x1d0] sm:$0xff]  ;;  %v104_v13 = vld [vmem:[#allocation2 + $0x1f8] sm:$0xff] }
  0xe9   :  { %v103_v50 = vld [vmem:[#allocation2 + $0x1f0] sm:$0xff]  ;;  %v3167_v22 = vcombine.high %v100_v49, %v104_v13 }
  0xea   :  { %v3165_v14 = vcombine.high %v99_v3, %v103_v50 }
  0xeb   :  { %808 = vmatpush1.bf16.msra.mxu0 %v3135_v26  ;;  %849 = vmatpush1.bf16.msra.mxu1 %v3137_v0  ;;  %4059 = vst [vmem:[#allocation78_spill] sm:$0xff] %v3167_v22 }
  0xec   :  { %809 = vmatprep.subr.bf16.mxu0 %v3141_v21  ;;  %850 = vmatprep.subr.bf16.mxu1 %v3143_v20  ;;  %4058 = vst [vmem:[#allocation77_spill] sm:$0xff] %v3165_v14  ;;  %v3171_v20 = vcombine.low %v99_v3, %v103_v50  ;;  %v219_v3 = vmul.f32 %v215_v43, %v3054_v7 }
  0xee   :  { %4060 = vst [vmem:[#allocation79_spill] sm:$0xff] %v3171_v20 }
  0xef   :  { %810 = vmatpush1.bf16.msra.mxu0 %v3147_v4  ;;  %851 = vmatpush1.bf16.msra.mxu1 %v3149_v59  ;;  %v3173_v4 = vcombine.low %v100_v49, %v104_v13  ;;  %v217_v13 = vmul.f32 %v215_v43, %v3051_v5 }
  0xf0   :  { %811 = vmatprep.subr.bf16.mxu0 %v3153_v61  ;;  %852 = vmatprep.subr.bf16.mxu1 %v3155_v9 }
  0xf1   :  { %4061 = vst [vmem:[#allocation80_spill] sm:$0xff] %v3173_v4 }
  0xf3   :  { %812 = vmatpush1.bf16.msra.mxu0 %v3159_v34  ;;  %853 = vmatpush1.bf16.msra.mxu1 %v3161_v2 }
  0xf4   :  { %813 = vmatprep.subr.bf16.mxu0 %v3165_v14  ;;  %854 = vmatprep.subr.bf16.mxu1 %v3167_v22 }
  0xf7   :  { %814 = vmatpush1.bf16.msra.mxu0 %v3171_v20  ;;  %855 = vmatpush1.bf16.msra.mxu1 %v3173_v4 }
  0xf8   :  { %931 = vmatprep.subr.bf16.mxu0 %v2942_v28  ;;  %972 = vmatprep.subr.bf16.mxu1 %v2944_v30 }
  0xfa   :  { %832 = vmatmul.mubr.bf16.vlgmr.msra.gmra.mrb[4].mxu0 %v3087_v23  ;;  %873 = vmatmul.mubr.bf16.vlgmr.msra.gmra.mrb[4].mxu1 %v3087_v23  ;;  %v2414_v23 = vld [vmem:[%s3841_s0 + $0x4] sm:$0x3] }
  0xfb   :  { %932 = vmatpush1.bf16.msra.mxu0 %v2946_v31  ;;  %973 = vmatpush1.bf16.msra.mxu1 %v2948_v32 }
  0xfc   :  { %933 = vmatprep.subr.bf16.mxu0 %v2954_v36  ;;  %974 = vmatprep.subr.bf16.mxu1 %v2956_v38 }
  0xfd   :  { %963 = vmatprep.mubr.bf16.mxu0 %v4046_v33  ;;  %1004 = vmatprep.mubr.bf16.mxu1 %v4046_v33 }
  0xfe   :  { %237 = vperm.xlu1 %2538, %v2414_v23  }
  0xff   :  { %934 = vmatpush1.bf16.msra.mxu0 %v2958_v39  ;;  %975 = vmatpush1.bf16.msra.mxu1 %v2960_v40 }
 0x100   :  { %935 = vmatprep.subr.bf16.mxu0 %v2966_v44  ;;  %976 = vmatprep.subr.bf16.mxu1 %v2968_v46 }
 0x102   :  { %260 = vperm.xlu1 %2538, %v2415_v25   ;;  %v218_v25 = vmul.f32 %v215_v43, %v2919_v17 }
 0x103   :  { %936 = vmatpush1.bf16.msra.mxu0 %v2970_v47  ;;  %977 = vmatpush1.bf16.msra.mxu1 %v2972_v48 }
 0x104   :  { %937 = vmatprep.subr.bf16.mxu0 %v2978_v52  ;;  %978 = vmatprep.subr.bf16.mxu1 %v2980_v54  ;;  %v226_v5 = vadd.f32 %v218_v25, %v2916_v16 }
 0x106   :  { %306 = vperm.xlu1 %2538, %v2417_v29   ;;  %v220_v29 = vmul.f32 %v215_v43, %v2925_v19 }
 0x107   :  { %938 = vmatpush1.bf16.msra.mxu0 %v2982_v55  ;;  %979 = vmatpush1.bf16.msra.mxu1 %v2984_v56 }
 0x108   :  { %939 = vmatprep.subr.bf16.mxu0 %v2990_v60  ;;  %980 = vmatprep.subr.bf16.mxu1 %v2992_v62  ;;  %v228_v7 = vadd.f32 %v220_v29, %v2922_v18 }
 0x10a   :  { %352 = vperm.xlu1 %2538, %v2419_v45   ;;  %v227_v45 = vadd.f32 %v219_v3, %v3061_v24 }
 0x10b   :  { %940 = vmatpush1.bf16.msra.mxu0 %v2994_v63  ;;  %981 = vmatpush1.bf16.msra.mxu1 %v2996_v1 }
 0x10c   :  { %941 = vmatprep.subr.bf16.mxu0 %v3002_v6  ;;  %982 = vmatprep.subr.bf16.mxu1 %v3006_v11 }
 0x10f   :  { %942 = vmatpush1.bf16.msra.mxu0 %v3004_v8  ;;  %983 = vmatpush1.bf16.msra.mxu1 %v3008_v12 }
 0x110   :  { %943 = vmatprep.subr.bf16.mxu0 %v3010_v15  ;;  %984 = vmatprep.subr.bf16.mxu1 %v3013_v27 }
 0x113   :  { %944 = vmatpush1.bf16.msra.mxu0 %v3017_v35  ;;  %985 = vmatpush1.bf16.msra.mxu1 %v3021_v37 }
 0x114   :  { %945 = vmatprep.subr.bf16.mxu0 %v3023_v41  ;;  %986 = vmatprep.subr.bf16.mxu1 %v3026_v42  ;;  %v225_v41 = vadd.f32 %v217_v13, %v3058_v10 }
 0x117   :  { %946 = vmatpush1.bf16.msra.mxu0 %v3029_v51  ;;  %987 = vmatpush1.bf16.msra.mxu1 %v3033_v53 }
 0x118   :  { %1013 = vmatprep.subr.bf16.mxu0 %v3035_v57  ;;  %1054 = vmatprep.subr.bf16.mxu1 %v3038_v58 }
 0x1ad   :  { %v751_v49 = vpop.f32.mrb[0].mxu0  ;;  %v792_v50 = vpop.f32.mrb[0].mxu1 }
 0x1ae   :  { %v753_v23 = vpop.f32.mrb[1].mxu0  ;;  %v794_v58 = vpop.f32.mrb[1].mxu1  ;;  %v752_v37 = vadd.f32 %v751_v49, %v225_v41  ;;  %v793_v35 = vadd.f32 %v792_v50, %v227_v45  ;;  %v4062_v49 = vld [vmem:[#allocation55_spill] sm:$0xff]  ;;  %v4063_v50 = vld [vmem:[#allocation57_spill] sm:$0xff] }
 0x1af   :  { %v755_v57 = vpop.f32.mrb[2].mxu0  ;;  %v796_v53 = vpop.f32.mrb[2].mxu1  ;;  %v754_v27 = vadd.f32 %v753_v23, %v226_v5  ;;  %v795_v15 = vadd.f32 %v794_v58, %v228_v7  ;;  %v221_v25 = vmul.f32 %v215_v43, %v4062_v49  ;;  %v223_v45 = vmul.f32 %v215_v43, %v4063_v50  ;;  %v4064_v5 = vld [vmem:[#allocation13_spill] sm:$0xff]  ;;  %v4067_v7 = vld [vmem:[#allocation58_spill] sm:$0xff] }
 0x1b0   :  { %v756_v51 = vpop.f32.mrb[3].mxu0  ;;  %v797_v42 = vpop.f32.mrb[3].mxu1  ;;  %v2487_v12 = vmul.f32 -1.442695, %v752_v37  ;;  %v2489_v17 = vmul.f32 -1.442695, %v793_v35  ;;  %v222_v58 = vmul.f32 %v215_v43, %v4064_v5 }
 0x1b1   :  { %v2488_v57 = vmul.f32 -1.442695, %v754_v27  ;;  %v2490_v53 = vmul.f32 -1.442695, %v795_v15  ;;  %v4065_v37 = vld [vmem:[#allocation15_spill] sm:$0xff]  ;;  %v231_v23 = vadd.f32 %v223_v45, %v4067_v7  ;;  %v4069_v49 = vld [vmem:[#allocation14_spill] sm:$0xff] }
 0x1b2   :  { %2555 = vpow2.f32 %v2487_v12  ;;  %v224_v35 = vmul.f32 %v215_v43, %v4065_v37 }
 0x1b3   :  { %2557 = vpow2.f32 %v2489_v17  ;;  %v4066_v17 = vld [vmem:[#allocation56_spill] sm:$0xff] }
 0x1b4   :  { %2559 = vpow2.f32 %v2488_v57  ;;  %v229_v12 = vadd.f32 %v221_v25, %v4066_v17  ;;  %v232_v16 = vadd.f32 %v224_v35, %v4069_v49 }
 0x1b5   :  { %2561 = vpow2.f32 %v2490_v53 }
 0x1bc   :  { %v2556_v42 = vpop.eup %2555 }
 0x1bd   :  { %v2558_v51 = vpop.eup %2557  ;;  %v899_v41 = vadd.f32 1.0, %v2556_v42  ;;  %v4068_v42 = vld [vmem:[#allocation12_spill] sm:$0xff] }
 0x1be   :  { %v2560_v13 = vpop.eup %2559  ;;  %v901_v29 = vadd.f32 1.0, %v2558_v51  ;;  %v230_v18 = vadd.f32 %v222_v58, %v4068_v42 }
 0x1bf   :  { %v2562_v3 = vpop.eup %2561  ;;  %v900_v27 = vadd.f32 1.0, %v2560_v13  ;;  %2563 = vrcp.f32 %v899_v41 }
 0x1c0   :  { %v902_v15 = vadd.f32 1.0, %v2562_v3  ;;  %2565 = vrcp.f32 %v901_v29 }
 0x1c1   :  { %2567 = vrcp.f32 %v900_v27 }
 0x1c2   :  { %2569 = vrcp.f32 %v902_v15 }
 0x1c9   :  { %v2564_v58 = vpop.eup %2563 }
 0x1ca   :  { %v2566_v35 = vpop.eup %2565 }
 0x1cb   :  { %v2568_v27 = vpop.eup %2567 }
 0x1cd   :  { %v833_v57 = vpop.f32.mrb[4].mxu0  ;;  %v874_v53 = vpop.f32.mrb[4].mxu1 }
 0x1ce   :  { %v834_v51 = vadd.f32 %v833_v57, %v229_v12  ;;  %v875_v50 = vadd.f32 %v874_v53, %v231_v23  ;;  %v835_v5 = vpop.f32.mrb[5].mxu0  ;;  %v876_v24 = vpop.f32.mrb[5].mxu1  ;;  %v4070_v53 = vld [vmem:[#allocation59_spill] sm:$0xff] }
 0x1cf   :  { %v836_v43 = vadd.f32 %v835_v5, %v230_v18  ;;  %v877_v13 = vadd.f32 %v876_v24, %v232_v16  ;;  %v837_v3 = vpop.f32.mrb[6].mxu0  ;;  %v878_v41 = vpop.f32.mrb[6].mxu1  ;;  %v924_v15 = vmul.f32 %v2566_v35, %v4070_v53  ;;  %v4074_v53 = vld [vmem:[#allocation61_spill] sm:$0xff] }
 0x1d0   :  { %v2491_v25 = vmul.f32 -1.442695, %v834_v51  ;;  %2571 = vtanh.f32 %v875_v50  ;;  %v838_v45 = vpop.f32.mrb[7].mxu0  ;;  %v879_v29 = vpop.f32.mrb[7].mxu1 }
 0x1d1   :  { %v2492_v7 = vmul.f32 -1.442695, %v836_v43  ;;  %2573 = vtanh.f32 %v877_v13  ;;  %v2570_v12 = vpop.eup %2569 }
 0x1d2   :  { %2575 = vpow2.f32 %v2491_v25  ;;  %v919_v24 = vmul.f32 0.0, %v2570_v12  ;;  %v4071_v12 = vld [vmem:[#allocation50_spill] sm:$0xff] }
 0x1d3   :  { %2577 = vpow2.f32 %v2492_v7 }
 0x1da   :  { %v2572_v23 = vpop.eup %2571 }
 0x1db   :  { %v2574_v57 = vpop.eup %2573  ;;  %v925_v18 = vmul.f32 %v2572_v23, %v2564_v58  ;;  %v4072_v23 = vld [vmem:[#allocation51_spill] sm:$0xff] }
 0x1dc   :  { %v2576_v16 = vpop.eup %2575  ;;  %v920_v5 = vmul.f32 %v2574_v57, %v2568_v27  ;;  %v4073_v57 = vld [vmem:[#allocation60_spill] sm:$0xff] }
 0x1dd   :  { %v2578_v51 = vpop.eup %2577  ;;  %v903_v50 = vadd.f32 1.0, %v2576_v16  ;;  %v3246_v3 = vadd.f32 %v925_v18, %v924_v15  ;;  %v4075_v15 = vld [vmem:[#allocation62_spill] sm:$0xff]  ;;  %v4076_v18 = vld [vmem:[#allocation63_spill] sm:$0xff]  ;;  %v4077_v16 = vld [vmem:[#allocation64_spill] sm:$0xff] }
 0x1de   :  { %v904_v43 = vadd.f32 1.0, %v2578_v51  ;;  %v3248_v13 = vadd.f32 %v920_v5, %v919_v24  ;;  %v4078_v24 = vld [vmem:[#allocation65_spill] sm:$0xff]  ;;  %v4079_v5 = vld [vmem:[#allocation66_spill] sm:$0xff]  ;;  %v4080_v51 = vld [vmem:[#allocation67_spill] sm:$0xff] }
 0x1df   :  { %2579 = vrcp.f32 %v903_v50  ;;  %v4081_v50 = vld [vmem:[#allocation68_spill] sm:$0xff] }
 0x1e0   :  { %2581 = vtanh.f32 %v3246_v3 }
 0x1e1   :  { %2583 = vrcp.f32 %v904_v43  ;;  %v4082_v43 = vld [vmem:[#allocation69_spill] sm:$0xff] }
 0x1e2   :  { %2585 = vtanh.f32 %v3248_v13 }
 0x1e9   :  { %v2580_v7 = vpop.eup %2579 }
 0x1ea   :  { %v2582_v41 = vpop.eup %2581 }
 0x1eb   :  { %v2584_v25 = vpop.eup %2583  ;;  %v928_v45 = vmul.f32 %v2582_v41, %v2580_v7  ;;  %v4083_v7 = vld [vmem:[#allocation70_spill] sm:$0xff]  ;;  %v4084_v41 = vld [vmem:[#allocation71_spill] sm:$0xff] }
 0x1ec   :  { %v2586_v29 = vpop.eup %2585 }
 0x1ed   :  { %v923_v58 = vmul.f32 %v2586_v29, %v2584_v25  ;;  %v4085_v25 = vld [vmem:[#allocation72_spill] sm:$0xff]  ;;  %v4087_v29 = vld [vmem:[#allocation74_spill] sm:$0xff] }
 0x1ef   :  { %v929_v35 = vadd.f32 %v928_v45, %v923_v58  ;;  %v4086_v45 = vld [vmem:[#allocation73_spill] sm:$0xff]  ;;  %v4088_v58 = vld [vmem:[#allocation75_spill] sm:$0xff] }
 0x1f1   :  { %v930_v27 = vpack.c.bf16 %v929_v35, %v929_v35  ;;  %v4089_v35 = vld [vmem:[#allocation39_spill] sm:$0xff] }
 0x1f3   :  { %964 = vmatmul.mubr.bf16.vlgmr.msra.gmra.mrb[8].mxu0 %v930_v27  ;;  %1005 = vmatmul.mubr.bf16.vlgmr.msra.gmra.mrb[8].mxu1 %v930_v27 }
 0x1f4   :  { %1014 = vmatpush1.bf16.msra.mxu0 %v4071_v12  ;;  %1055 = vmatpush1.bf16.msra.mxu1 %v4072_v23 }
 0x1f5   :  { %1015 = vmatprep.subr.bf16.mxu0 %v4073_v57  ;;  %1056 = vmatprep.subr.bf16.mxu1 %v4074_v53 }
 0x1f6   :  { %1045 = vmatprep.mubr.bf16.mxu0 %v4046_v33  ;;  %1086 = vmatprep.mubr.bf16.mxu1 %v4046_v33 }
 0x1f8   :  { %1016 = vmatpush1.bf16.msra.mxu0 %v4075_v15  ;;  %1057 = vmatpush1.bf16.msra.mxu1 %v4076_v18 }
 0x1f9   :  { %1017 = vmatprep.subr.bf16.mxu0 %v4077_v16  ;;  %1058 = vmatprep.subr.bf16.mxu1 %v4078_v24 }
 0x1fc   :  { %1018 = vmatpush1.bf16.msra.mxu0 %v4079_v5  ;;  %1059 = vmatpush1.bf16.msra.mxu1 %v4080_v51 }
 0x1fd   :  { %1019 = vmatprep.subr.bf16.mxu0 %v4081_v50  ;;  %1060 = vmatprep.subr.bf16.mxu1 %v4082_v43 }
 0x200   :  { %1020 = vmatpush1.bf16.msra.mxu0 %v4083_v7  ;;  %1061 = vmatpush1.bf16.msra.mxu1 %v4084_v41 }
 0x201   :  { %1021 = vmatprep.subr.bf16.mxu0 %v4085_v25  ;;  %1062 = vmatprep.subr.bf16.mxu1 %v4086_v45 }
 0x204   :  { %1022 = vmatpush1.bf16.msra.mxu0 %v3135_v26  ;;  %1063 = vmatpush1.bf16.msra.mxu1 %v3137_v0 }
 0x205   :  { %1023 = vmatprep.subr.bf16.mxu0 %v3141_v21  ;;  %1064 = vmatprep.subr.bf16.mxu1 %v4087_v29 }
 0x208   :  { %1024 = vmatpush1.bf16.msra.mxu0 %v4088_v58  ;;  %1065 = vmatpush1.bf16.msra.mxu1 %v3149_v59 }
 0x209   :  { %1025 = vmatprep.subr.bf16.mxu0 %v3153_v61  ;;  %1066 = vmatprep.subr.bf16.mxu1 %v3155_v9 }
 0x20c   :  { %1026 = vmatpush1.bf16.msra.mxu0 %v3159_v34  ;;  %1067 = vmatpush1.bf16.msra.mxu1 %v3161_v2 }
 0x20d   :  { %1027 = vmatprep.subr.bf16.mxu0 %v3165_v14  ;;  %1068 = vmatprep.subr.bf16.mxu1 %v3167_v22 }
 0x210   :  { %1028 = vmatpush1.bf16.msra.mxu0 %v3171_v20  ;;  %1069 = vmatpush1.bf16.msra.mxu1 %v3173_v4 }
 0x211   :  { %1145 = vmatprep.subr.bf16.mxu0 %v2942_v28  ;;  %1186 = vmatprep.subr.bf16.mxu1 %v2944_v30 }
 0x213   :  { %1046 = vmatmul.mubr.bf16.vlgmr.msra.gmra.mrb[12].mxu0 %v930_v27  ;;  %1087 = vmatmul.mubr.bf16.vlgmr.msra.gmra.mrb[12].mxu1 %v930_v27  ;;  %v4090_v27 = vld [vmem:[#allocation40_spill] sm:$0xff] }
 0x214   :  { %1146 = vmatpush1.bf16.msra.mxu0 %v2946_v31  ;;  %1187 = vmatpush1.bf16.msra.mxu1 %v2948_v32 }
 0x215   :  { %1147 = vmatprep.subr.bf16.mxu0 %v2954_v36  ;;  %1188 = vmatprep.subr.bf16.mxu1 %v2956_v38  ;;  %v4104_v38 = vld [vmem:[#allocation8_spill] sm:$0xff]  ;;  %v4105_v36 = vld [vmem:[#allocation10_spill] sm:$0xff] }
 0x216   :  { %1177 = vmatprep.mubr.bf16.mxu0 %v4046_v33  ;;  %1218 = vmatprep.mubr.bf16.mxu1 %v4046_v33 }
 0x218   :  { %1148 = vmatpush1.bf16.msra.mxu0 %v2958_v39  ;;  %1189 = vmatpush1.bf16.msra.mxu1 %v2960_v40 }
 0x219   :  { %1149 = vmatprep.subr.bf16.mxu0 %v2966_v44  ;;  %1190 = vmatprep.subr.bf16.mxu1 %v2968_v46 }
 0x21c   :  { %1150 = vmatpush1.bf16.msra.mxu0 %v2970_v47  ;;  %1191 = vmatpush1.bf16.msra.mxu1 %v2972_v48 }
 0x21d   :  { %1151 = vmatprep.subr.bf16.mxu0 %v2978_v52  ;;  %1192 = vmatprep.subr.bf16.mxu1 %v2980_v54 }
 0x220   :  { %1152 = vmatpush1.bf16.msra.mxu0 %v2982_v55  ;;  %1193 = vmatpush1.bf16.msra.mxu1 %v2984_v56  ;;  %v4091_v55 = vld [vmem:[#allocation41_spill] sm:$0xff]  ;;  %v4092_v56 = vld [vmem:[#allocation42_spill] sm:$0xff] }
 0x221   :  { %1153 = vmatprep.subr.bf16.mxu0 %v2990_v60  ;;  %1194 = vmatprep.subr.bf16.mxu1 %v2992_v62  ;;  %v4093_v60 = vld [vmem:[#allocation43_spill] sm:$0xff]  ;;  %v4094_v62 = vld [vmem:[#allocation44_spill] sm:$0xff] }
 0x224   :  { %1154 = vmatpush1.bf16.msra.mxu0 %v2994_v63  ;;  %1195 = vmatpush1.bf16.msra.mxu1 %v2996_v1  ;;  %v4095_v63 = vld [vmem:[#allocation45_spill] sm:$0xff]  ;;  %v4096_v1 = vld [vmem:[#allocation46_spill] sm:$0xff] }
 0x225   :  { %1155 = vmatprep.subr.bf16.mxu0 %v3002_v6  ;;  %1196 = vmatprep.subr.bf16.mxu1 %v3006_v11  ;;  %v4097_v6 = vld [vmem:[#allocation47_spill] sm:$0xff]  ;;  %v4098_v11 = vld [vmem:[#allocation48_spill] sm:$0xff] }
 0x228   :  { %1156 = vmatpush1.bf16.msra.mxu0 %v3004_v8  ;;  %1197 = vmatpush1.bf16.msra.mxu1 %v4089_v35  ;;  %v4099_v8 = vld [vmem:[#allocation49_spill] sm:$0xff]  ;;  %v238_v35 = vpop.permute.xlu1 %237 }
 0x229   :  { %1157 = vmatprep.subr.bf16.mxu0 %v4090_v27  ;;  %1198 = vmatprep.subr.bf16.mxu1 %v4091_v55  ;;  %v4100_v27 = vld [vmem:[#allocation52_spill] sm:$0xff]  ;;  %v4101_v55 = vld [vmem:[#allocation53_spill] sm:$0xff] }
 0x22a   :  { %v240_v54 = vmul.f32 %v238_v35, %v4100_v27  ;;  %v242_v52 = vmul.f32 %v238_v35, %v4101_v55 }
 0x22c   :  { %1158 = vmatpush1.bf16.msra.mxu0 %v4092_v56  ;;  %1199 = vmatpush1.bf16.msra.mxu1 %v4093_v60  ;;  %v4102_v60 = vld [vmem:[#allocation9_spill] sm:$0xff] }
 0x22d   :  { %1159 = vmatprep.subr.bf16.mxu0 %v4094_v62  ;;  %1200 = vmatprep.subr.bf16.mxu1 %v4095_v63  ;;  %v241_v47 = vmul.f32 %v238_v35, %v4102_v60  ;;  %v243_v63 = vmul.f32 %v238_v35, %v2925_v19 }
 0x22f   :  { %v249_v27 = vadd.f32 %v241_v47, %v4104_v38  ;;  %v251_v55 = vadd.f32 %v243_v63, %v4105_v36  ;;  %v4106_v47 = vld [vmem:[#allocation55_spill] sm:$0xff]  ;;  %v4107_v63 = vld [vmem:[#allocation57_spill] sm:$0xff] }
 0x230   :  { %1160 = vmatpush1.bf16.msra.mxu0 %v4096_v1  ;;  %1201 = vmatpush1.bf16.msra.mxu1 %v4097_v6  ;;  %v248_v1 = vadd.f32 %v240_v54, %v3058_v10 }
 0x231   :  { %1227 = vmatprep.subr.bf16.mxu0 %v4098_v11  ;;  %1268 = vmatprep.subr.bf16.mxu1 %v4099_v8  ;;  %v4103_v11 = vld [vmem:[#allocation54_spill] sm:$0xff] }
 0x232   :  { %v250_v40 = vadd.f32 %v242_v52, %v4103_v11 }
 0x2c6   :  { %v965_v56 = vpop.f32.mrb[8].mxu0  ;;  %v1006_v48 = vpop.f32.mrb[8].mxu1 }
 0x2c7   :  { %v967_v62 = vpop.f32.mrb[9].mxu0  ;;  %v1008_v46 = vpop.f32.mrb[9].mxu1  ;;  %v966_v32 = vadd.f32 %v965_v56, %v248_v1  ;;  %v1007_v31 = vadd.f32 %v1006_v48, %v250_v40  ;;  %v246_v56 = vmul.f32 %v238_v35, %v4107_v63  ;;  %v4108_v48 = vld [vmem:[#allocation13_spill] sm:$0xff] }
 0x2c8   :  { %v969_v6 = vpop.f32.mrb[10].mxu0  ;;  %v1010_v44 = vpop.f32.mrb[10].mxu1  ;;  %v968_v30 = vadd.f32 %v967_v62, %v249_v27  ;;  %v1009_v60 = vadd.f32 %v1008_v46, %v251_v55  ;;  %v245_v46 = vmul.f32 %v238_v35, %v4108_v48 }
 0x2c9   :  { %v970_v8 = vpop.f32.mrb[11].mxu0  ;;  %v1011_v39 = vpop.f32.mrb[11].mxu1  ;;  %v2493_v28 = vmul.f32 -1.442695, %v966_v32  ;;  %v2495_v4 = vmul.f32 -1.442695, %v1007_v31  ;;  %v247_v31 = vmul.f32 %v238_v35, %v4065_v37 }
 0x2ca   :  { %v2494_v19 = vmul.f32 -1.442695, %v968_v30  ;;  %v2496_v20 = vmul.f32 -1.442695, %v1009_v60  ;;  %v244_v8 = vmul.f32 %v238_v35, %v4106_v47  ;;  %v253_v1 = vadd.f32 %v245_v46, %v4068_v42 }
 0x2cb   :  { %2587 = vpow2.f32 %v2493_v28  ;;  %v4109_v28 = vld [vmem:[#allocation58_spill] sm:$0xff] }
 0x2cc   :  { %2589 = vpow2.f32 %v2495_v4  ;;  %v254_v55 = vadd.f32 %v246_v56, %v4109_v28 }
 0x2cd   :  { %2591 = vpow2.f32 %v2494_v19  ;;  %v252_v19 = vadd.f32 %v244_v8, %v4066_v17 }
 0x2ce   :  { %2593 = vpow2.f32 %v2496_v20  ;;  %v255_v20 = vadd.f32 %v247_v31, %v4069_v49 }
 0x2d5   :  { %v2588_v44 = vpop.eup %2587 }
 0x2d6   :  { %v2590_v52 = vpop.eup %2589  ;;  %v1113_v6 = vadd.f32 1.0, %v2588_v44 }
 0x2d7   :  { %v2592_v54 = vpop.eup %2591  ;;  %v1115_v40 = vadd.f32 1.0, %v2590_v52 }
 0x2d8   :  { %v2594_v39 = vpop.eup %2593  ;;  %v1114_v30 = vadd.f32 1.0, %v2592_v54  ;;  %2595 = vrcp.f32 %v1113_v6 }
 0x2d9   :  { %v1116_v32 = vadd.f32 1.0, %v2594_v39  ;;  %2597 = vrcp.f32 %v1115_v40 }
 0x2da   :  { %2599 = vrcp.f32 %v1114_v30 }
 0x2db   :  { %2601 = vrcp.f32 %v1116_v32 }
 0x2e2   :  { %v2596_v46 = vpop.eup %2595 }
 0x2e3   :  { %v2598_v31 = vpop.eup %2597 }
 0x2e4   :  { %v2600_v30 = vpop.eup %2599  ;;  %v1138_v32 = vmul.f32 %v2598_v31, %v3246_v3  ;;  %v4111_v31 = vld [vmem:[#allocation80_spill] sm:$0xff] }
 0x2e6   :  { %v1047_v60 = vpop.f32.mrb[12].mxu0  ;;  %v1088_v62 = vpop.f32.mrb[12].mxu1 }
 0x2e7   :  { %v1048_v4 = vadd.f32 %v1047_v60, %v252_v19  ;;  %v1089_v27 = vadd.f32 %v1088_v62, %v254_v55  ;;  %v1049_v44 = vpop.f32.mrb[13].mxu0  ;;  %v1090_v52 = vpop.f32.mrb[13].mxu1 }
 0x2e8   :  { %v1050_v35 = vadd.f32 %v1049_v44, %v253_v1  ;;  %v1091_v54 = vadd.f32 %v1090_v52, %v255_v20  ;;  %v1051_v39 = vpop.f32.mrb[14].mxu0  ;;  %v1092_v6 = vpop.f32.mrb[14].mxu1 }
 0x2e9   :  { %v2497_v8 = vmul.f32 -1.442695, %v1048_v4  ;;  %2603 = vtanh.f32 %v1089_v27  ;;  %v1052_v56 = vpop.f32.mrb[15].mxu0  ;;  %v1093_v40 = vpop.f32.mrb[15].mxu1 }
 0x2ea   :  { %v2498_v28 = vmul.f32 -1.442695, %v1050_v35  ;;  %2605 = vtanh.f32 %v1091_v54  ;;  %v2602_v19 = vpop.eup %2601 }
 0x2eb   :  { %2607 = vpow2.f32 %v2497_v8  ;;  %v1133_v20 = vmul.f32 %v2602_v19, %v3248_v13  ;;  %v4113_v19 = vld [vmem:[#allocation17_spill] sm:$0xff] }
 0x2ec   :  { %2609 = vpow2.f32 %v2498_v28 }
 0x2f3   :  { %v2604_v55 = vpop.eup %2603 }
 0x2f4   :  { %v2606_v60 = vpop.eup %2605  ;;  %v1139_v62 = vmul.f32 %v2604_v55, %v2596_v46  ;;  %v4110_v46 = vld [vmem:[#allocation79_spill] sm:$0xff]  ;;  %v4114_v55 = vld [vmem:[#allocation18_spill] sm:$0xff] }
 0x2f5   :  { %v2608_v1 = vpop.eup %2607  ;;  %v1134_v4 = vmul.f32 %v2606_v60, %v2600_v30  ;;  %v4112_v30 = vld [vmem:[#allocation16_spill] sm:$0xff]  ;;  %v4115_v60 = vld [vmem:[#allocation19_spill] sm:$0xff] }
 0x2f6   :  { %v2610_v27 = vpop.eup %2609  ;;  %v1117_v44 = vadd.f32 1.0, %v2608_v1  ;;  %v3338_v52 = vadd.f32 %v1139_v62, %v1138_v32  ;;  %v4116_v32 = vld [vmem:[#allocation20_spill] sm:$0xff]  ;;  %v4117_v62 = vld [vmem:[#allocation21_spill] sm:$0xff]  ;;  %v4118_v1 = vld [vmem:[#allocation22_spill] sm:$0xff] }
 0x2f7   :  { %v1118_v35 = vadd.f32 1.0, %v2610_v27  ;;  %v3340_v54 = vadd.f32 %v1134_v4, %v1133_v20  ;;  %v4119_v20 = vld [vmem:[#allocation23_spill] sm:$0xff]  ;;  %v4120_v4 = vld [vmem:[#allocation24_spill] sm:$0xff]  ;;  %v4121_v27 = vld [vmem:[#allocation25_spill] sm:$0xff] }
 0x2f8   :  { %2611 = vrcp.f32 %v1117_v44  ;;  %v4122_v44 = vld [vmem:[#allocation26_spill] sm:$0xff] }
 0x2f9   :  { %2613 = vtanh.f32 %v3338_v52 }
 0x2fa   :  { %2615 = vrcp.f32 %v1118_v35  ;;  %v4123_v35 = vld [vmem:[#allocation27_spill] sm:$0xff] }
 0x2fb   :  { %2617 = vtanh.f32 %v3340_v54 }
 0x302   :  { %v2612_v28 = vpop.eup %2611 }
 0x303   :  { %v2614_v3 = vpop.eup %2613 }
 0x304   :  { %v2616_v39 = vpop.eup %2615  ;;  %v1142_v6 = vmul.f32 %v2614_v3, %v2612_v28  ;;  %v4124_v28 = vld [vmem:[#allocation28_spill] sm:$0xff]  ;;  %v4125_v3 = vld [vmem:[#allocation29_spill] sm:$0xff] }
 0x305   :  { %v2618_v8 = vpop.eup %2617 }
 0x306   :  { %v1137_v13 = vmul.f32 %v2618_v8, %v2616_v39  ;;  %v4126_v39 = vld [vmem:[#allocation30_spill] sm:$0xff]  ;;  %v4128_v8 = vld [vmem:[#allocation32_spill] sm:$0xff] }
 0x308   :  { %v1143_v56 = vadd.f32 %v1142_v6, %v1137_v13  ;;  %v4127_v6 = vld [vmem:[#allocation31_spill] sm:$0xff]  ;;  %v4129_v13 = vld [vmem:[#allocation33_spill] sm:$0xff] }
 0x30a   :  { %v1144_v40 = vpack.c.bf16 %v1143_v56, %v1143_v56  ;;  %v4130_v56 = vld [vmem:[#allocation34_spill] sm:$0xff] }
 0x30c   :  { %1178 = vmatmul.mubr.bf16.vlgmr.msra.gmra.mrb[16].mxu0 %v1144_v40  ;;  %1219 = vmatmul.mubr.bf16.vlgmr.msra.gmra.mrb[16].mxu1 %v1144_v40 }
 0x30d   :  { %1228 = vmatpush1.bf16.msra.mxu0 %v4071_v12  ;;  %1269 = vmatpush1.bf16.msra.mxu1 %v4072_v23 }
 0x30e   :  { %1229 = vmatprep.subr.bf16.mxu0 %v4073_v57  ;;  %1270 = vmatprep.subr.bf16.mxu1 %v4074_v53 }
 0x30f   :  { %1259 = vmatprep.mubr.bf16.mxu0 %v4046_v33  ;;  %1300 = vmatprep.mubr.bf16.mxu1 %v4046_v33 }
 0x311   :  { %1230 = vmatpush1.bf16.msra.mxu0 %v4075_v15  ;;  %1271 = vmatpush1.bf16.msra.mxu1 %v4076_v18 }
 0x312   :  { %1231 = vmatprep.subr.bf16.mxu0 %v4077_v16  ;;  %1272 = vmatprep.subr.bf16.mxu1 %v4078_v24 }
 0x315   :  { %1232 = vmatpush1.bf16.msra.mxu0 %v4079_v5  ;;  %1273 = vmatpush1.bf16.msra.mxu1 %v4080_v51 }
 0x316   :  { %1233 = vmatprep.subr.bf16.mxu0 %v4081_v50  ;;  %1274 = vmatprep.subr.bf16.mxu1 %v4082_v43 }
 0x319   :  { %1234 = vmatpush1.bf16.msra.mxu0 %v4083_v7  ;;  %1275 = vmatpush1.bf16.msra.mxu1 %v4084_v41 }
 0x31a   :  { %1235 = vmatprep.subr.bf16.mxu0 %v4085_v25  ;;  %1276 = vmatprep.subr.bf16.mxu1 %v4086_v45 }
 0x31d   :  { %1236 = vmatpush1.bf16.msra.mxu0 %v3135_v26  ;;  %1277 = vmatpush1.bf16.msra.mxu1 %v3137_v0 }
 0x31e   :  { %1237 = vmatprep.subr.bf16.mxu0 %v3141_v21  ;;  %1278 = vmatprep.subr.bf16.mxu1 %v4087_v29 }
 0x321   :  { %1238 = vmatpush1.bf16.msra.mxu0 %v4088_v58  ;;  %1279 = vmatpush1.bf16.msra.mxu1 %v3149_v59 }
 0x322   :  { %1239 = vmatprep.subr.bf16.mxu0 %v3153_v61  ;;  %1280 = vmatprep.subr.bf16.mxu1 %v3155_v9 }
 0x325   :  { %1240 = vmatpush1.bf16.msra.mxu0 %v3159_v34  ;;  %1281 = vmatpush1.bf16.msra.mxu1 %v3161_v2 }
 0x326   :  { %1241 = vmatprep.subr.bf16.mxu0 %v3165_v14  ;;  %1282 = vmatprep.subr.bf16.mxu1 %v3167_v22 }
 0x329   :  { %1242 = vmatpush1.bf16.msra.mxu0 %v4110_v46  ;;  %1283 = vmatpush1.bf16.msra.mxu1 %v4111_v31 }
 0x32a   :  { %1359 = vmatprep.subr.bf16.mxu0 %v4112_v30  ;;  %1400 = vmatprep.subr.bf16.mxu1 %v4113_v19 }
 0x32c   :  { %1260 = vmatmul.mubr.bf16.vlgmr.msra.gmra.mrb[20].mxu0 %v1144_v40  ;;  %1301 = vmatmul.mubr.bf16.vlgmr.msra.gmra.mrb[20].mxu1 %v1144_v40  ;;  %v4131_v40 = vld [vmem:[#allocation35_spill] sm:$0xff] }
 0x32d   :  { %1360 = vmatpush1.bf16.msra.mxu0 %v4114_v55  ;;  %1401 = vmatpush1.bf16.msra.mxu1 %v4115_v60 }
 0x32e   :  { %1361 = vmatprep.subr.bf16.mxu0 %v4116_v32  ;;  %1402 = vmatprep.subr.bf16.mxu1 %v4117_v62 }
 0x32f   :  { %1391 = vmatprep.mubr.bf16.mxu0 %v4046_v33  ;;  %1432 = vmatprep.mubr.bf16.mxu1 %v4046_v33 }
 0x331   :  { %1362 = vmatpush1.bf16.msra.mxu0 %v4118_v1  ;;  %1403 = vmatpush1.bf16.msra.mxu1 %v4119_v20 }
 0x332   :  { %1363 = vmatprep.subr.bf16.mxu0 %v4120_v4  ;;  %1404 = vmatprep.subr.bf16.mxu1 %v4121_v27  ;;  %v4132_v27 = vld [vmem:[#allocation36_spill] sm:$0xff] }
 0x335   :  { %1364 = vmatpush1.bf16.msra.mxu0 %v4122_v44  ;;  %1405 = vmatpush1.bf16.msra.mxu1 %v4123_v35  ;;  %v4133_v44 = vld [vmem:[#allocation38_spill] sm:$0xff]  ;;  %v4134_v35 = vld [vmem:[#allocation37_spill] sm:$0xff] }
 0x336   :  { %1365 = vmatprep.subr.bf16.mxu0 %v4124_v28  ;;  %1406 = vmatprep.subr.bf16.mxu1 %v4125_v3  ;;  %v4135_v28 = vld [vmem:[#allocation39_spill] sm:$0xff]  ;;  %v4136_v3 = vld [vmem:[#allocation40_spill] sm:$0xff] }
 0x339   :  { %1366 = vmatpush1.bf16.msra.mxu0 %v4126_v39  ;;  %1407 = vmatpush1.bf16.msra.mxu1 %v4127_v6  ;;  %v4137_v39 = vld [vmem:[#allocation41_spill] sm:$0xff]  ;;  %v4138_v6 = vld [vmem:[#allocation42_spill] sm:$0xff] }
 0x33a   :  { %1367 = vmatprep.subr.bf16.mxu0 %v4128_v8  ;;  %1408 = vmatprep.subr.bf16.mxu1 %v4129_v13  ;;  %v4139_v8 = vld [vmem:[#allocation43_spill] sm:$0xff]  ;;  %v4140_v13 = vld [vmem:[#allocation44_spill] sm:$0xff] }
 0x33d   :  { %1368 = vmatpush1.bf16.msra.mxu0 %v4130_v56  ;;  %1409 = vmatpush1.bf16.msra.mxu1 %v4131_v40  ;;  %v4141_v56 = vld [vmem:[#allocation45_spill] sm:$0xff]  ;;  %v4142_v40 = vld [vmem:[#allocation46_spill] sm:$0xff] }
 0x33e   :  { %1369 = vmatprep.subr.bf16.mxu0 %v4132_v27  ;;  %1410 = vmatprep.subr.bf16.mxu1 %v4133_v44  ;;  %v4143_v27 = vld [vmem:[#allocation47_spill] sm:$0xff]  ;;  %v4144_v44 = vld [vmem:[#allocation48_spill] sm:$0xff] }
 0x341   :  { %1370 = vmatpush1.bf16.msra.mxu0 %v4134_v35  ;;  %1411 = vmatpush1.bf16.msra.mxu1 %v4135_v28  ;;  %v4145_v35 = vld [vmem:[#allocation49_spill] sm:$0xff]  ;;  %v261_v28 = vpop.permute.xlu1 %260 }
 0x342   :  { %1371 = vmatprep.subr.bf16.mxu0 %v4136_v3  ;;  %1412 = vmatprep.subr.bf16.mxu1 %v4137_v39  ;;  %v4146_v3 = vld [vmem:[#allocation52_spill] sm:$0xff] }
 0x343   :  { %v263_v4 = vmul.f32 %v261_v28, %v4146_v3 }
 0x345   :  { %1372 = vmatpush1.bf16.msra.mxu0 %v4138_v6  ;;  %1413 = vmatpush1.bf16.msra.mxu1 %v4139_v8  ;;  %v4147_v6 = vld [vmem:[#allocation53_spill] sm:$0xff] }
 0x346   :  { %1373 = vmatprep.subr.bf16.mxu0 %v4140_v13  ;;  %1414 = vmatprep.subr.bf16.mxu1 %v4141_v56  ;;  %v265_v1 = vmul.f32 %v261_v28, %v4147_v6  ;;  %v4148_v13 = vld [vmem:[#allocation9_spill] sm:$0xff] }
 0x347   :  { %v264_v32 = vmul.f32 %v261_v28, %v4148_v13 }
 0x349   :  { %1374 = vmatpush1.bf16.msra.mxu0 %v4142_v40  ;;  %1415 = vmatpush1.bf16.msra.mxu1 %v4143_v27  ;;  %v4149_v40 = vld [vmem:[#allocation11_spill] sm:$0xff]  ;;  %v272_v3 = vadd.f32 %v264_v32, %v4104_v38  ;;  %v267_v32 = vmul.f32 %v261_v28, %v4106_v47 }
 0x34a   :  { %1441 = vmatprep.subr.bf16.mxu0 %v4144_v44  ;;  %1482 = vmatprep.subr.bf16.mxu1 %v4145_v35  ;;  %v266_v55 = vmul.f32 %v261_v28, %v4149_v40  ;;  %v271_v44 = vadd.f32 %v263_v4, %v3058_v10  ;;  %v273_v35 = vadd.f32 %v265_v1, %v4103_v11 }
 0x34c   :  { %v274_v6 = vadd.f32 %v266_v55, %v4105_v36 }
 0x3df   :  { %v1179_v39 = vpop.f32.mrb[16].mxu0  ;;  %v1220_v20 = vpop.f32.mrb[16].mxu1 }
 0x3e0   :  { %v1181_v8 = vpop.f32.mrb[17].mxu0  ;;  %v1222_v62 = vpop.f32.mrb[17].mxu1  ;;  %v1180_v30 = vadd.f32 %v1179_v39, %v271_v44  ;;  %v1221_v31 = vadd.f32 %v1220_v20, %v273_v35  ;;  %v269_v20 = vmul.f32 %v261_v28, %v4107_v63 }
 0x3e1   :  { %v1183_v56 = vpop.f32.mrb[18].mxu0  ;;  %v1224_v60 = vpop.f32.mrb[18].mxu1  ;;  %v1182_v46 = vadd.f32 %v1181_v8, %v272_v3  ;;  %v1223_v22 = vadd.f32 %v1222_v62, %v274_v6  ;;  %v268_v62 = vmul.f32 %v261_v28, %v4108_v48 }
 0x3e2   :  { %v1184_v27 = vpop.f32.mrb[19].mxu0  ;;  %v1225_v19 = vpop.f32.mrb[19].mxu1  ;;  %v2499_v14 = vmul.f32 -1.442695, %v1180_v30  ;;  %v2501_v13 = vmul.f32 -1.442695, %v1221_v31  ;;  %v270_v31 = vmul.f32 %v261_v28, %v4065_v37 }
 0x3e3   :  { %v2500_v56 = vmul.f32 -1.442695, %v1182_v46  ;;  %v2502_v60 = vmul.f32 -1.442695, %v1223_v22  ;;  %v4150_v30 = vld [vmem:[#allocation58_spill] sm:$0xff]  ;;  %v276_v6 = vadd.f32 %v268_v62, %v4068_v42 }
 0x3e4   :  { %2619 = vpow2.f32 %v2499_v14  ;;  %v275_v14 = vadd.f32 %v267_v32, %v4066_v17  ;;  %v277_v35 = vadd.f32 %v269_v20, %v4150_v30  ;;  %v278_v8 = vadd.f32 %v270_v31, %v4069_v49 }
 0x3e5   :  { %2621 = vpow2.f32 %v2501_v13 }
 0x3e6   :  { %2623 = vpow2.f32 %v2500_v56 }
 0x3e7   :  { %2625 = vpow2.f32 %v2502_v60 }
 0x3ee   :  { %v2620_v19 = vpop.eup %2619 }
 0x3ef   :  { %v2622_v4 = vpop.eup %2621  ;;  %v1327_v44 = vadd.f32 1.0, %v2620_v19 }
 0x3f0   :  { %v2624_v27 = vpop.eup %2623  ;;  %v1329_v55 = vadd.f32 1.0, %v2622_v4 }
 0x3f1   :  { %v2626_v1 = vpop.eup %2625  ;;  %v1328_v46 = vadd.f32 1.0, %v2624_v27  ;;  %2627 = vrcp.f32 %v1327_v44 }
 0x3f2   :  { %v1330_v22 = vadd.f32 1.0, %v2626_v1  ;;  %2629 = vrcp.f32 %v1329_v55 }
 0x3f3   :  { %2631 = vrcp.f32 %v1328_v46 }
 0x3f4   :  { %2633 = vrcp.f32 %v1330_v22 }
 0x3fb   :  { %v2628_v62 = vpop.eup %2627 }
 0x3fc   :  { %v2630_v31 = vpop.eup %2629 }
 0x3fd   :  { %v2632_v46 = vpop.eup %2631  ;;  %v1352_v22 = vmul.f32 %v2630_v31, %v3338_v52  ;;  %v4152_v31 = vld [vmem:[#allocation78_spill] sm:$0xff] }
 0x3ff   :  { %v1261_v3 = vpop.f32.mrb[20].mxu0  ;;  %v1302_v39 = vpop.f32.mrb[20].mxu1 }
 0x400   :  { %v1262_v13 = vadd.f32 %v1261_v3, %v275_v14  ;;  %v1303_v56 = vadd.f32 %v1302_v39, %v277_v35  ;;  %v1263_v60 = vpop.f32.mrb[21].mxu0  ;;  %v1304_v19 = vpop.f32.mrb[21].mxu1 }
 0x401   :  { %v1264_v28 = vadd.f32 %v1263_v60, %v276_v6  ;;  %v1305_v4 = vadd.f32 %v1304_v19, %v278_v8  ;;  %v1265_v27 = vpop.f32.mrb[22].mxu0  ;;  %v1306_v1 = vpop.f32.mrb[22].mxu1 }
 0x402   :  { %v2503_v44 = vmul.f32 -1.442695, %v1262_v13  ;;  %2635 = vtanh.f32 %v1303_v56  ;;  %v1266_v32 = vpop.f32.mrb[23].mxu0  ;;  %v1307_v20 = vpop.f32.mrb[23].mxu1 }
 0x403   :  { %v2504_v55 = vmul.f32 -1.442695, %v1264_v28  ;;  %2637 = vtanh.f32 %v1305_v4  ;;  %v2634_v14 = vpop.eup %2633 }
 0x404   :  { %2639 = vpow2.f32 %v2503_v44  ;;  %v1347_v8 = vmul.f32 %v2634_v14, %v3340_v54  ;;  %v4154_v14 = vld [vmem:[#allocation80_spill] sm:$0xff] }
 0x405   :  { %2641 = vpow2.f32 %v2504_v55 }
 0x40c   :  { %v2636_v35 = vpop.eup %2635 }
 0x40d   :  { %v2638_v3 = vpop.eup %2637  ;;  %v1353_v39 = vmul.f32 %v2636_v35, %v2628_v62  ;;  %v4151_v62 = vld [vmem:[#allocation77_spill] sm:$0xff]  ;;  %v4155_v35 = vld [vmem:[#allocation16_spill] sm:$0xff] }
 0x40e   :  { %v2640_v6 = vpop.eup %2639  ;;  %v1348_v13 = vmul.f32 %v2638_v3, %v2632_v46  ;;  %v4153_v46 = vld [vmem:[#allocation79_spill] sm:$0xff]  ;;  %v4156_v3 = vld [vmem:[#allocation17_spill] sm:$0xff] }
 0x40f   :  { %v2642_v56 = vpop.eup %2641  ;;  %v1331_v60 = vadd.f32 1.0, %v2640_v6  ;;  %v3430_v19 = vadd.f32 %v1353_v39, %v1352_v22  ;;  %v4157_v22 = vld [vmem:[#allocation18_spill] sm:$0xff]  ;;  %v4158_v39 = vld [vmem:[#allocation19_spill] sm:$0xff]  ;;  %v4159_v6 = vld [vmem:[#allocation20_spill] sm:$0xff] }
 0x410   :  { %v1332_v28 = vadd.f32 1.0, %v2642_v56  ;;  %v3432_v4 = vadd.f32 %v1348_v13, %v1347_v8  ;;  %v4160_v8 = vld [vmem:[#allocation21_spill] sm:$0xff]  ;;  %v4161_v13 = vld [vmem:[#allocation22_spill] sm:$0xff]  ;;  %v4162_v56 = vld [vmem:[#allocation23_spill] sm:$0xff] }
 0x411   :  { %2643 = vrcp.f32 %v1331_v60  ;;  %v4163_v60 = vld [vmem:[#allocation24_spill] sm:$0xff] }
 0x412   :  { %2645 = vtanh.f32 %v3430_v19 }
 0x413   :  { %2647 = vrcp.f32 %v1332_v28  ;;  %v4164_v28 = vld [vmem:[#allocation25_spill] sm:$0xff] }
 0x414   :  { %2649 = vtanh.f32 %v3432_v4 }
 0x41b   :  { %v2644_v27 = vpop.eup %2643 }
 0x41c   :  { %v2646_v52 = vpop.eup %2645 }
 0x41d   :  { %v2648_v1 = vpop.eup %2647  ;;  %v1356_v44 = vmul.f32 %v2646_v52, %v2644_v27  ;;  %v4165_v27 = vld [vmem:[#allocation26_spill] sm:$0xff]  ;;  %v4166_v52 = vld [vmem:[#allocation27_spill] sm:$0xff] }
 0x41e   :  { %v2650_v32 = vpop.eup %2649 }
 0x41f   :  { %v1351_v54 = vmul.f32 %v2650_v32, %v2648_v1  ;;  %v4167_v1 = vld [vmem:[#allocation28_spill] sm:$0xff]  ;;  %v4169_v32 = vld [vmem:[#allocation30_spill] sm:$0xff] }
 0x421   :  { %v1357_v20 = vadd.f32 %v1356_v44, %v1351_v54  ;;  %v4168_v44 = vld [vmem:[#allocation29_spill] sm:$0xff]  ;;  %v4170_v54 = vld [vmem:[#allocation31_spill] sm:$0xff] }
 0x423   :  { %v1358_v55 = vpack.c.bf16 %v1357_v20, %v1357_v20  ;;  %v4171_v20 = vld [vmem:[#allocation32_spill] sm:$0xff] }
 0x425   :  { %1392 = vmatmul.mubr.bf16.vlgmr.msra.gmra.mrb[24].mxu0 %v1358_v55  ;;  %1433 = vmatmul.mubr.bf16.vlgmr.msra.gmra.mrb[24].mxu1 %v1358_v55 }
 0x426   :  { %1442 = vmatpush1.bf16.msra.mxu0 %v4071_v12  ;;  %1483 = vmatpush1.bf16.msra.mxu1 %v4072_v23 }
 0x427   :  { %1443 = vmatprep.subr.bf16.mxu0 %v4073_v57  ;;  %1484 = vmatprep.subr.bf16.mxu1 %v4074_v53 }
 0x428   :  { %1473 = vmatprep.mubr.bf16.mxu0 %v4046_v33  ;;  %1514 = vmatprep.mubr.bf16.mxu1 %v4046_v33 }
 0x42a   :  { %1444 = vmatpush1.bf16.msra.mxu0 %v4075_v15  ;;  %1485 = vmatpush1.bf16.msra.mxu1 %v4076_v18 }
 0x42b   :  { %1445 = vmatprep.subr.bf16.mxu0 %v4077_v16  ;;  %1486 = vmatprep.subr.bf16.mxu1 %v4078_v24 }
 0x42e   :  { %1446 = vmatpush1.bf16.msra.mxu0 %v4079_v5  ;;  %1487 = vmatpush1.bf16.msra.mxu1 %v4080_v51 }
 0x42f   :  { %1447 = vmatprep.subr.bf16.mxu0 %v4081_v50  ;;  %1488 = vmatprep.subr.bf16.mxu1 %v4082_v43 }
 0x432   :  { %1448 = vmatpush1.bf16.msra.mxu0 %v4083_v7  ;;  %1489 = vmatpush1.bf16.msra.mxu1 %v4084_v41 }
 0x433   :  { %1449 = vmatprep.subr.bf16.mxu0 %v4085_v25  ;;  %1490 = vmatprep.subr.bf16.mxu1 %v4086_v45 }
 0x436   :  { %1450 = vmatpush1.bf16.msra.mxu0 %v3135_v26  ;;  %1491 = vmatpush1.bf16.msra.mxu1 %v3137_v0 }
 0x437   :  { %1451 = vmatprep.subr.bf16.mxu0 %v3141_v21  ;;  %1492 = vmatprep.subr.bf16.mxu1 %v4087_v29 }
 0x43a   :  { %1452 = vmatpush1.bf16.msra.mxu0 %v4088_v58  ;;  %1493 = vmatpush1.bf16.msra.mxu1 %v3149_v59 }
 0x43b   :  { %1453 = vmatprep.subr.bf16.mxu0 %v3153_v61  ;;  %1494 = vmatprep.subr.bf16.mxu1 %v3155_v9 }
 0x43e   :  { %1454 = vmatpush1.bf16.msra.mxu0 %v3159_v34  ;;  %1495 = vmatpush1.bf16.msra.mxu1 %v3161_v2 }
 0x43f   :  { %1455 = vmatprep.subr.bf16.mxu0 %v4151_v62  ;;  %1496 = vmatprep.subr.bf16.mxu1 %v4152_v31 }
 0x442   :  { %1456 = vmatpush1.bf16.msra.mxu0 %v4153_v46  ;;  %1497 = vmatpush1.bf16.msra.mxu1 %v4154_v14 }
 0x443   :  { %1573 = vmatprep.subr.bf16.mxu0 %v4155_v35  ;;  %1614 = vmatprep.subr.bf16.mxu1 %v4156_v3 }
 0x445   :  { %1474 = vmatmul.mubr.bf16.vlgmr.msra.gmra.mrb[28].mxu0 %v1358_v55  ;;  %1515 = vmatmul.mubr.bf16.vlgmr.msra.gmra.mrb[28].mxu1 %v1358_v55  ;;  %v4172_v55 = vld [vmem:[#allocation33_spill] sm:$0xff] }
 0x446   :  { %1574 = vmatpush1.bf16.msra.mxu0 %v4157_v22  ;;  %1615 = vmatpush1.bf16.msra.mxu1 %v4158_v39 }
 0x447   :  { %1575 = vmatprep.subr.bf16.mxu0 %v4159_v6  ;;  %1616 = vmatprep.subr.bf16.mxu1 %v4160_v8 }
 0x448   :  { %1605 = vmatprep.mubr.bf16.mxu0 %v4046_v33  ;;  %1646 = vmatprep.mubr.bf16.mxu1 %v4046_v33 }
 0x44a   :  { %1576 = vmatpush1.bf16.msra.mxu0 %v4161_v13  ;;  %1617 = vmatpush1.bf16.msra.mxu1 %v4162_v56  ;;  %v4173_v56 = vld [vmem:[#allocation34_spill] sm:$0xff] }
 0x44b   :  { %1577 = vmatprep.subr.bf16.mxu0 %v4163_v60  ;;  %1618 = vmatprep.subr.bf16.mxu1 %v4164_v28  ;;  %v4174_v60 = vld [vmem:[#allocation35_spill] sm:$0xff]  ;;  %v4175_v28 = vld [vmem:[#allocation36_spill] sm:$0xff] }
 0x44e   :  { %1578 = vmatpush1.bf16.msra.mxu0 %v4165_v27  ;;  %1619 = vmatpush1.bf16.msra.mxu1 %v4166_v52  ;;  %v4176_v27 = vld [vmem:[#allocation38_spill] sm:$0xff]  ;;  %v4177_v52 = vld [vmem:[#allocation37_spill] sm:$0xff] }
 0x44f   :  { %1579 = vmatprep.subr.bf16.mxu0 %v4167_v1  ;;  %1620 = vmatprep.subr.bf16.mxu1 %v4168_v44  ;;  %v4178_v1 = vld [vmem:[#allocation39_spill] sm:$0xff]  ;;  %v4179_v44 = vld [vmem:[#allocation40_spill] sm:$0xff] }
 0x452   :  { %1580 = vmatpush1.bf16.msra.mxu0 %v4169_v32  ;;  %1621 = vmatpush1.bf16.msra.mxu1 %v4170_v54  ;;  %v4180_v32 = vld [vmem:[#allocation41_spill] sm:$0xff]  ;;  %v4181_v54 = vld [vmem:[#allocation42_spill] sm:$0xff] }
 0x453   :  { %1581 = vmatprep.subr.bf16.mxu0 %v4171_v20  ;;  %1622 = vmatprep.subr.bf16.mxu1 %v4172_v55  ;;  %v4182_v20 = vld [vmem:[#allocation43_spill] sm:$0xff]  ;;  %v4183_v55 = vld [vmem:[#allocation44_spill] sm:$0xff] }
 0x456   :  { %1582 = vmatpush1.bf16.msra.mxu0 %v4173_v56  ;;  %1623 = vmatpush1.bf16.msra.mxu1 %v4174_v60  ;;  %v4184_v56 = vld [vmem:[#allocation45_spill] sm:$0xff]  ;;  %v4185_v60 = vld [vmem:[#allocation46_spill] sm:$0xff] }
 0x457   :  { %1583 = vmatprep.subr.bf16.mxu0 %v4175_v28  ;;  %1624 = vmatprep.subr.bf16.mxu1 %v4176_v27  ;;  %v4186_v28 = vld [vmem:[#allocation47_spill] sm:$0xff]  ;;  %v4187_v27 = vld [vmem:[#allocation48_spill] sm:$0xff] }
 0x45a   :  { %1584 = vmatpush1.bf16.msra.mxu0 %v4177_v52  ;;  %1625 = vmatpush1.bf16.msra.mxu1 %v4178_v1  ;;  %v4188_v52 = vld [vmem:[#allocation49_spill] sm:$0xff]  ;;  %v284_v1 = vpop.permute.xlu0 %283 }
 0x45b   :  { %1585 = vmatprep.subr.bf16.mxu0 %v4179_v44  ;;  %1626 = vmatprep.subr.bf16.mxu1 %v4180_v32  ;;  %v4189_v44 = vld [vmem:[#allocation52_spill] sm:$0xff] }
 0x45c   :  { %v286_v13 = vmul.f32 %v284_v1, %v4189_v44 }
 0x45e   :  { %1586 = vmatpush1.bf16.msra.mxu0 %v4181_v54  ;;  %1627 = vmatpush1.bf16.msra.mxu1 %v4182_v20  ;;  %v4190_v54 = vld [vmem:[#allocation53_spill] sm:$0xff] }
 0x45f   :  { %1587 = vmatprep.subr.bf16.mxu0 %v4183_v55  ;;  %1628 = vmatprep.subr.bf16.mxu1 %v4184_v56  ;;  %v288_v6 = vmul.f32 %v284_v1, %v4190_v54  ;;  %v4191_v55 = vld [vmem:[#allocation9_spill] sm:$0xff] }
 0x460   :  { %v287_v22 = vmul.f32 %v284_v1, %v4191_v55 }
 0x462   :  { %1588 = vmatpush1.bf16.msra.mxu0 %v4185_v60  ;;  %1629 = vmatpush1.bf16.msra.mxu1 %v4186_v28  ;;  %v289_v60 = vmul.f32 %v284_v1, %v4149_v40  ;;  %v295_v44 = vadd.f32 %v287_v22, %v4104_v38  ;;  %v290_v22 = vmul.f32 %v284_v1, %v4106_v47 }
 0x463   :  { %1655 = vmatprep.subr.bf16.mxu0 %v4187_v27  ;;  %1696 = vmatprep.subr.bf16.mxu1 %v4188_v52  ;;  %v294_v27 = vadd.f32 %v286_v13, %v3058_v10  ;;  %v296_v52 = vadd.f32 %v288_v6, %v4103_v11 }
 0x464   :  { %v297_v54 = vadd.f32 %v289_v60, %v4105_v36 }
 0x4f8   :  { %v1393_v32 = vpop.f32.mrb[24].mxu0  ;;  %v1434_v8 = vpop.f32.mrb[24].mxu1 }
 0x4f9   :  { %v1395_v20 = vpop.f32.mrb[25].mxu0  ;;  %v1436_v39 = vpop.f32.mrb[25].mxu1  ;;  %v1394_v14 = vadd.f32 %v1393_v32, %v294_v27  ;;  %v1435_v46 = vadd.f32 %v1434_v8, %v296_v52  ;;  %v292_v8 = vmul.f32 %v284_v1, %v4107_v63 }
 0x4fa   :  { %v1397_v56 = vpop.f32.mrb[26].mxu0  ;;  %v1438_v3 = vpop.f32.mrb[26].mxu1  ;;  %v1396_v31 = vadd.f32 %v1395_v20, %v295_v44  ;;  %v1437_v62 = vadd.f32 %v1436_v39, %v297_v54  ;;  %v291_v39 = vmul.f32 %v284_v1, %v4108_v48 }
 0x4fb   :  { %v1398_v28 = vpop.f32.mrb[27].mxu0  ;;  %v1439_v35 = vpop.f32.mrb[27].mxu1  ;;  %v2505_v2 = vmul.f32 -1.442695, %v1394_v14  ;;  %v2507_v55 = vmul.f32 -1.442695, %v1435_v46  ;;  %v293_v46 = vmul.f32 %v284_v1, %v4065_v37  ;;  %v300_v14 = vadd.f32 %v292_v8, %v4150_v30 }
 0x4fc   :  { %v2506_v56 = vmul.f32 -1.442695, %v1396_v31  ;;  %v2508_v3 = vmul.f32 -1.442695, %v1437_v62  ;;  %v299_v32 = vadd.f32 %v291_v39, %v4068_v42 }
 0x4fd   :  { %2651 = vpow2.f32 %v2505_v2  ;;  %v298_v2 = vadd.f32 %v290_v22, %v4066_v17  ;;  %v301_v54 = vadd.f32 %v293_v46, %v4069_v49 }
 0x4fe   :  { %2653 = vpow2.f32 %v2507_v55 }
 0x4ff   :  { %2655 = vpow2.f32 %v2506_v56 }
 0x500   :  { %2657 = vpow2.f32 %v2508_v3 }
 0x507   :  { %v2652_v35 = vpop.eup %2651 }
 0x508   :  { %v2654_v13 = vpop.eup %2653  ;;  %v1541_v27 = vadd.f32 1.0, %v2652_v35 }
 0x509   :  { %v2656_v28 = vpop.eup %2655  ;;  %v1543_v60 = vadd.f32 1.0, %v2654_v13 }
 0x50a   :  { %v2658_v6 = vpop.eup %2657  ;;  %v1542_v31 = vadd.f32 1.0, %v2656_v28  ;;  %2659 = vrcp.f32 %v1541_v27 }
 0x50b   :  { %v1544_v62 = vadd.f32 1.0, %v2658_v6  ;;  %2661 = vrcp.f32 %v1543_v60 }
 0x50c   :  { %2663 = vrcp.f32 %v1542_v31 }
 0x50d   :  { %2665 = vrcp.f32 %v1544_v62 }
 0x514   :  { %v2660_v60 = vpop.eup %2659 }
 0x515   :  { %v2662_v39 = vpop.eup %2661 }
 0x516   :  { %v2664_v46 = vpop.eup %2663  ;;  %v1566_v62 = vmul.f32 %v2662_v39, %v3430_v19  ;;  %v4194_v39 = vld [vmem:[#allocation78_spill] sm:$0xff] }
 0x517   :  { %v2666_v31 = vpop.eup %2665 }
 0x518   :  { %v1475_v52 = vpop.f32.mrb[28].mxu0  ;;  %v1516_v44 = vpop.f32.mrb[28].mxu1 }
 0x519   :  { %v1476_v20 = vadd.f32 %v1475_v52, %v298_v2  ;;  %v1517_v55 = vadd.f32 %v1516_v44, %v300_v14  ;;  %v1477_v56 = vpop.f32.mrb[29].mxu0  ;;  %v1518_v3 = vpop.f32.mrb[29].mxu1 }
 0x51a   :  { %v1478_v1 = vadd.f32 %v1477_v56, %v299_v32  ;;  %v1519_v35 = vadd.f32 %v1518_v3, %v301_v54  ;;  %v1479_v13 = vpop.f32.mrb[30].mxu0  ;;  %v1520_v28 = vpop.f32.mrb[30].mxu1  ;;  %v1561_v32 = vmul.f32 %v2666_v31, %v3432_v4  ;;  %v4196_v31 = vld [vmem:[#allocation80_spill] sm:$0xff] }
 0x51b   :  { %v2509_v6 = vmul.f32 -1.442695, %v1476_v20  ;;  %2667 = vtanh.f32 %v1517_v55  ;;  %v1480_v27 = vpop.f32.mrb[31].mxu0  ;;  %v1521_v22 = vpop.f32.mrb[31].mxu1 }
 0x51c   :  { %v2510_v8 = vmul.f32 -1.442695, %v1478_v1  ;;  %2669 = vtanh.f32 %v1519_v35 }
 0x51d   :  { %2671 = vpow2.f32 %v2509_v6 }
 0x51e   :  { %2673 = vpow2.f32 %v2510_v8  ;;  %v4192_v8 = vld [vmem:[#allocation76_spill] sm:$0xff] }
 0x525   :  { %v2668_v2 = vpop.eup %2667 }
 0x526   :  { %v2670_v14 = vpop.eup %2669  ;;  %v1567_v52 = vmul.f32 %v2668_v2, %v2660_v60  ;;  %v4193_v60 = vld [vmem:[#allocation77_spill] sm:$0xff]  ;;  %v4197_v2 = vld [vmem:[#allocation16_spill] sm:$0xff] }
 0x527   :  { %v2672_v44 = vpop.eup %2671  ;;  %v1562_v54 = vmul.f32 %v2670_v14, %v2664_v46  ;;  %v4195_v46 = vld [vmem:[#allocation79_spill] sm:$0xff]  ;;  %v4198_v14 = vld [vmem:[#allocation17_spill] sm:$0xff] }
 0x528   :  { %v2674_v20 = vpop.eup %2673  ;;  %v1545_v55 = vadd.f32 1.0, %v2672_v44  ;;  %v3522_v56 = vadd.f32 %v1567_v52, %v1566_v62  ;;  %v4199_v62 = vld [vmem:[#allocation18_spill] sm:$0xff]  ;;  %v4200_v52 = vld [vmem:[#allocation19_spill] sm:$0xff]  ;;  %v4201_v44 = vld [vmem:[#allocation20_spill] sm:$0xff] }
 0x529   :  { %v1546_v3 = vadd.f32 1.0, %v2674_v20  ;;  %v3524_v1 = vadd.f32 %v1562_v54, %v1561_v32  ;;  %v4202_v32 = vld [vmem:[#allocation21_spill] sm:$0xff]  ;;  %v4203_v54 = vld [vmem:[#allocation22_spill] sm:$0xff]  ;;  %v4204_v20 = vld [vmem:[#allocation23_spill] sm:$0xff] }
 0x52a   :  { %2675 = vrcp.f32 %v1545_v55  ;;  %v4205_v55 = vld [vmem:[#allocation24_spill] sm:$0xff] }
 0x52b   :  { %2677 = vtanh.f32 %v3522_v56 }
 0x52c   :  { %2679 = vrcp.f32 %v1546_v3  ;;  %v4206_v3 = vld [vmem:[#allocation25_spill] sm:$0xff] }
 0x52d   :  { %2681 = vtanh.f32 %v3524_v1 }
 0x534   :  { %v2676_v35 = vpop.eup %2675 }
 0x535   :  { %v2678_v19 = vpop.eup %2677 }
 0x536   :  { %v2680_v13 = vpop.eup %2679  ;;  %v1570_v28 = vmul.f32 %v2678_v19, %v2676_v35  ;;  %v4207_v35 = vld [vmem:[#allocation26_spill] sm:$0xff]  ;;  %v4208_v19 = vld [vmem:[#allocation27_spill] sm:$0xff] }
 0x537   :  { %v2682_v6 = vpop.eup %2681 }
 0x538   :  { %v1565_v4 = vmul.f32 %v2682_v6, %v2680_v13  ;;  %v4209_v13 = vld [vmem:[#allocation28_spill] sm:$0xff]  ;;  %v4211_v6 = vld [vmem:[#allocation30_spill] sm:$0xff] }
 0x53a   :  { %v1571_v27 = vadd.f32 %v1570_v28, %v1565_v4  ;;  %v4210_v28 = vld [vmem:[#allocation29_spill] sm:$0xff]  ;;  %v4212_v4 = vld [vmem:[#allocation31_spill] sm:$0xff] }
 0x53c   :  { %v1572_v22 = vpack.c.bf16 %v1571_v27, %v1571_v27  ;;  %v4213_v27 = vld [vmem:[#allocation32_spill] sm:$0xff] }
 0x53e   :  { %1606 = vmatmul.mubr.bf16.vlgmr.msra.gmra.mrb[32].mxu0 %v1572_v22  ;;  %1647 = vmatmul.mubr.bf16.vlgmr.msra.gmra.mrb[32].mxu1 %v1572_v22 }
 0x53f   :  { %1656 = vmatpush1.bf16.msra.mxu0 %v4071_v12  ;;  %1697 = vmatpush1.bf16.msra.mxu1 %v4072_v23 }
 0x540   :  { %1657 = vmatprep.subr.bf16.mxu0 %v4073_v57  ;;  %1698 = vmatprep.subr.bf16.mxu1 %v4074_v53 }
 0x541   :  { %1687 = vmatprep.mubr.bf16.mxu0 %v4046_v33  ;;  %1728 = vmatprep.mubr.bf16.mxu1 %v4046_v33 }
 0x543   :  { %1658 = vmatpush1.bf16.msra.mxu0 %v4075_v15  ;;  %1699 = vmatpush1.bf16.msra.mxu1 %v4076_v18 }
 0x544   :  { %1659 = vmatprep.subr.bf16.mxu0 %v4077_v16  ;;  %1700 = vmatprep.subr.bf16.mxu1 %v4078_v24 }
 0x547   :  { %1660 = vmatpush1.bf16.msra.mxu0 %v4079_v5  ;;  %1701 = vmatpush1.bf16.msra.mxu1 %v4080_v51 }
 0x548   :  { %1661 = vmatprep.subr.bf16.mxu0 %v4081_v50  ;;  %1702 = vmatprep.subr.bf16.mxu1 %v4082_v43 }
 0x54b   :  { %1662 = vmatpush1.bf16.msra.mxu0 %v4083_v7  ;;  %1703 = vmatpush1.bf16.msra.mxu1 %v4084_v41 }
 0x54c   :  { %1663 = vmatprep.subr.bf16.mxu0 %v4085_v25  ;;  %1704 = vmatprep.subr.bf16.mxu1 %v4086_v45 }
 0x54f   :  { %1664 = vmatpush1.bf16.msra.mxu0 %v3135_v26  ;;  %1705 = vmatpush1.bf16.msra.mxu1 %v3137_v0 }
 0x550   :  { %1665 = vmatprep.subr.bf16.mxu0 %v3141_v21  ;;  %1706 = vmatprep.subr.bf16.mxu1 %v4087_v29 }
 0x553   :  { %1666 = vmatpush1.bf16.msra.mxu0 %v4088_v58  ;;  %1707 = vmatpush1.bf16.msra.mxu1 %v3149_v59 }
 0x554   :  { %1667 = vmatprep.subr.bf16.mxu0 %v3153_v61  ;;  %1708 = vmatprep.subr.bf16.mxu1 %v3155_v9 }
 0x557   :  { %1668 = vmatpush1.bf16.msra.mxu0 %v3159_v34  ;;  %1709 = vmatpush1.bf16.msra.mxu1 %v4192_v8 }
 0x558   :  { %1669 = vmatprep.subr.bf16.mxu0 %v4193_v60  ;;  %1710 = vmatprep.subr.bf16.mxu1 %v4194_v39 }
 0x55b   :  { %1670 = vmatpush1.bf16.msra.mxu0 %v4195_v46  ;;  %1711 = vmatpush1.bf16.msra.mxu1 %v4196_v31 }
 0x55c   :  { %1787 = vmatprep.subr.bf16.mxu0 %v4197_v2  ;;  %1828 = vmatprep.subr.bf16.mxu1 %v4198_v14 }
 0x55e   :  { %1688 = vmatmul.mubr.bf16.vlgmr.msra.gmra.mrb[36].mxu0 %v1572_v22  ;;  %1729 = vmatmul.mubr.bf16.vlgmr.msra.gmra.mrb[36].mxu1 %v1572_v22  ;;  %v4214_v22 = vld [vmem:[#allocation33_spill] sm:$0xff] }
 0x55f   :  { %1788 = vmatpush1.bf16.msra.mxu0 %v4199_v62  ;;  %1829 = vmatpush1.bf16.msra.mxu1 %v4200_v52 }
 0x560   :  { %1789 = vmatprep.subr.bf16.mxu0 %v4201_v44  ;;  %1830 = vmatprep.subr.bf16.mxu1 %v4202_v32 }
 0x561   :  { %1819 = vmatprep.mubr.bf16.mxu0 %v4046_v33  ;;  %1860 = vmatprep.mubr.bf16.mxu1 %v4046_v33 }
 0x563   :  { %1790 = vmatpush1.bf16.msra.mxu0 %v4203_v54  ;;  %1831 = vmatpush1.bf16.msra.mxu1 %v4204_v20  ;;  %v4215_v20 = vld [vmem:[#allocation34_spill] sm:$0xff] }
 0x564   :  { %1791 = vmatprep.subr.bf16.mxu0 %v4205_v55  ;;  %1832 = vmatprep.subr.bf16.mxu1 %v4206_v3  ;;  %v4216_v55 = vld [vmem:[#allocation35_spill] sm:$0xff]  ;;  %v4217_v3 = vld [vmem:[#allocation36_spill] sm:$0xff] }
 0x567   :  { %1792 = vmatpush1.bf16.msra.mxu0 %v4207_v35  ;;  %1833 = vmatpush1.bf16.msra.mxu1 %v4208_v19  ;;  %v4218_v35 = vld [vmem:[#allocation38_spill] sm:$0xff]  ;;  %v4219_v19 = vld [vmem:[#allocation37_spill] sm:$0xff] }
 0x568   :  { %1793 = vmatprep.subr.bf16.mxu0 %v4209_v13  ;;  %1834 = vmatprep.subr.bf16.mxu1 %v4210_v28  ;;  %v4220_v13 = vld [vmem:[#allocation39_spill] sm:$0xff]  ;;  %v4221_v28 = vld [vmem:[#allocation40_spill] sm:$0xff] }
 0x56b   :  { %1794 = vmatpush1.bf16.msra.mxu0 %v4211_v6  ;;  %1835 = vmatpush1.bf16.msra.mxu1 %v4212_v4  ;;  %v4222_v6 = vld [vmem:[#allocation41_spill] sm:$0xff]  ;;  %v4223_v4 = vld [vmem:[#allocation42_spill] sm:$0xff] }
 0x56c   :  { %1795 = vmatprep.subr.bf16.mxu0 %v4213_v27  ;;  %1836 = vmatprep.subr.bf16.mxu1 %v4214_v22  ;;  %v4224_v27 = vld [vmem:[#allocation43_spill] sm:$0xff]  ;;  %v4225_v22 = vld [vmem:[#allocation44_spill] sm:$0xff] }
 0x56f   :  { %1796 = vmatpush1.bf16.msra.mxu0 %v4215_v20  ;;  %1837 = vmatpush1.bf16.msra.mxu1 %v4216_v55  ;;  %v4226_v20 = vld [vmem:[#allocation45_spill] sm:$0xff]  ;;  %v4227_v55 = vld [vmem:[#allocation46_spill] sm:$0xff] }
 0x570   :  { %1797 = vmatprep.subr.bf16.mxu0 %v4217_v3  ;;  %1838 = vmatprep.subr.bf16.mxu1 %v4218_v35  ;;  %v4228_v3 = vld [vmem:[#allocation47_spill] sm:$0xff]  ;;  %v4229_v35 = vld [vmem:[#allocation48_spill] sm:$0xff] }
 0x573   :  { %1798 = vmatpush1.bf16.msra.mxu0 %v4219_v19  ;;  %1839 = vmatpush1.bf16.msra.mxu1 %v4220_v13  ;;  %v4230_v19 = vld [vmem:[#allocation49_spill] sm:$0xff]  ;;  %v307_v13 = vpop.permute.xlu1 %306 }
 0x574   :  { %1799 = vmatprep.subr.bf16.mxu0 %v4221_v28  ;;  %1840 = vmatprep.subr.bf16.mxu1 %v4222_v6  ;;  %v4231_v28 = vld [vmem:[#allocation52_spill] sm:$0xff] }
 0x575   :  { %v309_v54 = vmul.f32 %v307_v13, %v4231_v28 }
 0x577   :  { %1800 = vmatpush1.bf16.msra.mxu0 %v4223_v4  ;;  %1841 = vmatpush1.bf16.msra.mxu1 %v4224_v27  ;;  %v4232_v4 = vld [vmem:[#allocation53_spill] sm:$0xff] }
 0x578   :  { %1801 = vmatprep.subr.bf16.mxu0 %v4225_v22  ;;  %1842 = vmatprep.subr.bf16.mxu1 %v4226_v20  ;;  %v311_v44 = vmul.f32 %v307_v13, %v4232_v4  ;;  %v4233_v22 = vld [vmem:[#allocation9_spill] sm:$0xff] }
 0x579   :  { %v310_v62 = vmul.f32 %v307_v13, %v4233_v22 }
 0x57b   :  { %1802 = vmatpush1.bf16.msra.mxu0 %v4227_v55  ;;  %1843 = vmatpush1.bf16.msra.mxu1 %v4228_v3  ;;  %v312_v55 = vmul.f32 %v307_v13, %v4149_v40  ;;  %v318_v28 = vadd.f32 %v310_v62, %v4104_v38  ;;  %v313_v62 = vmul.f32 %v307_v13, %v4106_v47 }
 0x57c   :  { %1869 = vmatprep.subr.bf16.mxu0 %v4229_v35  ;;  %1910 = vmatprep.subr.bf16.mxu1 %v4230_v19  ;;  %v317_v35 = vadd.f32 %v309_v54, %v3058_v10  ;;  %v319_v19 = vadd.f32 %v311_v44, %v4103_v11 }
 0x57d   :  { %v320_v4 = vadd.f32 %v312_v55, %v4105_v36 }
 0x611   :  { %v1607_v6 = vpop.f32.mrb[32].mxu0  ;;  %v1648_v32 = vpop.f32.mrb[32].mxu1 }
 0x612   :  { %v1609_v27 = vpop.f32.mrb[33].mxu0  ;;  %v1650_v52 = vpop.f32.mrb[33].mxu1  ;;  %v1608_v31 = vadd.f32 %v1607_v6, %v317_v35  ;;  %v1649_v46 = vadd.f32 %v1648_v32, %v319_v19  ;;  %v315_v32 = vmul.f32 %v307_v13, %v4107_v63 }
 0x613   :  { %v1611_v20 = vpop.f32.mrb[34].mxu0  ;;  %v1652_v14 = vpop.f32.mrb[34].mxu1  ;;  %v1610_v39 = vadd.f32 %v1609_v27, %v318_v28  ;;  %v1651_v60 = vadd.f32 %v1650_v52, %v320_v4  ;;  %v314_v52 = vmul.f32 %v307_v13, %v4108_v48 }
 0x614   :  { %v1612_v3 = vpop.f32.mrb[35].mxu0  ;;  %v1653_v2 = vpop.f32.mrb[35].mxu1  ;;  %v2511_v8 = vmul.f32 -1.442695, %v1608_v31  ;;  %v2513_v22 = vmul.f32 -1.442695, %v1649_v46  ;;  %v316_v46 = vmul.f32 %v307_v13, %v4065_v37  ;;  %v323_v31 = vadd.f32 %v315_v32, %v4150_v30 }
 0x615   :  { %v2512_v20 = vmul.f32 -1.442695, %v1610_v39  ;;  %v2514_v14 = vmul.f32 -1.442695, %v1651_v60  ;;  %v322_v6 = vadd.f32 %v314_v52, %v4068_v42 }
 0x616   :  { %2683 = vpow2.f32 %v2511_v8  ;;  %v321_v8 = vadd.f32 %v313_v62, %v4066_v17  ;;  %v324_v4 = vadd.f32 %v316_v46, %v4069_v49 }
 0x617   :  { %2685 = vpow2.f32 %v2513_v22 }
 0x618   :  { %2687 = vpow2.f32 %v2512_v20 }
 0x619   :  { %2689 = vpow2.f32 %v2514_v14 }
 0x620   :  { %v2684_v2 = vpop.eup %2683 }
 0x621   :  { %v2686_v54 = vpop.eup %2685  ;;  %v1755_v35 = vadd.f32 1.0, %v2684_v2 }
 0x622   :  { %v2688_v3 = vpop.eup %2687  ;;  %v1757_v55 = vadd.f32 1.0, %v2686_v54 }
 0x623   :  { %v2690_v44 = vpop.eup %2689  ;;  %v1756_v39 = vadd.f32 1.0, %v2688_v3  ;;  %2691 = vrcp.f32 %v1755_v35 }
 0x624   :  { %v1758_v60 = vadd.f32 1.0, %v2690_v44  ;;  %2693 = vrcp.f32 %v1757_v55 }
 0x625   :  { %2695 = vrcp.f32 %v1756_v39 }
 0x626   :  { %2697 = vrcp.f32 %v1758_v60 }
 0x62d   :  { %v2692_v55 = vpop.eup %2691 }
 0x62e   :  { %v2694_v52 = vpop.eup %2693 }
 0x62f   :  { %v2696_v46 = vpop.eup %2695  ;;  %v1780_v60 = vmul.f32 %v2694_v52, %v3522_v56  ;;  %v4236_v52 = vld [vmem:[#allocation78_spill] sm:$0xff] }
 0x630   :  { %v2698_v39 = vpop.eup %2697 }
 0x631   :  { %v1689_v19 = vpop.f32.mrb[36].mxu0  ;;  %v1730_v28 = vpop.f32.mrb[36].mxu1 }
 0x632   :  { %v1690_v27 = vadd.f32 %v1689_v19, %v321_v8  ;;  %v1731_v22 = vadd.f32 %v1730_v28, %v323_v31  ;;  %v1691_v20 = vpop.f32.mrb[37].mxu0  ;;  %v1732_v14 = vpop.f32.mrb[37].mxu1 }
 0x633   :  { %v1692_v13 = vadd.f32 %v1691_v20, %v322_v6  ;;  %v1733_v2 = vadd.f32 %v1732_v14, %v324_v4  ;;  %v1693_v54 = vpop.f32.mrb[38].mxu0  ;;  %v1734_v3 = vpop.f32.mrb[38].mxu1  ;;  %v1775_v6 = vmul.f32 %v2698_v39, %v3524_v1  ;;  %v4238_v39 = vld [vmem:[#allocation80_spill] sm:$0xff] }
 0x634   :  { %v2515_v44 = vmul.f32 -1.442695, %v1690_v27  ;;  %2699 = vtanh.f32 %v1731_v22  ;;  %v1694_v35 = vpop.f32.mrb[39].mxu0  ;;  %v1735_v62 = vpop.f32.mrb[39].mxu1 }
 0x635   :  { %v2516_v32 = vmul.f32 -1.442695, %v1692_v13  ;;  %2701 = vtanh.f32 %v1733_v2 }
 0x636   :  { %2703 = vpow2.f32 %v2515_v44 }
 0x637   :  { %2705 = vpow2.f32 %v2516_v32  ;;  %v4234_v32 = vld [vmem:[#allocation76_spill] sm:$0xff] }
 0x63e   :  { %v2700_v8 = vpop.eup %2699 }
 0x63f   :  { %v2702_v31 = vpop.eup %2701  ;;  %v1781_v19 = vmul.f32 %v2700_v8, %v2692_v55  ;;  %v4235_v55 = vld [vmem:[#allocation77_spill] sm:$0xff]  ;;  %v4239_v8 = vld [vmem:[#allocation16_spill] sm:$0xff] }
 0x640   :  { %v2704_v28 = vpop.eup %2703  ;;  %v1776_v4 = vmul.f32 %v2702_v31, %v2696_v46  ;;  %v4237_v46 = vld [vmem:[#allocation79_spill] sm:$0xff]  ;;  %v4240_v31 = vld [vmem:[#allocation17_spill] sm:$0xff] }
 0x641   :  { %v2706_v27 = vpop.eup %2705  ;;  %v1759_v22 = vadd.f32 1.0, %v2704_v28  ;;  %v3614_v20 = vadd.f32 %v1781_v19, %v1780_v60  ;;  %v4241_v60 = vld [vmem:[#allocation18_spill] sm:$0xff]  ;;  %v4242_v19 = vld [vmem:[#allocation19_spill] sm:$0xff]  ;;  %v4243_v28 = vld [vmem:[#allocation20_spill] sm:$0xff] }
 0x642   :  { %v1760_v14 = vadd.f32 1.0, %v2706_v27  ;;  %v3616_v13 = vadd.f32 %v1776_v4, %v1775_v6  ;;  %v4244_v6 = vld [vmem:[#allocation21_spill] sm:$0xff]  ;;  %v4245_v4 = vld [vmem:[#allocation22_spill] sm:$0xff]  ;;  %v4246_v27 = vld [vmem:[#allocation23_spill] sm:$0xff] }
 0x643   :  { %2707 = vrcp.f32 %v1759_v22  ;;  %v4247_v22 = vld [vmem:[#allocation24_spill] sm:$0xff] }
 0x644   :  { %2709 = vtanh.f32 %v3614_v20 }
 0x645   :  { %2711 = vrcp.f32 %v1760_v14  ;;  %v4248_v14 = vld [vmem:[#allocation25_spill] sm:$0xff] }
 0x646   :  { %2713 = vtanh.f32 %v3616_v13 }
 0x64d   :  { %v2708_v2 = vpop.eup %2707 }
 0x64e   :  { %v2710_v56 = vpop.eup %2709 }
 0x64f   :  { %v2712_v54 = vpop.eup %2711  ;;  %v1784_v3 = vmul.f32 %v2710_v56, %v2708_v2  ;;  %v4249_v2 = vld [vmem:[#allocation26_spill] sm:$0xff]  ;;  %v4250_v56 = vld [vmem:[#allocation27_spill] sm:$0xff] }
 0x650   :  { %v2714_v44 = vpop.eup %2713 }
 0x651   :  { %v1779_v1 = vmul.f32 %v2714_v44, %v2712_v54  ;;  %v4251_v54 = vld [vmem:[#allocation28_spill] sm:$0xff]  ;;  %v4253_v44 = vld [vmem:[#allocation30_spill] sm:$0xff] }
 0x653   :  { %v1785_v35 = vadd.f32 %v1784_v3, %v1779_v1  ;;  %v4252_v3 = vld [vmem:[#allocation29_spill] sm:$0xff]  ;;  %v4254_v1 = vld [vmem:[#allocation31_spill] sm:$0xff] }
 0x655   :  { %v1786_v62 = vpack.c.bf16 %v1785_v35, %v1785_v35  ;;  %v4255_v35 = vld [vmem:[#allocation32_spill] sm:$0xff] }
 0x657   :  { %1820 = vmatmul.mubr.bf16.vlgmr.msra.gmra.mrb[40].mxu0 %v1786_v62  ;;  %1861 = vmatmul.mubr.bf16.vlgmr.msra.gmra.mrb[40].mxu1 %v1786_v62 }
 0x658   :  { %1870 = vmatpush1.bf16.msra.mxu0 %v4071_v12  ;;  %1911 = vmatpush1.bf16.msra.mxu1 %v4072_v23 }
 0x659   :  { %1871 = vmatprep.subr.bf16.mxu0 %v4073_v57  ;;  %1912 = vmatprep.subr.bf16.mxu1 %v4074_v53 }
 0x65a   :  { %1901 = vmatprep.mubr.bf16.mxu0 %v4046_v33  ;;  %1942 = vmatprep.mubr.bf16.mxu1 %v4046_v33 }
 0x65c   :  { %1872 = vmatpush1.bf16.msra.mxu0 %v4075_v15  ;;  %1913 = vmatpush1.bf16.msra.mxu1 %v4076_v18 }
 0x65d   :  { %1873 = vmatprep.subr.bf16.mxu0 %v4077_v16  ;;  %1914 = vmatprep.subr.bf16.mxu1 %v4078_v24 }
 0x660   :  { %1874 = vmatpush1.bf16.msra.mxu0 %v4079_v5  ;;  %1915 = vmatpush1.bf16.msra.mxu1 %v4080_v51 }
 0x661   :  { %1875 = vmatprep.subr.bf16.mxu0 %v4081_v50  ;;  %1916 = vmatprep.subr.bf16.mxu1 %v4082_v43 }
 0x664   :  { %1876 = vmatpush1.bf16.msra.mxu0 %v4083_v7  ;;  %1917 = vmatpush1.bf16.msra.mxu1 %v4084_v41 }
 0x665   :  { %1877 = vmatprep.subr.bf16.mxu0 %v4085_v25  ;;  %1918 = vmatprep.subr.bf16.mxu1 %v4086_v45 }
 0x668   :  { %1878 = vmatpush1.bf16.msra.mxu0 %v3135_v26  ;;  %1919 = vmatpush1.bf16.msra.mxu1 %v3137_v0 }
 0x669   :  { %1879 = vmatprep.subr.bf16.mxu0 %v3141_v21  ;;  %1920 = vmatprep.subr.bf16.mxu1 %v4087_v29 }
 0x66c   :  { %1880 = vmatpush1.bf16.msra.mxu0 %v4088_v58  ;;  %1921 = vmatpush1.bf16.msra.mxu1 %v3149_v59 }
 0x66d   :  { %1881 = vmatprep.subr.bf16.mxu0 %v3153_v61  ;;  %1922 = vmatprep.subr.bf16.mxu1 %v3155_v9 }
 0x670   :  { %1882 = vmatpush1.bf16.msra.mxu0 %v3159_v34  ;;  %1923 = vmatpush1.bf16.msra.mxu1 %v4234_v32 }
 0x671   :  { %1883 = vmatprep.subr.bf16.mxu0 %v4235_v55  ;;  %1924 = vmatprep.subr.bf16.mxu1 %v4236_v52 }
 0x674   :  { %1884 = vmatpush1.bf16.msra.mxu0 %v4237_v46  ;;  %1925 = vmatpush1.bf16.msra.mxu1 %v4238_v39 }
 0x675   :  { %2001 = vmatprep.subr.bf16.mxu0 %v4239_v8  ;;  %2042 = vmatprep.subr.bf16.mxu1 %v4240_v31 }
 0x677   :  { %1902 = vmatmul.mubr.bf16.vlgmr.msra.gmra.mrb[44].mxu0 %v1786_v62  ;;  %1943 = vmatmul.mubr.bf16.vlgmr.msra.gmra.mrb[44].mxu1 %v1786_v62  ;;  %v4256_v62 = vld [vmem:[#allocation33_spill] sm:$0xff] }
 0x678   :  { %2002 = vmatpush1.bf16.msra.mxu0 %v4241_v60  ;;  %2043 = vmatpush1.bf16.msra.mxu1 %v4242_v19 }
 0x679   :  { %2003 = vmatprep.subr.bf16.mxu0 %v4243_v28  ;;  %2044 = vmatprep.subr.bf16.mxu1 %v4244_v6 }
 0x67a   :  { %2033 = vmatprep.mubr.bf16.mxu0 %v4046_v33  ;;  %2074 = vmatprep.mubr.bf16.mxu1 %v4046_v33 }
 0x67c   :  { %2004 = vmatpush1.bf16.msra.mxu0 %v4245_v4  ;;  %2045 = vmatpush1.bf16.msra.mxu1 %v4246_v27  ;;  %v4257_v27 = vld [vmem:[#allocation34_spill] sm:$0xff] }
 0x67d   :  { %2005 = vmatprep.subr.bf16.mxu0 %v4247_v22  ;;  %2046 = vmatprep.subr.bf16.mxu1 %v4248_v14  ;;  %v4258_v22 = vld [vmem:[#allocation35_spill] sm:$0xff]  ;;  %v4259_v14 = vld [vmem:[#allocation36_spill] sm:$0xff] }
 0x680   :  { %2006 = vmatpush1.bf16.msra.mxu0 %v4249_v2  ;;  %2047 = vmatpush1.bf16.msra.mxu1 %v4250_v56  ;;  %v4260_v2 = vld [vmem:[#allocation38_spill] sm:$0xff]  ;;  %v4261_v56 = vld [vmem:[#allocation37_spill] sm:$0xff] }
 0x681   :  { %2007 = vmatprep.subr.bf16.mxu0 %v4251_v54  ;;  %2048 = vmatprep.subr.bf16.mxu1 %v4252_v3  ;;  %v4262_v54 = vld [vmem:[#allocation39_spill] sm:$0xff]  ;;  %v4263_v3 = vld [vmem:[#allocation40_spill] sm:$0xff] }
 0x684   :  { %2008 = vmatpush1.bf16.msra.mxu0 %v4253_v44  ;;  %2049 = vmatpush1.bf16.msra.mxu1 %v4254_v1  ;;  %v4264_v44 = vld [vmem:[#allocation41_spill] sm:$0xff]  ;;  %v4265_v1 = vld [vmem:[#allocation42_spill] sm:$0xff] }
 0x685   :  { %2009 = vmatprep.subr.bf16.mxu0 %v4255_v35  ;;  %2050 = vmatprep.subr.bf16.mxu1 %v4256_v62  ;;  %v4266_v35 = vld [vmem:[#allocation43_spill] sm:$0xff]  ;;  %v4267_v62 = vld [vmem:[#allocation44_spill] sm:$0xff] }
 0x688   :  { %2010 = vmatpush1.bf16.msra.mxu0 %v4257_v27  ;;  %2051 = vmatpush1.bf16.msra.mxu1 %v4258_v22  ;;  %v4268_v27 = vld [vmem:[#allocation45_spill] sm:$0xff]  ;;  %v4269_v22 = vld [vmem:[#allocation46_spill] sm:$0xff] }
 0x689   :  { %2011 = vmatprep.subr.bf16.mxu0 %v4259_v14  ;;  %2052 = vmatprep.subr.bf16.mxu1 %v4260_v2  ;;  %v4270_v14 = vld [vmem:[#allocation47_spill] sm:$0xff]  ;;  %v4271_v2 = vld [vmem:[#allocation48_spill] sm:$0xff] }
 0x68c   :  { %2012 = vmatpush1.bf16.msra.mxu0 %v4261_v56  ;;  %2053 = vmatpush1.bf16.msra.mxu1 %v4262_v54  ;;  %v4272_v56 = vld [vmem:[#allocation49_spill] sm:$0xff]  ;;  %v330_v54 = vpop.permute.xlu0 %329 }
 0x68d   :  { %2013 = vmatprep.subr.bf16.mxu0 %v4263_v3  ;;  %2054 = vmatprep.subr.bf16.mxu1 %v4264_v44  ;;  %v4273_v3 = vld [vmem:[#allocation52_spill] sm:$0xff] }
 0x68e   :  { %v332_v4 = vmul.f32 %v330_v54, %v4273_v3 }
 0x690   :  { %2014 = vmatpush1.bf16.msra.mxu0 %v4265_v1  ;;  %2055 = vmatpush1.bf16.msra.mxu1 %v4266_v35  ;;  %v4274_v1 = vld [vmem:[#allocation53_spill] sm:$0xff] }
 0x691   :  { %2015 = vmatprep.subr.bf16.mxu0 %v4267_v62  ;;  %2056 = vmatprep.subr.bf16.mxu1 %v4268_v27  ;;  %v334_v28 = vmul.f32 %v330_v54, %v4274_v1  ;;  %v4275_v62 = vld [vmem:[#allocation9_spill] sm:$0xff] }
 0x692   :  { %v333_v60 = vmul.f32 %v330_v54, %v4275_v62 }
 0x694   :  { %2016 = vmatpush1.bf16.msra.mxu0 %v4269_v22  ;;  %2057 = vmatpush1.bf16.msra.mxu1 %v4270_v14  ;;  %v335_v22 = vmul.f32 %v330_v54, %v4149_v40  ;;  %v341_v3 = vadd.f32 %v333_v60, %v4104_v38  ;;  %v336_v60 = vmul.f32 %v330_v54, %v4106_v47 }
 0x695   :  { %2083 = vmatprep.subr.bf16.mxu0 %v4271_v2  ;;  %2124 = vmatprep.subr.bf16.mxu1 %v4272_v56  ;;  %v340_v2 = vadd.f32 %v332_v4, %v3058_v10  ;;  %v342_v56 = vadd.f32 %v334_v28, %v4103_v11 }
 0x696   :  { %v343_v1 = vadd.f32 %v335_v22, %v4105_v36 }
 0x72a   :  { %v1821_v44 = vpop.f32.mrb[40].mxu0  ;;  %v1862_v6 = vpop.f32.mrb[40].mxu1 }
 0x72b   :  { %v1823_v35 = vpop.f32.mrb[41].mxu0  ;;  %v1864_v19 = vpop.f32.mrb[41].mxu1  ;;  %v1822_v39 = vadd.f32 %v1821_v44, %v340_v2  ;;  %v1863_v46 = vadd.f32 %v1862_v6, %v342_v56  ;;  %v338_v6 = vmul.f32 %v330_v54, %v4107_v63 }
 0x72c   :  { %v1825_v27 = vpop.f32.mrb[42].mxu0  ;;  %v1866_v31 = vpop.f32.mrb[42].mxu1  ;;  %v1824_v52 = vadd.f32 %v1823_v35, %v341_v3  ;;  %v1865_v55 = vadd.f32 %v1864_v19, %v343_v1  ;;  %v337_v19 = vmul.f32 %v330_v54, %v4108_v48 }
 0x72d   :  { %v1826_v14 = vpop.f32.mrb[43].mxu0  ;;  %v1867_v8 = vpop.f32.mrb[43].mxu1  ;;  %v2517_v32 = vmul.f32 -1.442695, %v1822_v39  ;;  %v2519_v62 = vmul.f32 -1.442695, %v1863_v46  ;;  %v339_v46 = vmul.f32 %v330_v54, %v4065_v37  ;;  %v346_v39 = vadd.f32 %v338_v6, %v4150_v30 }
 0x72e   :  { %v2518_v27 = vmul.f32 -1.442695, %v1824_v52  ;;  %v2520_v31 = vmul.f32 -1.442695, %v1865_v55  ;;  %v345_v44 = vadd.f32 %v337_v19, %v4068_v42 }
 0x72f   :  { %2715 = vpow2.f32 %v2517_v32  ;;  %v344_v32 = vadd.f32 %v336_v60, %v4066_v17  ;;  %v347_v1 = vadd.f32 %v339_v46, %v4069_v49 }
 0x730   :  { %2717 = vpow2.f32 %v2519_v62 }
 0x731   :  { %2719 = vpow2.f32 %v2518_v27 }
 0x732   :  { %2721 = vpow2.f32 %v2520_v31 }
 0x739   :  { %v2716_v8 = vpop.eup %2715 }
 0x73a   :  { %v2718_v4 = vpop.eup %2717  ;;  %v1969_v2 = vadd.f32 1.0, %v2716_v8 }
 0x73b   :  { %v2720_v14 = vpop.eup %2719  ;;  %v1971_v22 = vadd.f32 1.0, %v2718_v4 }
 0x73c   :  { %v2722_v28 = vpop.eup %2721  ;;  %v1970_v52 = vadd.f32 1.0, %v2720_v14  ;;  %2723 = vrcp.f32 %v1969_v2 }
 0x73d   :  { %v1972_v55 = vadd.f32 1.0, %v2722_v28  ;;  %2725 = vrcp.f32 %v1971_v22 }
 0x73e   :  { %2727 = vrcp.f32 %v1970_v52 }
 0x73f   :  { %2729 = vrcp.f32 %v1972_v55 }
 0x746   :  { %v2724_v22 = vpop.eup %2723 }
 0x747   :  { %v2726_v19 = vpop.eup %2725 }
 0x748   :  { %v2728_v46 = vpop.eup %2727  ;;  %v1994_v55 = vmul.f32 %v2726_v19, %v3614_v20  ;;  %v4278_v19 = vld [vmem:[#allocation78_spill] sm:$0xff] }
 0x749   :  { %v2730_v52 = vpop.eup %2729 }
 0x74a   :  { %v1903_v56 = vpop.f32.mrb[44].mxu0  ;;  %v1944_v3 = vpop.f32.mrb[44].mxu1 }
 0x74b   :  { %v1904_v35 = vadd.f32 %v1903_v56, %v344_v32  ;;  %v1945_v62 = vadd.f32 %v1944_v3, %v346_v39  ;;  %v1905_v27 = vpop.f32.mrb[45].mxu0  ;;  %v1946_v31 = vpop.f32.mrb[45].mxu1 }
 0x74c   :  { %v1906_v54 = vadd.f32 %v1905_v27, %v345_v44  ;;  %v1947_v8 = vadd.f32 %v1946_v31, %v347_v1  ;;  %v1907_v4 = vpop.f32.mrb[46].mxu0  ;;  %v1948_v14 = vpop.f32.mrb[46].mxu1  ;;  %v1989_v44 = vmul.f32 %v2730_v52, %v3616_v13  ;;  %v4280_v52 = vld [vmem:[#allocation80_spill] sm:$0xff] }
 0x74d   :  { %v2521_v28 = vmul.f32 -1.442695, %v1904_v35  ;;  %2731 = vtanh.f32 %v1945_v62  ;;  %v1908_v2 = vpop.f32.mrb[47].mxu0  ;;  %v1949_v60 = vpop.f32.mrb[47].mxu1 }
 0x74e   :  { %v2522_v6 = vmul.f32 -1.442695, %v1906_v54  ;;  %2733 = vtanh.f32 %v1947_v8 }
 0x74f   :  { %2735 = vpow2.f32 %v2521_v28 }
 0x750   :  { %2737 = vpow2.f32 %v2522_v6  ;;  %v4276_v6 = vld [vmem:[#allocation76_spill] sm:$0xff] }
 0x757   :  { %v2732_v32 = vpop.eup %2731 }
 0x758   :  { %v2734_v39 = vpop.eup %2733  ;;  %v1995_v56 = vmul.f32 %v2732_v32, %v2724_v22  ;;  %v4277_v22 = vld [vmem:[#allocation77_spill] sm:$0xff]  ;;  %v4281_v32 = vld [vmem:[#allocation16_spill] sm:$0xff] }
 0x759   :  { %v2736_v3 = vpop.eup %2735  ;;  %v1990_v1 = vmul.f32 %v2734_v39, %v2728_v46  ;;  %v4279_v46 = vld [vmem:[#allocation79_spill] sm:$0xff]  ;;  %v4282_v39 = vld [vmem:[#allocation17_spill] sm:$0xff] }
 0x75a   :  { %v2738_v35 = vpop.eup %2737  ;;  %v1973_v62 = vadd.f32 1.0, %v2736_v3  ;;  %v3706_v27 = vadd.f32 %v1995_v56, %v1994_v55  ;;  %v4283_v55 = vld [vmem:[#allocation18_spill] sm:$0xff]  ;;  %v4284_v56 = vld [vmem:[#allocation19_spill] sm:$0xff]  ;;  %v4285_v3 = vld [vmem:[#allocation20_spill] sm:$0xff] }
 0x75b   :  { %v1974_v31 = vadd.f32 1.0, %v2738_v35  ;;  %v3708_v54 = vadd.f32 %v1990_v1, %v1989_v44  ;;  %v4286_v44 = vld [vmem:[#allocation21_spill] sm:$0xff]  ;;  %v4287_v1 = vld [vmem:[#allocation22_spill] sm:$0xff]  ;;  %v4288_v35 = vld [vmem:[#allocation23_spill] sm:$0xff] }
 0x75c   :  { %2739 = vrcp.f32 %v1973_v62  ;;  %v4289_v62 = vld [vmem:[#allocation24_spill] sm:$0xff] }
 0x75d   :  { %2741 = vtanh.f32 %v3706_v27 }
 0x75e   :  { %2743 = vrcp.f32 %v1974_v31  ;;  %v4290_v31 = vld [vmem:[#allocation25_spill] sm:$0xff] }
 0x75f   :  { %2745 = vtanh.f32 %v3708_v54 }
 0x766   :  { %v2740_v8 = vpop.eup %2739 }
 0x767   :  { %v2742_v20 = vpop.eup %2741 }
 0x768   :  { %v2744_v4 = vpop.eup %2743  ;;  %v1998_v14 = vmul.f32 %v2742_v20, %v2740_v8  ;;  %v4291_v8 = vld [vmem:[#allocation26_spill] sm:$0xff]  ;;  %v4292_v20 = vld [vmem:[#allocation27_spill] sm:$0xff] }
 0x769   :  { %v2746_v28 = vpop.eup %2745 }
 0x76a   :  { %v1993_v13 = vmul.f32 %v2746_v28, %v2744_v4  ;;  %v4293_v4 = vld [vmem:[#allocation28_spill] sm:$0xff]  ;;  %v4295_v28 = vld [vmem:[#allocation30_spill] sm:$0xff] }
 0x76c   :  { %v1999_v2 = vadd.f32 %v1998_v14, %v1993_v13  ;;  %v4294_v14 = vld [vmem:[#allocation29_spill] sm:$0xff]  ;;  %v4296_v13 = vld [vmem:[#allocation31_spill] sm:$0xff] }
 0x76e   :  { %v2000_v60 = vpack.c.bf16 %v1999_v2, %v1999_v2  ;;  %v4297_v2 = vld [vmem:[#allocation32_spill] sm:$0xff] }
 0x770   :  { %2034 = vmatmul.mubr.bf16.vlgmr.msra.gmra.mrb[48].mxu0 %v2000_v60  ;;  %2075 = vmatmul.mubr.bf16.vlgmr.msra.gmra.mrb[48].mxu1 %v2000_v60 }
 0x771   :  { %2084 = vmatpush1.bf16.msra.mxu0 %v4071_v12  ;;  %2125 = vmatpush1.bf16.msra.mxu1 %v4072_v23 }
 0x772   :  { %2085 = vmatprep.subr.bf16.mxu0 %v4073_v57  ;;  %2126 = vmatprep.subr.bf16.mxu1 %v4074_v53 }
 0x773   :  { %2115 = vmatprep.mubr.bf16.mxu0 %v4046_v33  ;;  %2156 = vmatprep.mubr.bf16.mxu1 %v4046_v33 }
 0x775   :  { %2086 = vmatpush1.bf16.msra.mxu0 %v4075_v15  ;;  %2127 = vmatpush1.bf16.msra.mxu1 %v4076_v18 }
 0x776   :  { %2087 = vmatprep.subr.bf16.mxu0 %v4077_v16  ;;  %2128 = vmatprep.subr.bf16.mxu1 %v4078_v24 }
 0x779   :  { %2088 = vmatpush1.bf16.msra.mxu0 %v4079_v5  ;;  %2129 = vmatpush1.bf16.msra.mxu1 %v4080_v51 }
 0x77a   :  { %2089 = vmatprep.subr.bf16.mxu0 %v4081_v50  ;;  %2130 = vmatprep.subr.bf16.mxu1 %v4082_v43 }
 0x77d   :  { %2090 = vmatpush1.bf16.msra.mxu0 %v4083_v7  ;;  %2131 = vmatpush1.bf16.msra.mxu1 %v4084_v41 }
 0x77e   :  { %2091 = vmatprep.subr.bf16.mxu0 %v4085_v25  ;;  %2132 = vmatprep.subr.bf16.mxu1 %v4086_v45 }
 0x781   :  { %2092 = vmatpush1.bf16.msra.mxu0 %v3135_v26  ;;  %2133 = vmatpush1.bf16.msra.mxu1 %v3137_v0 }
 0x782   :  { %2093 = vmatprep.subr.bf16.mxu0 %v3141_v21  ;;  %2134 = vmatprep.subr.bf16.mxu1 %v4087_v29 }
 0x785   :  { %2094 = vmatpush1.bf16.msra.mxu0 %v4088_v58  ;;  %2135 = vmatpush1.bf16.msra.mxu1 %v3149_v59 }
 0x786   :  { %2095 = vmatprep.subr.bf16.mxu0 %v3153_v61  ;;  %2136 = vmatprep.subr.bf16.mxu1 %v3155_v9 }
 0x789   :  { %2096 = vmatpush1.bf16.msra.mxu0 %v3159_v34  ;;  %2137 = vmatpush1.bf16.msra.mxu1 %v4276_v6 }
 0x78a   :  { %2097 = vmatprep.subr.bf16.mxu0 %v4277_v22  ;;  %2138 = vmatprep.subr.bf16.mxu1 %v4278_v19 }
 0x78d   :  { %2098 = vmatpush1.bf16.msra.mxu0 %v4279_v46  ;;  %2139 = vmatpush1.bf16.msra.mxu1 %v4280_v52 }
 0x78e   :  { %2215 = vmatprep.subr.bf16.mxu0 %v4281_v32  ;;  %2255 = vmatprep.subr.bf16.mxu1 %v4282_v39  ;;  %v4299_v32 = vld [vmem:[#allocation34_spill] sm:$0xff]  ;;  %v4300_v39 = vld [vmem:[#allocation35_spill] sm:$0xff] }
 0x790   :  { %2116 = vmatmul.mubr.bf16.vlgmr.msra.gmra.mrb[52].mxu0 %v2000_v60  ;;  %2157 = vmatmul.mubr.bf16.vlgmr.msra.gmra.mrb[52].mxu1 %v2000_v60  ;;  %v4298_v60 = vld [vmem:[#allocation33_spill] sm:$0xff] }
 0x791   :  { %2216 = vmatpush1.bf16.msra.mxu0 %v4283_v55  ;;  %2256 = vmatpush1.bf16.msra.mxu1 %v4284_v56  ;;  %v4301_v55 = vld [vmem:[#allocation36_spill] sm:$0xff]  ;;  %v4302_v56 = vld [vmem:[#allocation38_spill] sm:$0xff] }
 0x792   :  { %2217 = vmatprep.subr.bf16.mxu0 %v4285_v3  ;;  %2257 = vmatprep.subr.bf16.mxu1 %v4286_v44  ;;  %v4303_v3 = vld [vmem:[#allocation37_spill] sm:$0xff]  ;;  %v4304_v44 = vld [vmem:[#allocation39_spill] sm:$0xff] }
 0x793   :  { %2247 = vmatprep.mubr.bf16.mxu0 %v4046_v33  ;;  %2287 = vmatprep.mubr.bf16.mxu1 %v4046_v33 }
 0x795   :  { %2218 = vmatpush1.bf16.msra.mxu0 %v4287_v1  ;;  %2258 = vmatpush1.bf16.msra.mxu1 %v4288_v35  ;;  %v4305_v1 = vld [vmem:[#allocation40_spill] sm:$0xff]  ;;  %v4306_v35 = vld [vmem:[#allocation41_spill] sm:$0xff] }
 0x796   :  { %2219 = vmatprep.subr.bf16.mxu0 %v4289_v62  ;;  %2259 = vmatprep.subr.bf16.mxu1 %v4290_v31  ;;  %v4307_v62 = vld [vmem:[#allocation42_spill] sm:$0xff]  ;;  %v4308_v31 = vld [vmem:[#allocation43_spill] sm:$0xff] }
 0x799   :  { %2220 = vmatpush1.bf16.msra.mxu0 %v4291_v8  ;;  %2260 = vmatpush1.bf16.msra.mxu1 %v4292_v20  ;;  %v4309_v8 = vld [vmem:[#allocation44_spill] sm:$0xff]  ;;  %v4310_v20 = vld [vmem:[#allocation45_spill] sm:$0xff] }
 0x79a   :  { %2221 = vmatprep.subr.bf16.mxu0 %v4293_v4  ;;  %2261 = vmatprep.subr.bf16.mxu1 %v4294_v14  ;;  %v4311_v4 = vld [vmem:[#allocation46_spill] sm:$0xff]  ;;  %v4312_v14 = vld [vmem:[#allocation47_spill] sm:$0xff] }
 0x79d   :  { %2222 = vmatpush1.bf16.msra.mxu0 %v4295_v28  ;;  %2262 = vmatpush1.bf16.msra.mxu1 %v4296_v13  ;;  %v4313_v28 = vld [vmem:[#allocation48_spill] sm:$0xff]  ;;  %v4314_v13 = vld [vmem:[#allocation49_spill] sm:$0xff] }
 0x79e   :  { %2223 = vmatprep.subr.bf16.mxu0 %v4297_v2  ;;  %2263 = vmatprep.subr.bf16.mxu1 %v4298_v60  ;;  %v353_v2 = vpop.permute.xlu1 %352  ;;  %v4315_v60 = vld [vmem:[#allocation52_spill] sm:$0xff] }
 0x7a1   :  { %2224 = vmatpush1.bf16.msra.mxu0 %v4299_v32  ;;  %2264 = vmatpush1.bf16.msra.mxu1 %v4300_v39  ;;  %v355_v32 = vmul.f32 %v353_v2, %v4315_v60 }
 0x7a2   :  { %2225 = vmatprep.subr.bf16.mxu0 %v4301_v55  ;;  %2265 = vmatprep.subr.bf16.mxu1 %v4302_v56  ;;  %v4316_v56 = vld [vmem:[#allocation53_spill] sm:$0xff] }
 0x7a5   :  { %2226 = vmatpush1.bf16.msra.mxu0 %v4303_v3  ;;  %2266 = vmatpush1.bf16.msra.mxu1 %v4304_v44  ;;  %v357_v3 = vmul.f32 %v353_v2, %v4316_v56 }
 0x7a6   :  { %2227 = vmatprep.subr.bf16.mxu0 %v4305_v1  ;;  %2267 = vmatprep.subr.bf16.mxu1 %v4306_v35  ;;  %v4317_v35 = vld [vmem:[#allocation9_spill] sm:$0xff] }
 0x7a9   :  { %2228 = vmatpush1.bf16.msra.mxu0 %v4307_v62  ;;  %2268 = vmatpush1.bf16.msra.mxu1 %v4308_v31  ;;  %v356_v62 = vmul.f32 %v353_v2, %v4317_v35 }
 0x7aa   :  { %2229 = vmatprep.subr.bf16.mxu0 %v4309_v8  ;;  %2269 = vmatprep.subr.bf16.mxu1 %v4310_v20  ;;  %v358_v20 = vmul.f32 %v353_v2, %v4149_v40 }
 0x7ab   :  { %v364_v60 = vadd.f32 %v356_v62, %v4104_v38 }
 0x7ac   :  { %v366_v56 = vadd.f32 %v358_v20, %v4105_v36 }
 0x7ad   :  { %2230 = vmatpush1.bf16.msra.mxu0 %v4311_v4  ;;  %2270 = vmatpush1.bf16.msra.mxu1 %v4312_v14 }
 0x7ae   :  { %2295 = vmatprep.subr.bf16.mxu0 %v4313_v28  ;;  %2335 = vmatprep.subr.bf16.mxu1 %v4314_v13  ;;  %v363_v28 = vadd.f32 %v355_v32, %v3058_v10  ;;  %v365_v13 = vadd.f32 %v357_v3, %v4103_v11  ;;  %v359_v3 = vmul.f32 %v353_v2, %v4106_v47 }
 0x843   :  { %v2035_v39 = vpop.f32.mrb[48].mxu0  ;;  %v2076_v55 = vpop.f32.mrb[48].mxu1 }
 0x844   :  { %v2037_v44 = vpop.f32.mrb[49].mxu0  ;;  %v2078_v1 = vpop.f32.mrb[49].mxu1  ;;  %v2036_v52 = vadd.f32 %v2035_v39, %v363_v28  ;;  %v2077_v46 = vadd.f32 %v2076_v55, %v365_v13  ;;  %v361_v55 = vmul.f32 %v353_v2, %v4107_v63 }
 0x845   :  { %v2039_v31 = vpop.f32.mrb[50].mxu0  ;;  %v2080_v8 = vpop.f32.mrb[50].mxu1  ;;  %v2038_v19 = vadd.f32 %v2037_v44, %v364_v60  ;;  %v2079_v22 = vadd.f32 %v2078_v1, %v366_v56  ;;  %v360_v44 = vmul.f32 %v353_v2, %v4108_v48 }
 0x846   :  { %v2040_v4 = vpop.f32.mrb[51].mxu0  ;;  %v2081_v14 = vpop.f32.mrb[51].mxu1  ;;  %v2523_v6 = vmul.f32 -1.442695, %v2036_v52  ;;  %v2525_v35 = vmul.f32 -1.442695, %v2077_v46  ;;  %v362_v46 = vmul.f32 %v353_v2, %v4065_v37  ;;  %v369_v52 = vadd.f32 %v361_v55, %v4150_v30 }
 0x847   :  { %v2524_v31 = vmul.f32 -1.442695, %v2038_v19  ;;  %v2526_v8 = vmul.f32 -1.442695, %v2079_v22  ;;  %v368_v4 = vadd.f32 %v360_v44, %v4068_v42 }
 0x848   :  { %2747 = vpow2.f32 %v2523_v6  ;;  %v367_v6 = vadd.f32 %v359_v3, %v4066_v17  ;;  %v370_v47 = vadd.f32 %v362_v46, %v4069_v49 }
 0x849   :  { %2749 = vpow2.f32 %v2525_v35 }
 0x84a   :  { %2751 = vpow2.f32 %v2524_v31 }
 0x84b   :  { %2753 = vpow2.f32 %v2526_v8 }
 0x852   :  { %v2748_v40 = vpop.eup %2747 }
 0x853   :  { %v2750_v10 = vpop.eup %2749  ;;  %v2183_v39 = vadd.f32 1.0, %v2748_v40 }
 0x854   :  { %v2752_v32 = vpop.eup %2751  ;;  %v2185_v62 = vadd.f32 1.0, %v2750_v10 }
 0x855   :  { %v2754_v11 = vpop.eup %2753  ;;  %v2184_v19 = vadd.f32 1.0, %v2752_v32  ;;  %2755 = vrcp.f32 %v2183_v39 }
 0x856   :  { %v2186_v22 = vadd.f32 1.0, %v2754_v11  ;;  %2757 = vrcp.f32 %v2185_v62 }
 0x857   :  { %2759 = vrcp.f32 %v2184_v19 }
 0x858   :  { %2761 = vrcp.f32 %v2186_v22 }
 0x85f   :  { %v2756_v31 = vpop.eup %2755 }
 0x860   :  { %v2758_v8 = vpop.eup %2757 }
 0x861   :  { %v2760_v40 = vpop.eup %2759  ;;  %v2208_v39 = vmul.f32 %v2758_v8, %v3706_v27 }
 0x862   :  { %v2762_v10 = vpop.eup %2761 }
 0x863   :  { %v2117_v1 = vpop.f32.mrb[52].mxu0  ;;  %v2158_v20 = vpop.f32.mrb[52].mxu1  ;;  %v2203_v62 = vmul.f32 %v2762_v10, %v3708_v54 }
 0x864   :  { %v2118_v63 = vadd.f32 %v2117_v1, %v367_v6  ;;  %v2159_v14 = vadd.f32 %v2158_v20, %v369_v52  ;;  %v2119_v48 = vpop.f32.mrb[53].mxu0  ;;  %v2160_v28 = vpop.f32.mrb[53].mxu1 }
 0x865   :  { %v2120_v37 = vadd.f32 %v2119_v48, %v368_v4  ;;  %v2161_v2 = vadd.f32 %v2160_v28, %v370_v47  ;;  %v2121_v13 = vpop.f32.mrb[54].mxu0  ;;  %v2162_v60 = vpop.f32.mrb[54].mxu1 }
 0x866   :  { %v2527_v17 = vmul.f32 -1.442695, %v2118_v63  ;;  %2763 = vtanh.f32 %v2159_v14  ;;  %v2122_v30 = vpop.f32.mrb[55].mxu0  ;;  %v2163_v56 = vpop.f32.mrb[55].mxu1 }
 0x867   :  { %v2528_v35 = vmul.f32 -1.442695, %v2120_v37  ;;  %2765 = vtanh.f32 %v2161_v2 }
 0x868   :  { %2767 = vpow2.f32 %v2527_v17 }
 0x869   :  { %2769 = vpow2.f32 %v2528_v35 }
 0x870   :  { %v2764_v32 = vpop.eup %2763 }
 0x871   :  { %v2766_v11 = vpop.eup %2765  ;;  %v2209_v3 = vmul.f32 %v2764_v32, %v2756_v31 }
 0x872   :  { %v2768_v55 = vpop.eup %2767  ;;  %v2204_v44 = vmul.f32 %v2766_v11, %v2760_v40  ;;  %v153_v40 = vld [vmem:[#allocation4 + $0x2] ss:$0 sm:$0xff] }
 0x873   :  { %v2770_v46 = vpop.eup %2769  ;;  %v2187_v19 = vadd.f32 1.0, %v2768_v55  ;;  %v2210_v22 = vadd.f32 %v2209_v3, %v2208_v39  ;;  %v154_v39 = vld [vmem:[#allocation4 + $0x3] ss:$0 sm:$0xff] }
 0x874   :  { %v2188_v6 = vadd.f32 1.0, %v2770_v46  ;;  %v3798_v52 = vadd.f32 %v2204_v44, %v2203_v62 }
 0x875   :  { %2771 = vrcp.f32 %v2187_v19 }
 0x876   :  { %2773 = vtanh.f32 %v2210_v22 }
 0x877   :  { %2775 = vrcp.f32 %v2188_v6 }
 0x878   :  { %2777 = vtanh.f32 %v3798_v52 }
 0x87f   :  { %v2772_v1 = vpop.eup %2771 }
 0x880   :  { %v2774_v20 = vpop.eup %2773 }
 0x881   :  { %v2776_v4 = vpop.eup %2775  ;;  %v2212_v27 = vmul.f32 %v2774_v20, %v2772_v1 }
 0x882   :  { %v2778_v47 = vpop.eup %2777 }
 0x883   :  { %v2207_v63 = vmul.f32 %v2778_v47, %v2776_v4 }
 0x885   :  { %v2213_v14 = vadd.f32 %v2212_v27, %v2207_v63 }
 0x887   :  { %v2214_v54 = vpack.c.bf16 %v2213_v14, %v2213_v14 }
 0x889   :  { %2248 = vmatmul.mubr.bf16.vlgmr.msra.gmra.mrb[56].mxu0 %v2214_v54  ;;  %2288 = vmatmul.mubr.bf16.vlgmr.msra.gmra.mrb[56].mxu1 %v2214_v54 }
 0x88a   :  { %2296 = vmatpush1.bf16.msra.mxu0 %v4071_v12  ;;  %2336 = vmatpush1.bf16.msra.mxu1 %v4072_v23  ;;  %v4319_v12 = vld [vmem:[#allocation77_spill] sm:$0xff] }
 0x88b   :  { %2297 = vmatprep.subr.bf16.mxu0 %v4073_v57  ;;  %2337 = vmatprep.subr.bf16.mxu1 %v4074_v53 }
 0x88c   :  { %2327 = vmatprep.mubr.bf16.mxu0 %v4046_v33  ;;  %2367 = vmatprep.mubr.bf16.mxu1 %v4046_v33  ;;  %v4318_v33 = vld [vmem:[#allocation76_spill] sm:$0xff] }
 0x88e   :  { %2298 = vmatpush1.bf16.msra.mxu0 %v4075_v15  ;;  %2338 = vmatpush1.bf16.msra.mxu1 %v4076_v18 }
 0x88f   :  { %2299 = vmatprep.subr.bf16.mxu0 %v4077_v16  ;;  %2339 = vmatprep.subr.bf16.mxu1 %v4078_v24 }
 0x892   :  { %2300 = vmatpush1.bf16.msra.mxu0 %v4079_v5  ;;  %2340 = vmatpush1.bf16.msra.mxu1 %v4080_v51 }
 0x893   :  { %2301 = vmatprep.subr.bf16.mxu0 %v4081_v50  ;;  %2341 = vmatprep.subr.bf16.mxu1 %v4082_v43 }
 0x896   :  { %2302 = vmatpush1.bf16.msra.mxu0 %v4083_v7  ;;  %2342 = vmatpush1.bf16.msra.mxu1 %v4084_v41 }
 0x897   :  { %2303 = vmatprep.subr.bf16.mxu0 %v4085_v25  ;;  %2343 = vmatprep.subr.bf16.mxu1 %v4086_v45 }
 0x89a   :  { %2304 = vmatpush1.bf16.msra.mxu0 %v3135_v26  ;;  %2344 = vmatpush1.bf16.msra.mxu1 %v3137_v0  ;;  %v4320_v26 = vld [vmem:[#allocation78_spill] sm:$0xff]  ;;  %v4321_v0 = vld [vmem:[#allocation79_spill] sm:$0xff] }
 0x89b   :  { %2305 = vmatprep.subr.bf16.mxu0 %v3141_v21  ;;  %2345 = vmatprep.subr.bf16.mxu1 %v4087_v29  ;;  %v4322_v21 = vld [vmem:[#allocation80_spill] sm:$0xff] }
 0x89e   :  { %2306 = vmatpush1.bf16.msra.mxu0 %v4088_v58  ;;  %2346 = vmatpush1.bf16.msra.mxu1 %v3149_v59 }
 0x89f   :  { %2307 = vmatprep.subr.bf16.mxu0 %v3153_v61  ;;  %2347 = vmatprep.subr.bf16.mxu1 %v3155_v9 }
 0x8a2   :  { %2308 = vmatpush1.bf16.msra.mxu0 %v3159_v34  ;;  %2348 = vmatpush1.bf16.msra.mxu1 %v4318_v33 }
 0x8a3   :  { %2309 = vmatprep.subr.bf16.mxu0 %v4319_v12  ;;  %2349 = vmatprep.subr.bf16.mxu1 %v4320_v26 }
 0x8a6   :  { %2310 = vmatpush1.bf16.msra.mxu0 %v4321_v0  ;;  %2350 = vmatpush1.bf16.msra.mxu1 %v4322_v21 }
 0x8a9   :  { %2328 = vmatmul.mubr.bf16.vlgmr.msra.gmra.mrb[60].mxu0 %v2214_v54  ;;  %2368 = vmatmul.mubr.bf16.vlgmr.msra.gmra.mrb[60].mxu1 %v2214_v54 }
 0x95c   :  { %v2249_v23 = vpop.f32.mrb[56].mxu0  ;;  %v2289_v59 = vpop.f32.mrb[56].mxu1 }
 0x95d   :  { %v2250_v57 = vpop.f32.mrb[57].mxu0  ;;  %v2290_v61 = vpop.f32.mrb[57].mxu1 }
 0x95e   :  { %v2252_v53 = vpop.f32.mrb[58].mxu0  ;;  %v2292_v9 = vpop.f32.mrb[58].mxu1  ;;  %v2291_v18 = vadd.f32 %v2290_v61, %v4105_v36  ;;  %v2251_v16 = vadd.f32 %v2250_v57, %v4104_v38 }
 0x95f   :  { %v2253_v15 = vpop.f32.mrb[59].mxu0  ;;  %v2293_v34 = vpop.f32.mrb[59].mxu1 }
 0x960   :  { %v2530_v24 = vmul.f32 -1.442695, %v2291_v18  ;;  %v2529_v5 = vmul.f32 -1.442695, %v2251_v16 }
 0x962   :  { %2779 = vpow2.f32 %v2530_v24 }
 0x963   :  { %2781 = vpow2.f32 %v2529_v5 }
 0x96c   :  { %v2780_v51 = vpop.eup %2779 }
 0x96d   :  { %v2782_v50 = vpop.eup %2781  ;;  %v2385_v43 = vadd.f32 1.0, %v2780_v51 }
 0x96e   :  { %v2384_v7 = vadd.f32 1.0, %v2782_v50 }
 0x96f   :  { %2783 = vrcp.f32 %v2385_v43 }
 0x970   :  { %2785 = vrcp.f32 %v2384_v7 }
 0x979   :  { %v2784_v13 = vpop.eup %2783 }
 0x97a   :  { %v2786_v60 = vpop.eup %2785  ;;  %v2394_v30 = vmul.f32 %v2784_v13, %v3798_v52 }
 0x97c   :  { %v2329_v41 = vpop.f32.mrb[60].mxu0  ;;  %v2369_v25 = vpop.f32.mrb[60].mxu1 }
 0x97d   :  { %v2330_v45 = vpop.f32.mrb[61].mxu0  ;;  %v2370_v29 = vpop.f32.mrb[61].mxu1 }
 0x97e   :  { %v2331_v58 = vadd.f32 %v2330_v45, %v4068_v42  ;;  %v2371_v48 = vadd.f32 %v2370_v29, %v4069_v49  ;;  %v2332_v36 = vpop.f32.mrb[62].mxu0  ;;  %v2372_v28 = vpop.f32.mrb[62].mxu1 }
 0x97f   :  { %v2333_v38 = vpop.f32.mrb[63].mxu0  ;;  %v2373_v37 = vpop.f32.mrb[63].mxu1 }
 0x980   :  { %v2531_v2 = vmul.f32 -1.442695, %v2331_v58  ;;  %2787 = vtanh.f32 %v2371_v48 }
 0x982   :  { %2789 = vpow2.f32 %v2531_v2 }
 0x98a   :  { %v2788_v17 = vpop.eup %2787 }
 0x98b   :  { %v2395_v56 = vmul.f32 %v2788_v17, %v2786_v60 }
 0x98c   :  { %v2790_v35 = vpop.eup %2789 }
 0x98d   :  { %v2386_v31 = vadd.f32 1.0, %v2790_v35  ;;  %v2396_v8 = vadd.f32 %v2395_v56, %v2394_v30 }
 0x98f   :  { %2791 = vrcp.f32 %v2386_v31 }
 0x990   :  { %2793 = vtanh.f32 %v2396_v8 }
 0x999   :  { %v2792_v49 = vpop.eup %2791 }
 0x99a   :  { %v2794_v42 = vpop.eup %2793 }
 0x99b   :  { %v2398_v10 = vmul.f32 %v2794_v42, %v2792_v49 }
 0x99d   :  { %v2399_v32 = vmul.f32 %v2398_v10, %v153_v40 }
 0x99f   :  { %v2401_v11 = vsel %vm2400_vm0, %v2399_v32, 0.0 }
 0x9a0   :  { %2402 = vadd.xlane.f32.xlu0 %v2401_v11 }
 0xa2d   :  { %v2403_v3 = vpop.xlane.xlu0 %2402 }
 0xa2e   :  { %v2404_v55 = vadd.f32 %v2403_v3, %v154_v39 }
 0xa30   :  { %2406 = vst.msk [vmem:[%s3844_s3] sm:$0x3] %vm2405_vm1, %v2404_v55 }
 0xa31   :  { %2411 = vsyncpa [#allocation3], 1 }
 0xa32   :  { %2412 = vsyncpa [#allocation5], 1 }

</bundles_post_ra>
